<compile_context>
chip_gen: v6e
topology: v6e:2x2x1
jax: 0.10.0
libtpu: 0.0.40
codegen_flags: <defaults>
</compile_context>

<pallas_src>
import functools

import jax
import jax.numpy as jnp
from jax.experimental import pallas as pl
from jax.experimental.pallas import tpu as pltpu


def _round_up(n, m):
    return ((n + m - 1) // m) * m


def _sigmoid_eup(x):
    # Exactly sigmoid(x); tanh form keeps the nonlinearity on the EUP slot.
    return 0.5 * (jnp.tanh(0.5 * x) + 1.0)


def _lstm_chunk_kernel(x_ref, wih_ref, whh_ref, b_ref,
                       out_ref, hn_ref, cn_ref,
                       gx_scr, h_scr, c_scr, *,
                       hidden_pad, chunk, sub, seq_len, mask_tail, mxu_dtype):
    """One grid step == one batch tile x one chunk of `chunk` time steps.

    x_ref:   (Bt, chunk, I)    batch_first input slab (mxu_dtype)
    wih_ref: (I, 4Hp)          W_ih^T  (mxu_dtype, resident / single-buffered)
    whh_ref: (Hp, 4Hp)         W_hh^T  (mxu_dtype, resident / single-buffered)
    b_ref:   (1, 4Hp)          b_ih + b_hh (f32, resident)
    out_ref: (Bt, chunk, Hp)   hidden outputs for this chunk (batch_first)
    hn_ref/cn_ref: (Bt, Hp)    final hidden / cell state (written on last chunk)
    gx_scr:  (Bt, chunk, 4Hp)  f32 scratch holding the hoisted input projection
    h_scr/c_scr: (Bt, Hp)      f32 scratch carrying the recurrent state
    """
    Hp = hidden_pad
    G = 4 * Hp
    c_idx = pl.program_id(1)

    @pl.when(c_idx == 0)
    def _():
        h_scr[...] = jnp.zeros_like(h_scr)
        c_scr[...] = jnp.zeros_like(c_scr)

    Bt = x_ref.shape[0]
    I = x_ref.shape[2]

    whh = whh_ref[...]                                        # (Hp, 4Hp)

    # ---- Hoisted input projection for the whole chunk: one MXU matmul ----
    gx = jnp.dot(x_ref[...].reshape(Bt * chunk, I), wih_ref[...],
                 preferred_element_type=jnp.float32)          # (Bt*chunk, 4Hp)
    gx_scr[...] = (gx + b_ref[...]).reshape(Bt, chunk, G)

    num_sub = chunk // sub

    # ---- Serial recurrence: pl.loop over sub-chunks, bounded static unroll ----
    @pl.loop(0, num_sub)
    def _(s):
        base = pl.multiple_of(s * sub, sub)
        gx_sub = gx_scr[:, pl.ds(base, sub), :]               # (Bt, sub, 4Hp)
        h = h_scr[...]                                        # (Bt, Hp) f32
        c = c_scr[...]                                        # (Bt, Hp) f32
        hs = []
        for j in range(sub):                                  # bounded unroll
            gates = gx_sub[:, j, :] + jnp.dot(
                h.astype(mxu_dtype), whh, preferred_element_type=jnp.float32)
            # PyTorch gate order: input, forget, cell (g), output.
            # Hp is a multiple of 128 => every slice is lane-tile aligned.
            i_g = _sigmoid_eup(gates[:, 0 * Hp:1 * Hp])
            f_g = _sigmoid_eup(gates[:, 1 * Hp:2 * Hp])
            g_g = jnp.tanh(gates[:, 2 * Hp:3 * Hp])
            o_g = _sigmoid_eup(gates[:, 3 * Hp:4 * Hp])
            c_new = f_g * c + i_g * g_g
            h_new = o_g * jnp.tanh(c_new)
            if mask_tail:
                # Padded time steps (t >= seq_len) carry the state through.
                m = (c_idx * chunk + base + j < seq_len).astype(jnp.float32)
                h = m * h_new + (1.0 - m) * h
                c = m * c_new + (1.0 - m) * c
            else:
                h, c = h_new, c_new
            hs.append(h)
        # One lane-dense, sublane-aligned store per sub-chunk (no masked vst).
        out_ref[:, pl.ds(base, sub), :] = (
            jnp.stack(hs, axis=1).astype(out_ref.dtype))
        h_scr[...] = h
        c_scr[...] = c

    @pl.when(c_idx == pl.num_programs(1) - 1)
    def _():
        hn_ref[...] = h_scr[...].astype(hn_ref.dtype)
        cn_ref[...] = c_scr[...].astype(cn_ref.dtype)


def lstm_encoder_forward(x, w_ih, w_hh, b_ih, b_hh, *,
                         mxu_dtype=jnp.bfloat16, max_chunk=128,
                         batch_tiles=1, single_buffer_weights=True):
    """Forward pass of lstm_encoder (nn.LSTM, num_layers=1, batch_first=True).

    x:     (batch, seq, input_size)
    w_ih:  (4H, input_size);  w_hh: (4H, H);  b_ih, b_hh: (4H,)
    Returns: lstm_out (batch, seq, H), (h_n (1, batch, H), c_n (1, batch, H))
    """
    B, S, I = x.shape
    H = w_hh.shape[1]
    dtype = x.dtype

    assert B % batch_tiles == 0, "batch must divide evenly into batch_tiles"
    Bt = B // batch_tiles

    SUB = 8                                   # sub-chunk = bounded unroll depth
    Hp = _round_up(H, 128)                    # lane-align hidden / gate axes
    G = 4 * Hp

    # chunk: multiple of 8, capped by max_chunk; pad S up to a chunk multiple.
    chunk = min(_round_up(max_chunk, SUB), _round_up(S, SUB))
    S_pad = _round_up(S, chunk)
    num_chunks = S_pad // chunk
    mask_tail = S_pad != S

    # ---- one-time (tiny) weight prep: gate-pad H -> Hp, transpose, cast ----
    def pad_gate_rows(w):                     # (4H, K) -> (4Hp, K)
        w4 = w.reshape(4, H, -1)
        return jnp.pad(w4, ((0, 0), (0, Hp - H), (0, 0))).reshape(4 * Hp, -1)

    wih_t = pad_gate_rows(w_ih).T.astype(mxu_dtype)                 # (I, 4Hp)
    whh_t = jnp.pad(pad_gate_rows(w_hh),
                    ((0, 0), (0, Hp - H))).T.astype(mxu_dtype)      # (Hp, 4Hp)
    bias = jnp.pad((b_ih + b_hh).reshape(4, H),
                   ((0, 0), (0, Hp - H))).reshape(1, G).astype(jnp.float32)

    # Stream x in the MXU dtype (halves HBM->VMEM bytes when bf16).
    x_in = x
    if mask_tail:
        x_in = jnp.pad(x_in, ((0, 0), (0, S_pad - S), (0, 0)))
    x_in = x_in.astype(mxu_dtype)

    kernel = functools.partial(
        _lstm_chunk_kernel, hidden_pad=Hp, chunk=chunk, sub=SUB,
        seq_len=S, mask_tail=mask_tail, mxu_dtype=mxu_dtype)

    out_shapes = (
        jax.ShapeDtypeStruct((B, S_pad, Hp), dtype),   # lstm_out (padded)
        jax.ShapeDtypeStruct((B, Hp), dtype),          # h_n (padded)
        jax.ShapeDtypeStruct((B, Hp), dtype),          # c_n (padded)
    )

    # VMEM budget from the actual buffers (x/out double-buffered, weights x1).
    itemsize_x = jnp.dtype(mxu_dtype).itemsize
    itemsize_o = jnp.dtype(dtype).itemsize
    needed = (2 * Bt * chunk * I * itemsize_x            # x chunk blocks
              + 2 * Bt * chunk * Hp * itemsize_o         # out chunk blocks
              + (I + Hp) * G * itemsize_x + G * 4        # weights + bias
              + Bt * chunk * G * 4                       # gx scratch
              + 2 * Bt * Hp * 4                          # h/c carries
              + 2 * 2 * Bt * Hp * itemsize_o)            # hn/cn blocks
    vmem_limit = int(min(64 * 2 ** 20, max(32 * 2 ** 20, 2 * needed)))

    def build(single_buffer):
        resident = ({"pipeline_mode": pl.Buffered(1)} if single_buffer else {})
        grid_spec = pltpu.PrefetchScalarGridSpec(
            num_scalar_prefetch=0,
            grid=(batch_tiles, num_chunks),
            in_specs=[
                pl.BlockSpec((Bt, chunk, I), lambda b, c: (b, c, 0)),   # x
                pl.BlockSpec((I, G), lambda b, c: (0, 0), **resident),  # W_ih^T
                pl.BlockSpec((Hp, G), lambda b, c: (0, 0), **resident), # W_hh^T
                pl.BlockSpec((1, G), lambda b, c: (0, 0), **resident),  # bias
            ],
            out_specs=[
                pl.BlockSpec((Bt, chunk, Hp), lambda b, c: (b, c, 0)),  # out
                pl.BlockSpec((Bt, Hp), lambda b, c: (b, 0)),            # h_n
                pl.BlockSpec((Bt, Hp), lambda b, c: (b, 0)),            # c_n
            ],
            scratch_shapes=[
                pltpu.VMEM((Bt, chunk, G), jnp.float32),   # hoisted projection
                pltpu.VMEM((Bt, Hp), jnp.float32),         # h carry
                pltpu.VMEM((Bt, Hp), jnp.float32),         # c carry
            ],
        )
        return pl.pallas_call(
            kernel,
            out_shape=out_shapes,
            grid_spec=grid_spec,
            compiler_params=pltpu.CompilerParams(
                # batch tiles independent (v7x 2-TC), chunk axis is the recurrence
                dimension_semantics=("parallel", "arbitrary"),
                vmem_limit_bytes=vmem_limit,
            ),
        )

    try:
        outs = build(single_buffer_weights)(x_in, wih_t, whh_t, bias)
        jax.block_until_ready(outs)
    except Exception:
        if not single_buffer_weights:
            raise
        # TODO(synk): pl.Buffered(1) rejected by this jax build; fall back to
        #             default double-buffering for the resident weights.
        outs = build(False)(x_in, wih_t, whh_t, bias)

    out_p, hn_p, cn_p = outs
    lstm_out = out_p[:, :S, :H]
    h_n = hn_p[:, :H][None, :, :]
    c_n = cn_p[:, :H][None, :, :]
    return lstm_out, (h_n, c_n)


def _lstm_reference(x, w_ih, w_hh, b_ih, b_hh):
    """Pure-JAX f32 reference (same math as torch.nn.LSTM, num_layers=1)."""
    B, S, I = x.shape
    H = w_hh.shape[1]

    def step(carry, x_t):
        h, c = carry
        gates = x_t @ w_ih.T + h @ w_hh.T + b_ih + b_hh
        i_g = jax.nn.sigmoid(gates[:, 0 * H:1 * H])
        f_g = jax.nn.sigmoid(gates[:, 1 * H:2 * H])
        g_g = jnp.tanh(gates[:, 2 * H:3 * H])
        o_g = jax.nn.sigmoid(gates[:, 3 * H:4 * H])
        c_new = f_g * c + i_g * g_g
        h_new = o_g * jnp.tanh(c_new)
        return (h_new, c_new), h_new

    h0 = jnp.zeros((B, H), x.dtype)
    c0 = jnp.zeros((B, H), x.dtype)
    (h_n, c_n), outs = jax.lax.scan(step, (h0, c0), jnp.transpose(x, (1, 0, 2)))
    return jnp.transpose(outs, (1, 0, 2)), (h_n[None], c_n[None])


if __name__ == "__main__":
    # Small shapes consistent with the module's forward.
    batch, seq, input_size, hidden_size = 2, 8, 4, 32

    key = jax.random.PRNGKey(0)
    k_x, k_x2, k_wih, k_whh, k_bih, k_bhh = jax.random.split(key, 6)

    bound = 1.0 / jnp.sqrt(jnp.float32(hidden_size))
    x = jax.random.normal(k_x, (batch, seq, input_size), dtype=jnp.float32)
    w_ih = jax.random.uniform(k_wih, (4 * hidden_size, input_size),
                              minval=-bound, maxval=bound, dtype=jnp.float32)
    w_hh = jax.random.uniform(k_whh, (4 * hidden_size, hidden_size),
                              minval=-bound, maxval=bound, dtype=jnp.float32)
    b_ih = jax.random.uniform(k_bih, (4 * hidden_size,),
                              minval=-bound, maxval=bound, dtype=jnp.float32)
    b_hh = jax.random.uniform(k_bhh, (4 * hidden_size,),
                              minval=-bound, maxval=bound, dtype=jnp.float32)

    ref_out, (ref_h, ref_c) = _lstm_reference(x, w_ih, w_hh, b_ih, b_hh)

    # 1) f32 MXU operands: structural/numerical check against the reference.
    out32, (h32, c32) = lstm_encoder_forward(x, w_ih, w_hh, b_ih, b_hh,
                                             mxu_dtype=jnp.float32)
    jax.block_until_ready((out32, h32, c32))
    assert out32.shape == (batch, seq, hidden_size)
    assert h32.shape == (1, batch, hidden_size)
    assert c32.shape == (1, batch, hidden_size)
    assert jnp.allclose(out32, ref_out, atol=1e-4, rtol=1e-4)
    assert jnp.allclose(h32, ref_h, atol=1e-4, rtol=1e-4)
    assert jnp.allclose(c32, ref_c, atol=1e-4, rtol=1e-4)

    # 2) bf16 MXU operands (default fast path): relaxed tolerance, the f32
    #    carry bounds the drift over the sequence.
    out16, (h16, c16) = lstm_encoder_forward(x, w_ih, w_hh, b_ih, b_hh,
                                             mxu_dtype=jnp.bfloat16)
    jax.block_until_ready((out16, h16, c16))
    assert jnp.allclose(out16, ref_out, atol=3e-2, rtol=3e-2)
    assert jnp.allclose(h16, ref_h, atol=3e-2, rtol=3e-2)
    assert jnp.allclose(c16, ref_c, atol=3e-2, rtol=3e-2)

    # 3) Ragged sequence length: exercises the seq padding + tail masking path.
    seq2 = 10
    x2 = jax.random.normal(k_x2, (batch, seq2, input_size), dtype=jnp.float32)
    ref_out2, (ref_h2, ref_c2) = _lstm_reference(x2, w_ih, w_hh, b_ih, b_hh)
    out2, (h2, c2) = lstm_encoder_forward(x2, w_ih, w_hh, b_ih, b_hh,
                                          mxu_dtype=jnp.float32)
    jax.block_until_ready((out2, h2, c2))
    assert out2.shape == (batch, seq2, hidden_size)
    assert jnp.allclose(out2, ref_out2, atol=1e-4, rtol=1e-4)
    assert jnp.allclose(h2, ref_h2, atol=1e-4, rtol=1e-4)
    assert jnp.allclose(c2, ref_c2, atol=1e-4, rtol=1e-4)

    print("KERNEL_OK")
</pallas_src>

<mosaic_0001>
module attributes {stable_mosaic.version = 11 : i64} {
  func.func @_lstm_chunk_kernel(%arg0: i32, %arg1: i32, %arg2: memref<2x8x4xf32, #tpu.memory_space<vmem>>, %arg3: memref<4x512xf32, #tpu.memory_space<vmem>>, %arg4: memref<128x512xf32, #tpu.memory_space<vmem>>, %arg5: memref<1x512xf32, #tpu.memory_space<vmem>>, %arg6: memref<2x8x128xf32, #tpu.memory_space<vmem>>, %arg7: memref<2x128xf32, #tpu.memory_space<vmem>>, %arg8: memref<2x128xf32, #tpu.memory_space<vmem>>, %arg9: memref<2x8x512xf32, #tpu.memory_space<vmem>>, %arg10: memref<2x128xf32, #tpu.memory_space<vmem>>, %arg11: memref<2x128xf32, #tpu.memory_space<vmem>>) attributes {dimension_semantics = [#tpu.dimension_semantics<parallel>, #tpu.dimension_semantics<arbitrary>], iteration_bounds = array<i64: 1, 1>, scalar_prefetch = 0 : i64, scratch_operands = 3 : i64, tpu.core_type = #tpu.core_type<tc>, window_params = [{transform_indices = @transform_0, window_bounds = array<i64: 2, 8, 4>}, {pipeline_mode = #tpu.pipeline_mode<synchronous>, transform_indices = @transform_1, window_bounds = array<i64: 4, 512>}, {pipeline_mode = #tpu.pipeline_mode<synchronous>, transform_indices = @transform_2, window_bounds = array<i64: 128, 512>}, {pipeline_mode = #tpu.pipeline_mode<synchronous>, transform_indices = @transform_3, window_bounds = array<i64: 1, 512>}, {transform_indices = @transform_4, window_bounds = array<i64: 2, 8, 128>}, {transform_indices = @transform_5, window_bounds = array<i64: 2, 128>}, {transform_indices = @transform_6, window_bounds = array<i64: 2, 128>}]} {
    %c0_i32 = arith.constant 0 : i32
    %0 = arith.cmpi eq, %arg1, %c0_i32 : i32
    %1 = arith.extui %0 : i1 to i32
    %c0_i32_0 = arith.constant 0 : i32
    %2 = arith.cmpi ne, %1, %c0_i32_0 : i32
    scf.if %2 {
      %cst_109 = arith.constant 0.000000e+00 : f32
      %317 = vector.broadcast %cst_109 : f32 to vector<2x128xf32>
      %c0_110 = arith.constant 0 : index
      %c0_111 = arith.constant 0 : index
      %318 = vector.load %arg10[%c0_110, %c0_111] : memref<2x128xf32, #tpu.memory_space<vmem>>, vector<2x128xf32>
      tpu.vector_store %arg10[%c0_110, %c0_111], %317 {strides = array<i32>} : memref<2x128xf32, #tpu.memory_space<vmem>>, vector<2x128xf32>,
      %cst_112 = arith.constant 0.000000e+00 : f32
      %319 = vector.broadcast %cst_112 : f32 to vector<2x128xf32>
      %c0_113 = arith.constant 0 : index
      %c0_114 = arith.constant 0 : index
      %320 = vector.load %arg11[%c0_113, %c0_114] : memref<2x128xf32, #tpu.memory_space<vmem>>, vector<2x128xf32>
      tpu.vector_store %arg11[%c0_113, %c0_114], %319 {strides = array<i32>} : memref<2x128xf32, #tpu.memory_space<vmem>>, vector<2x128xf32>,
    } else {
    }
    %c0 = arith.constant 0 : index
    %c0_1 = arith.constant 0 : index
    %3 = vector.load %arg4[%c0, %c0_1] : memref<128x512xf32, #tpu.memory_space<vmem>>, vector<128x512xf32>
    %c0_2 = arith.constant 0 : index
    %c0_3 = arith.constant 0 : index
    %c0_4 = arith.constant 0 : index
    %4 = vector.load %arg2[%c0_2, %c0_3, %c0_4] : memref<2x8x4xf32, #tpu.memory_space<vmem>>, vector<2x8x4xf32>
    %5 = vector.shape_cast %4 : vector<2x8x4xf32> to vector<16x4xf32>
    %c0_5 = arith.constant 0 : index
    %c0_6 = arith.constant 0 : index
    %6 = vector.load %arg3[%c0_5, %c0_6] : memref<4x512xf32, #tpu.memory_space<vmem>>, vector<4x512xf32>
    %cst = arith.constant dense<0.000000e+00> : vector<16x512xf32>
    %7 = tpu.matmul %5, %6, %cst {dimension_numbers = #tpu.dot_dimension_numbers<[1], [0], [0], [1], [0, 0, 1, 1], [], []>} : vector<16x4xf32>, vector<4x512xf32>, vector<16x512xf32> -> vector<16x512xf32>
    %c0_7 = arith.constant 0 : index
    %c0_8 = arith.constant 0 : index
    %8 = vector.load %arg5[%c0_7, %c0_8] : memref<1x512xf32, #tpu.memory_space<vmem>>, vector<1x512xf32>
    %9 = vector.broadcast %8 : vector<1x512xf32> to vector<16x512xf32>
    %10 = arith.addf %7, %9 : vector<16x512xf32>
    %11 = vector.shape_cast %10 : vector<16x512xf32> to vector<2x8x512xf32>
    %c0_9 = arith.constant 0 : index
    %c0_10 = arith.constant 0 : index
    %c0_11 = arith.constant 0 : index
    %12 = vector.load %arg9[%c0_9, %c0_10, %c0_11] : memref<2x8x512xf32, #tpu.memory_space<vmem>>, vector<2x8x512xf32>
    tpu.vector_store %arg9[%c0_9, %c0_10, %c0_11], %11 {strides = array<i32>} : memref<2x8x512xf32, #tpu.memory_space<vmem>>, vector<2x8x512xf32>,
    %c0_i32_12 = arith.constant 0 : i32
    %c1_i32 = arith.constant 1 : i32
    %13 = arith.muli %c0_i32_12, %c1_i32 : i32
    %c0_i32_13 = arith.constant 0 : i32
    %14 = arith.addi %c0_i32_13, %13 : i32
    %c8_i32 = arith.constant 8 : i32
    %15 = arith.muli %14, %c8_i32 : i32
    %16 = tpu.assume_multiple %15, 8 : i32
    %c0_14 = arith.constant 0 : index
    %17 = arith.index_cast %16 : i32 to index
    %c0_15 = arith.constant 0 : index
    %18 = vector.load %arg9[%c0_14, %17, %c0_15] : memref<2x8x512xf32, #tpu.memory_space<vmem>>, vector<2x8x512xf32>
    %c0_16 = arith.constant 0 : index
    %c0_17 = arith.constant 0 : index
    %19 = vector.load %arg10[%c0_16, %c0_17] : memref<2x128xf32, #tpu.memory_space<vmem>>, vector<2x128xf32>
    %c0_18 = arith.constant 0 : index
    %c0_19 = arith.constant 0 : index
    %20 = vector.load %arg11[%c0_18, %c0_19] : memref<2x128xf32, #tpu.memory_space<vmem>>, vector<2x128xf32>
    %21 = vector.extract_strided_slice %18 {offsets = [0, 0, 0], sizes = [2, 1, 512], strides = [1, 1, 1]} : vector<2x8x512xf32> to vector<2x1x512xf32>
    %22 = vector.shape_cast %21 : vector<2x1x512xf32> to vector<2x512xf32>
    %cst_20 = arith.constant dense<0.000000e+00> : vector<2x512xf32>
    %23 = tpu.matmul %19, %3, %cst_20 {dimension_numbers = #tpu.dot_dimension_numbers<[1], [0], [0], [1], [0, 0, 1, 1], [], []>} : vector<2x128xf32>, vector<128x512xf32>, vector<2x512xf32> -> vector<2x512xf32>
    %24 = arith.addf %22, %23 : vector<2x512xf32>
    %25 = vector.extract_strided_slice %24 {offsets = [0, 0], sizes = [2, 128], strides = [1, 1]} : vector<2x512xf32> to vector<2x128xf32>
    %cst_21 = arith.constant 5.000000e-01 : f32
    %26 = vector.broadcast %cst_21 : f32 to vector<2x128xf32>
    %27 = arith.mulf %26, %25 : vector<2x128xf32>
    %28 = math.tanh %27 : vector<2x128xf32>
    %cst_22 = arith.constant 1.000000e+00 : f32
    %29 = vector.broadcast %cst_22 : f32 to vector<2x128xf32>
    %30 = arith.addf %28, %29 : vector<2x128xf32>
    %cst_23 = arith.constant 5.000000e-01 : f32
    %31 = vector.broadcast %cst_23 : f32 to vector<2x128xf32>
    %32 = arith.mulf %31, %30 : vector<2x128xf32>
    %33 = vector.extract_strided_slice %24 {offsets = [0, 128], sizes = [2, 128], strides = [1, 1]} : vector<2x512xf32> to vector<2x128xf32>
    %cst_24 = arith.constant 5.000000e-01 : f32
    %34 = vector.broadcast %cst_24 : f32 to vector<2x128xf32>
    %35 = arith.mulf %34, %33 : vector<2x128xf32>
    %36 = math.tanh %35 : vector<2x128xf32>
    %cst_25 = arith.constant 1.000000e+00 : f32
    %37 = vector.broadcast %cst_25 : f32 to vector<2x128xf32>
    %38 = arith.addf %36, %37 : vector<2x128xf32>
    %cst_26 = arith.constant 5.000000e-01 : f32
    %39 = vector.broadcast %cst_26 : f32 to vector<2x128xf32>
    %40 = arith.mulf %39, %38 : vector<2x128xf32>
    %41 = vector.extract_strided_slice %24 {offsets = [0, 256], sizes = [2, 128], strides = [1, 1]} : vector<2x512xf32> to vector<2x128xf32>
    %42 = math.tanh %41 : vector<2x128xf32>
    %43 = vector.extract_strided_slice %24 {offsets = [0, 384], sizes = [2, 128], strides = [1, 1]} : vector<2x512xf32> to vector<2x128xf32>
    %cst_27 = arith.constant 5.000000e-01 : f32
    %44 = vector.broadcast %cst_27 : f32 to vector<2x128xf32>
    %45 = arith.mulf %44, %43 : vector<2x128xf32>
    %46 = math.tanh %45 : vector<2x128xf32>
    %cst_28 = arith.constant 1.000000e+00 : f32
    %47 = vector.broadcast %cst_28 : f32 to vector<2x128xf32>
    %48 = arith.addf %46, %47 : vector<2x128xf32>
    %cst_29 = arith.constant 5.000000e-01 : f32
    %49 = vector.broadcast %cst_29 : f32 to vector<2x128xf32>
    %50 = arith.mulf %49, %48 : vector<2x128xf32>
    %51 = arith.mulf %40, %20 : vector<2x128xf32>
    %52 = arith.mulf %32, %42 : vector<2x128xf32>
    %53 = arith.addf %51, %52 : vector<2x128xf32>
    %54 = math.tanh %53 : vector<2x128xf32>
    %55 = arith.mulf %50, %54 : vector<2x128xf32>
    %56 = vector.extract_strided_slice %18 {offsets = [0, 1, 0], sizes = [2, 1, 512], strides = [1, 1, 1]} : vector<2x8x512xf32> to vector<2x1x512xf32>
    %57 = vector.shape_cast %56 : vector<2x1x512xf32> to vector<2x512xf32>
    %cst_30 = arith.constant dense<0.000000e+00> : vector<2x512xf32>
    %58 = tpu.matmul %55, %3, %cst_30 {dimension_numbers = #tpu.dot_dimension_numbers<[1], [0], [0], [1], [0, 0, 1, 1], [], []>} : vector<2x128xf32>, vector<128x512xf32>, vector<2x512xf32> -> vector<2x512xf32>
    %59 = arith.addf %57, %58 : vector<2x512xf32>
    %60 = vector.extract_strided_slice %59 {offsets = [0, 0], sizes = [2, 128], strides = [1, 1]} : vector<2x512xf32> to vector<2x128xf32>
    %cst_31 = arith.constant 5.000000e-01 : f32
    %61 = vector.broadcast %cst_31 : f32 to vector<2x128xf32>
    %62 = arith.mulf %61, %60 : vector<2x128xf32>
    %63 = math.tanh %62 : vector<2x128xf32>
    %cst_32 = arith.constant 1.000000e+00 : f32
    %64 = vector.broadcast %cst_32 : f32 to vector<2x128xf32>
    %65 = arith.addf %63, %64 : vector<2x128xf32>
    %cst_33 = arith.constant 5.000000e-01 : f32
    %66 = vector.broadcast %cst_33 : f32 to vector<2x128xf32>
    %67 = arith.mulf %66, %65 : vector<2x128xf32>
    %68 = vector.extract_strided_slice %59 {offsets = [0, 128], sizes = [2, 128], strides = [1, 1]} : vector<2x512xf32> to vector<2x128xf32>
    %cst_34 = arith.constant 5.000000e-01 : f32
    %69 = vector.broadcast %cst_34 : f32 to vector<2x128xf32>
    %70 = arith.mulf %69, %68 : vector<2x128xf32>
    %71 = math.tanh %70 : vector<2x128xf32>
    %cst_35 = arith.constant 1.000000e+00 : f32
    %72 = vector.broadcast %cst_35 : f32 to vector<2x128xf32>
    %73 = arith.addf %71, %72 : vector<2x128xf32>
    %cst_36 = arith.constant 5.000000e-01 : f32
    %74 = vector.broadcast %cst_36 : f32 to vector<2x128xf32>
    %75 = arith.mulf %74, %73 : vector<2x128xf32>
    %76 = vector.extract_strided_slice %59 {offsets = [0, 256], sizes = [2, 128], strides = [1, 1]} : vector<2x512xf32> to vector<2x128xf32>
    %77 = math.tanh %76 : vector<2x128xf32>
    %78 = vector.extract_strided_slice %59 {offsets = [0, 384], sizes = [2, 128], strides = [1, 1]} : vector<2x512xf32> to vector<2x128xf32>
    %cst_37 = arith.constant 5.000000e-01 : f32
    %79 = vector.broadcast %cst_37 : f32 to vector<2x128xf32>
    %80 = arith.mulf %79, %78 : vector<2x128xf32>
    %81 = math.tanh %80 : vector<2x128xf32>
    %cst_38 = arith.constant 1.000000e+00 : f32
    %82 = vector.broadcast %cst_38 : f32 to vector<2x128xf32>
    %83 = arith.addf %81, %82 : vector<2x128xf32>
    %cst_39 = arith.constant 5.000000e-01 : f32
    %84 = vector.broadcast %cst_39 : f32 to vector<2x128xf32>
    %85 = arith.mulf %84, %83 : vector<2x128xf32>
    %86 = arith.mulf %75, %53 : vector<2x128xf32>
    %87 = arith.mulf %67, %77 : vector<2x128xf32>
    %88 = arith.addf %86, %87 : vector<2x128xf32>
    %89 = math.tanh %88 : vector<2x128xf32>
    %90 = arith.mulf %85, %89 : vector<2x128xf32>
    %91 = vector.extract_strided_slice %18 {offsets = [0, 2, 0], sizes = [2, 1, 512], strides = [1, 1, 1]} : vector<2x8x512xf32> to vector<2x1x512xf32>
    %92 = vector.shape_cast %91 : vector<2x1x512xf32> to vector<2x512xf32>
    %cst_40 = arith.constant dense<0.000000e+00> : vector<2x512xf32>
    %93 = tpu.matmul %90, %3, %cst_40 {dimension_numbers = #tpu.dot_dimension_numbers<[1], [0], [0], [1], [0, 0, 1, 1], [], []>} : vector<2x128xf32>, vector<128x512xf32>, vector<2x512xf32> -> vector<2x512xf32>
    %94 = arith.addf %92, %93 : vector<2x512xf32>
    %95 = vector.extract_strided_slice %94 {offsets = [0, 0], sizes = [2, 128], strides = [1, 1]} : vector<2x512xf32> to vector<2x128xf32>
    %cst_41 = arith.constant 5.000000e-01 : f32
    %96 = vector.broadcast %cst_41 : f32 to vector<2x128xf32>
    %97 = arith.mulf %96, %95 : vector<2x128xf32>
    %98 = math.tanh %97 : vector<2x128xf32>
    %cst_42 = arith.constant 1.000000e+00 : f32
    %99 = vector.broadcast %cst_42 : f32 to vector<2x128xf32>
    %100 = arith.addf %98, %99 : vector<2x128xf32>
    %cst_43 = arith.constant 5.000000e-01 : f32
    %101 = vector.broadcast %cst_43 : f32 to vector<2x128xf32>
    %102 = arith.mulf %101, %100 : vector<2x128xf32>
    %103 = vector.extract_strided_slice %94 {offsets = [0, 128], sizes = [2, 128], strides = [1, 1]} : vector<2x512xf32> to vector<2x128xf32>
    %cst_44 = arith.constant 5.000000e-01 : f32
    %104 = vector.broadcast %cst_44 : f32 to vector<2x128xf32>
    %105 = arith.mulf %104, %103 : vector<2x128xf32>
    %106 = math.tanh %105 : vector<2x128xf32>
    %cst_45 = arith.constant 1.000000e+00 : f32
    %107 = vector.broadcast %cst_45 : f32 to vector<2x128xf32>
    %108 = arith.addf %106, %107 : vector<2x128xf32>
    %cst_46 = arith.constant 5.000000e-01 : f32
    %109 = vector.broadcast %cst_46 : f32 to vector<2x128xf32>
    %110 = arith.mulf %109, %108 : vector<2x128xf32>
    %111 = vector.extract_strided_slice %94 {offsets = [0, 256], sizes = [2, 128], strides = [1, 1]} : vector<2x512xf32> to vector<2x128xf32>
    %112 = math.tanh %111 : vector<2x128xf32>
    %113 = vector.extract_strided_slice %94 {offsets = [0, 384], sizes = [2, 128], strides = [1, 1]} : vector<2x512xf32> to vector<2x128xf32>
    %cst_47 = arith.constant 5.000000e-01 : f32
    %114 = vector.broadcast %cst_47 : f32 to vector<2x128xf32>
    %115 = arith.mulf %114, %113 : vector<2x128xf32>
    %116 = math.tanh %115 : vector<2x128xf32>
    %cst_48 = arith.constant 1.000000e+00 : f32
    %117 = vector.broadcast %cst_48 : f32 to vector<2x128xf32>
    %118 = arith.addf %116, %117 : vector<2x128xf32>
    %cst_49 = arith.constant 5.000000e-01 : f32
    %119 = vector.broadcast %cst_49 : f32 to vector<2x128xf32>
    %120 = arith.mulf %119, %118 : vector<2x128xf32>
    %121 = arith.mulf %110, %88 : vector<2x128xf32>
    %122 = arith.mulf %102, %112 : vector<2x128xf32>
    %123 = arith.addf %121, %122 : vector<2x128xf32>
    %124 = math.tanh %123 : vector<2x128xf32>
    %125 = arith.mulf %120, %124 : vector<2x128xf32>
    %126 = vector.extract_strided_slice %18 {offsets = [0, 3, 0], sizes = [2, 1, 512], strides = [1, 1, 1]} : vector<2x8x512xf32> to vector<2x1x512xf32>
    %127 = vector.shape_cast %126 : vector<2x1x512xf32> to vector<2x512xf32>
    %cst_50 = arith.constant dense<0.000000e+00> : vector<2x512xf32>
    %128 = tpu.matmul %125, %3, %cst_50 {dimension_numbers = #tpu.dot_dimension_numbers<[1], [0], [0], [1], [0, 0, 1, 1], [], []>} : vector<2x128xf32>, vector<128x512xf32>, vector<2x512xf32> -> vector<2x512xf32>
    %129 = arith.addf %127, %128 : vector<2x512xf32>
    %130 = vector.extract_strided_slice %129 {offsets = [0, 0], sizes = [2, 128], strides = [1, 1]} : vector<2x512xf32> to vector<2x128xf32>
    %cst_51 = arith.constant 5.000000e-01 : f32
    %131 = vector.broadcast %cst_51 : f32 to vector<2x128xf32>
    %132 = arith.mulf %131, %130 : vector<2x128xf32>
    %133 = math.tanh %132 : vector<2x128xf32>
    %cst_52 = arith.constant 1.000000e+00 : f32
    %134 = vector.broadcast %cst_52 : f32 to vector<2x128xf32>
    %135 = arith.addf %133, %134 : vector<2x128xf32>
    %cst_53 = arith.constant 5.000000e-01 : f32
    %136 = vector.broadcast %cst_53 : f32 to vector<2x128xf32>
    %137 = arith.mulf %136, %135 : vector<2x128xf32>
    %138 = vector.extract_strided_slice %129 {offsets = [0, 128], sizes = [2, 128], strides = [1, 1]} : vector<2x512xf32> to vector<2x128xf32>
    %cst_54 = arith.constant 5.000000e-01 : f32
    %139 = vector.broadcast %cst_54 : f32 to vector<2x128xf32>
    %140 = arith.mulf %139, %138 : vector<2x128xf32>
    %141 = math.tanh %140 : vector<2x128xf32>
    %cst_55 = arith.constant 1.000000e+00 : f32
    %142 = vector.broadcast %cst_55 : f32 to vector<2x128xf32>
    %143 = arith.addf %141, %142 : vector<2x128xf32>
    %cst_56 = arith.constant 5.000000e-01 : f32
    %144 = vector.broadcast %cst_56 : f32 to vector<2x128xf32>
    %145 = arith.mulf %144, %143 : vector<2x128xf32>
    %146 = vector.extract_strided_slice %129 {offsets = [0, 256], sizes = [2, 128], strides = [1, 1]} : vector<2x512xf32> to vector<2x128xf32>
    %147 = math.tanh %146 : vector<2x128xf32>
    %148 = vector.extract_strided_slice %129 {offsets = [0, 384], sizes = [2, 128], strides = [1, 1]} : vector<2x512xf32> to vector<2x128xf32>
    %cst_57 = arith.constant 5.000000e-01 : f32
    %149 = vector.broadcast %cst_57 : f32 to vector<2x128xf32>
    %150 = arith.mulf %149, %148 : vector<2x128xf32>
    %151 = math.tanh %150 : vector<2x128xf32>
    %cst_58 = arith.constant 1.000000e+00 : f32
    %152 = vector.broadcast %cst_58 : f32 to vector<2x128xf32>
    %153 = arith.addf %151, %152 : vector<2x128xf32>
    %cst_59 = arith.constant 5.000000e-01 : f32
    %154 = vector.broadcast %cst_59 : f32 to vector<2x128xf32>
    %155 = arith.mulf %154, %153 : vector<2x128xf32>
    %156 = arith.mulf %145, %123 : vector<2x128xf32>
    %157 = arith.mulf %137, %147 : vector<2x128xf32>
    %158 = arith.addf %156, %157 : vector<2x128xf32>
    %159 = math.tanh %158 : vector<2x128xf32>
    %160 = arith.mulf %155, %159 : vector<2x128xf32>
    %161 = vector.extract_strided_slice %18 {offsets = [0, 4, 0], sizes = [2, 1, 512], strides = [1, 1, 1]} : vector<2x8x512xf32> to vector<2x1x512xf32>
    %162 = vector.shape_cast %161 : vector<2x1x512xf32> to vector<2x512xf32>
    %cst_60 = arith.constant dense<0.000000e+00> : vector<2x512xf32>
    %163 = tpu.matmul %160, %3, %cst_60 {dimension_numbers = #tpu.dot_dimension_numbers<[1], [0], [0], [1], [0, 0, 1, 1], [], []>} : vector<2x128xf32>, vector<128x512xf32>, vector<2x512xf32> -> vector<2x512xf32>
    %164 = arith.addf %162, %163 : vector<2x512xf32>
    %165 = vector.extract_strided_slice %164 {offsets = [0, 0], sizes = [2, 128], strides = [1, 1]} : vector<2x512xf32> to vector<2x128xf32>
    %cst_61 = arith.constant 5.000000e-01 : f32
    %166 = vector.broadcast %cst_61 : f32 to vector<2x128xf32>
    %167 = arith.mulf %166, %165 : vector<2x128xf32>
    %168 = math.tanh %167 : vector<2x128xf32>
    %cst_62 = arith.constant 1.000000e+00 : f32
    %169 = vector.broadcast %cst_62 : f32 to vector<2x128xf32>
    %170 = arith.addf %168, %169 : vector<2x128xf32>
    %cst_63 = arith.constant 5.000000e-01 : f32
    %171 = vector.broadcast %cst_63 : f32 to vector<2x128xf32>
    %172 = arith.mulf %171, %170 : vector<2x128xf32>
    %173 = vector.extract_strided_slice %164 {offsets = [0, 128], sizes = [2, 128], strides = [1, 1]} : vector<2x512xf32> to vector<2x128xf32>
    %cst_64 = arith.constant 5.000000e-01 : f32
    %174 = vector.broadcast %cst_64 : f32 to vector<2x128xf32>
    %175 = arith.mulf %174, %173 : vector<2x128xf32>
    %176 = math.tanh %175 : vector<2x128xf32>
    %cst_65 = arith.constant 1.000000e+00 : f32
    %177 = vector.broadcast %cst_65 : f32 to vector<2x128xf32>
    %178 = arith.addf %176, %177 : vector<2x128xf32>
    %cst_66 = arith.constant 5.000000e-01 : f32
    %179 = vector.broadcast %cst_66 : f32 to vector<2x128xf32>
    %180 = arith.mulf %179, %178 : vector<2x128xf32>
    %181 = vector.extract_strided_slice %164 {offsets = [0, 256], sizes = [2, 128], strides = [1, 1]} : vector<2x512xf32> to vector<2x128xf32>
    %182 = math.tanh %181 : vector<2x128xf32>
    %183 = vector.extract_strided_slice %164 {offsets = [0, 384], sizes = [2, 128], strides = [1, 1]} : vector<2x512xf32> to vector<2x128xf32>
    %cst_67 = arith.constant 5.000000e-01 : f32
    %184 = vector.broadcast %cst_67 : f32 to vector<2x128xf32>
    %185 = arith.mulf %184, %183 : vector<2x128xf32>
    %186 = math.tanh %185 : vector<2x128xf32>
    %cst_68 = arith.constant 1.000000e+00 : f32
    %187 = vector.broadcast %cst_68 : f32 to vector<2x128xf32>
    %188 = arith.addf %186, %187 : vector<2x128xf32>
    %cst_69 = arith.constant 5.000000e-01 : f32
    %189 = vector.broadcast %cst_69 : f32 to vector<2x128xf32>
    %190 = arith.mulf %189, %188 : vector<2x128xf32>
    %191 = arith.mulf %180, %158 : vector<2x128xf32>
    %192 = arith.mulf %172, %182 : vector<2x128xf32>
    %193 = arith.addf %191, %192 : vector<2x128xf32>
    %194 = math.tanh %193 : vector<2x128xf32>
    %195 = arith.mulf %190, %194 : vector<2x128xf32>
    %196 = vector.extract_strided_slice %18 {offsets = [0, 5, 0], sizes = [2, 1, 512], strides = [1, 1, 1]} : vector<2x8x512xf32> to vector<2x1x512xf32>
    %197 = vector.shape_cast %196 : vector<2x1x512xf32> to vector<2x512xf32>
    %cst_70 = arith.constant dense<0.000000e+00> : vector<2x512xf32>
    %198 = tpu.matmul %195, %3, %cst_70 {dimension_numbers = #tpu.dot_dimension_numbers<[1], [0], [0], [1], [0, 0, 1, 1], [], []>} : vector<2x128xf32>, vector<128x512xf32>, vector<2x512xf32> -> vector<2x512xf32>
    %199 = arith.addf %197, %198 : vector<2x512xf32>
    %200 = vector.extract_strided_slice %199 {offsets = [0, 0], sizes = [2, 128], strides = [1, 1]} : vector<2x512xf32> to vector<2x128xf32>
    %cst_71 = arith.constant 5.000000e-01 : f32
    %201 = vector.broadcast %cst_71 : f32 to vector<2x128xf32>
    %202 = arith.mulf %201, %200 : vector<2x128xf32>
    %203 = math.tanh %202 : vector<2x128xf32>
    %cst_72 = arith.constant 1.000000e+00 : f32
    %204 = vector.broadcast %cst_72 : f32 to vector<2x128xf32>
    %205 = arith.addf %203, %204 : vector<2x128xf32>
    %cst_73 = arith.constant 5.000000e-01 : f32
    %206 = vector.broadcast %cst_73 : f32 to vector<2x128xf32>
    %207 = arith.mulf %206, %205 : vector<2x128xf32>
    %208 = vector.extract_strided_slice %199 {offsets = [0, 128], sizes = [2, 128], strides = [1, 1]} : vector<2x512xf32> to vector<2x128xf32>
    %cst_74 = arith.constant 5.000000e-01 : f32
    %209 = vector.broadcast %cst_74 : f32 to vector<2x128xf32>
    %210 = arith.mulf %209, %208 : vector<2x128xf32>
    %211 = math.tanh %210 : vector<2x128xf32>
    %cst_75 = arith.constant 1.000000e+00 : f32
    %212 = vector.broadcast %cst_75 : f32 to vector<2x128xf32>
    %213 = arith.addf %211, %212 : vector<2x128xf32>
    %cst_76 = arith.constant 5.000000e-01 : f32
    %214 = vector.broadcast %cst_76 : f32 to vector<2x128xf32>
    %215 = arith.mulf %214, %213 : vector<2x128xf32>
    %216 = vector.extract_strided_slice %199 {offsets = [0, 256], sizes = [2, 128], strides = [1, 1]} : vector<2x512xf32> to vector<2x128xf32>
    %217 = math.tanh %216 : vector<2x128xf32>
    %218 = vector.extract_strided_slice %199 {offsets = [0, 384], sizes = [2, 128], strides = [1, 1]} : vector<2x512xf32> to vector<2x128xf32>
    %cst_77 = arith.constant 5.000000e-01 : f32
    %219 = vector.broadcast %cst_77 : f32 to vector<2x128xf32>
    %220 = arith.mulf %219, %218 : vector<2x128xf32>
    %221 = math.tanh %220 : vector<2x128xf32>
    %cst_78 = arith.constant 1.000000e+00 : f32
    %222 = vector.broadcast %cst_78 : f32 to vector<2x128xf32>
    %223 = arith.addf %221, %222 : vector<2x128xf32>
    %cst_79 = arith.constant 5.000000e-01 : f32
    %224 = vector.broadcast %cst_79 : f32 to vector<2x128xf32>
    %225 = arith.mulf %224, %223 : vector<2x128xf32>
    %226 = arith.mulf %215, %193 : vector<2x128xf32>
    %227 = arith.mulf %207, %217 : vector<2x128xf32>
    %228 = arith.addf %226, %227 : vector<2x128xf32>
    %229 = math.tanh %228 : vector<2x128xf32>
    %230 = arith.mulf %225, %229 : vector<2x128xf32>
    %231 = vector.extract_strided_slice %18 {offsets = [0, 6, 0], sizes = [2, 1, 512], strides = [1, 1, 1]} : vector<2x8x512xf32> to vector<2x1x512xf32>
    %232 = vector.shape_cast %231 : vector<2x1x512xf32> to vector<2x512xf32>
    %cst_80 = arith.constant dense<0.000000e+00> : vector<2x512xf32>
    %233 = tpu.matmul %230, %3, %cst_80 {dimension_numbers = #tpu.dot_dimension_numbers<[1], [0], [0], [1], [0, 0, 1, 1], [], []>} : vector<2x128xf32>, vector<128x512xf32>, vector<2x512xf32> -> vector<2x512xf32>
    %234 = arith.addf %232, %233 : vector<2x512xf32>
    %235 = vector.extract_strided_slice %234 {offsets = [0, 0], sizes = [2, 128], strides = [1, 1]} : vector<2x512xf32> to vector<2x128xf32>
    %cst_81 = arith.constant 5.000000e-01 : f32
    %236 = vector.broadcast %cst_81 : f32 to vector<2x128xf32>
    %237 = arith.mulf %236, %235 : vector<2x128xf32>
    %238 = math.tanh %237 : vector<2x128xf32>
    %cst_82 = arith.constant 1.000000e+00 : f32
    %239 = vector.broadcast %cst_82 : f32 to vector<2x128xf32>
    %240 = arith.addf %238, %239 : vector<2x128xf32>
    %cst_83 = arith.constant 5.000000e-01 : f32
    %241 = vector.broadcast %cst_83 : f32 to vector<2x128xf32>
    %242 = arith.mulf %241, %240 : vector<2x128xf32>
    %243 = vector.extract_strided_slice %234 {offsets = [0, 128], sizes = [2, 128], strides = [1, 1]} : vector<2x512xf32> to vector<2x128xf32>
    %cst_84 = arith.constant 5.000000e-01 : f32
    %244 = vector.broadcast %cst_84 : f32 to vector<2x128xf32>
    %245 = arith.mulf %244, %243 : vector<2x128xf32>
    %246 = math.tanh %245 : vector<2x128xf32>
    %cst_85 = arith.constant 1.000000e+00 : f32
    %247 = vector.broadcast %cst_85 : f32 to vector<2x128xf32>
    %248 = arith.addf %246, %247 : vector<2x128xf32>
    %cst_86 = arith.constant 5.000000e-01 : f32
    %249 = vector.broadcast %cst_86 : f32 to vector<2x128xf32>
    %250 = arith.mulf %249, %248 : vector<2x128xf32>
    %251 = vector.extract_strided_slice %234 {offsets = [0, 256], sizes = [2, 128], strides = [1, 1]} : vector<2x512xf32> to vector<2x128xf32>
    %252 = math.tanh %251 : vector<2x128xf32>
    %253 = vector.extract_strided_slice %234 {offsets = [0, 384], sizes = [2, 128], strides = [1, 1]} : vector<2x512xf32> to vector<2x128xf32>
    %cst_87 = arith.constant 5.000000e-01 : f32
    %254 = vector.broadcast %cst_87 : f32 to vector<2x128xf32>
    %255 = arith.mulf %254, %253 : vector<2x128xf32>
    %256 = math.tanh %255 : vector<2x128xf32>
    %cst_88 = arith.constant 1.000000e+00 : f32
    %257 = vector.broadcast %cst_88 : f32 to vector<2x128xf32>
    %258 = arith.addf %256, %257 : vector<2x128xf32>
    %cst_89 = arith.constant 5.000000e-01 : f32
    %259 = vector.broadcast %cst_89 : f32 to vector<2x128xf32>
    %260 = arith.mulf %259, %258 : vector<2x128xf32>
    %261 = arith.mulf %250, %228 : vector<2x128xf32>
    %262 = arith.mulf %242, %252 : vector<2x128xf32>
    %263 = arith.addf %261, %262 : vector<2x128xf32>
    %264 = math.tanh %263 : vector<2x128xf32>
    %265 = arith.mulf %260, %264 : vector<2x128xf32>
    %266 = vector.extract_strided_slice %18 {offsets = [0, 7, 0], sizes = [2, 1, 512], strides = [1, 1, 1]} : vector<2x8x512xf32> to vector<2x1x512xf32>
    %267 = vector.shape_cast %266 : vector<2x1x512xf32> to vector<2x512xf32>
    %cst_90 = arith.constant dense<0.000000e+00> : vector<2x512xf32>
    %268 = tpu.matmul %265, %3, %cst_90 {dimension_numbers = #tpu.dot_dimension_numbers<[1], [0], [0], [1], [0, 0, 1, 1], [], []>} : vector<2x128xf32>, vector<128x512xf32>, vector<2x512xf32> -> vector<2x512xf32>
    %269 = arith.addf %267, %268 : vector<2x512xf32>
    %270 = vector.extract_strided_slice %269 {offsets = [0, 0], sizes = [2, 128], strides = [1, 1]} : vector<2x512xf32> to vector<2x128xf32>
    %cst_91 = arith.constant 5.000000e-01 : f32
    %271 = vector.broadcast %cst_91 : f32 to vector<2x128xf32>
    %272 = arith.mulf %271, %270 : vector<2x128xf32>
    %273 = math.tanh %272 : vector<2x128xf32>
    %cst_92 = arith.constant 1.000000e+00 : f32
    %274 = vector.broadcast %cst_92 : f32 to vector<2x128xf32>
    %275 = arith.addf %273, %274 : vector<2x128xf32>
    %cst_93 = arith.constant 5.000000e-01 : f32
    %276 = vector.broadcast %cst_93 : f32 to vector<2x128xf32>
    %277 = arith.mulf %276, %275 : vector<2x128xf32>
    %278 = vector.extract_strided_slice %269 {offsets = [0, 128], sizes = [2, 128], strides = [1, 1]} : vector<2x512xf32> to vector<2x128xf32>
    %cst_94 = arith.constant 5.000000e-01 : f32
    %279 = vector.broadcast %cst_94 : f32 to vector<2x128xf32>
    %280 = arith.mulf %279, %278 : vector<2x128xf32>
    %281 = math.tanh %280 : vector<2x128xf32>
    %cst_95 = arith.constant 1.000000e+00 : f32
    %282 = vector.broadcast %cst_95 : f32 to vector<2x128xf32>
    %283 = arith.addf %281, %282 : vector<2x128xf32>
    %cst_96 = arith.constant 5.000000e-01 : f32
    %284 = vector.broadcast %cst_96 : f32 to vector<2x128xf32>
    %285 = arith.mulf %284, %283 : vector<2x128xf32>
    %286 = vector.extract_strided_slice %269 {offsets = [0, 256], sizes = [2, 128], strides = [1, 1]} : vector<2x512xf32> to vector<2x128xf32>
    %287 = math.tanh %286 : vector<2x128xf32>
    %288 = vector.extract_strided_slice %269 {offsets = [0, 384], sizes = [2, 128], strides = [1, 1]} : vector<2x512xf32> to vector<2x128xf32>
    %cst_97 = arith.constant 5.000000e-01 : f32
    %289 = vector.broadcast %cst_97 : f32 to vector<2x128xf32>
    %290 = arith.mulf %289, %288 : vector<2x128xf32>
    %291 = math.tanh %290 : vector<2x128xf32>
    %cst_98 = arith.constant 1.000000e+00 : f32
    %292 = vector.broadcast %cst_98 : f32 to vector<2x128xf32>
    %293 = arith.addf %291, %292 : vector<2x128xf32>
    %cst_99 = arith.constant 5.000000e-01 : f32
    %294 = vector.broadcast %cst_99 : f32 to vector<2x128xf32>
    %295 = arith.mulf %294, %293 : vector<2x128xf32>
    %296 = arith.mulf %285, %263 : vector<2x128xf32>
    %297 = arith.mulf %277, %287 : vector<2x128xf32>
    %298 = arith.addf %296, %297 : vector<2x128xf32>
    %299 = math.tanh %298 : vector<2x128xf32>
    %300 = arith.mulf %295, %299 : vector<2x128xf32>
    %301 = vector.shape_cast %55 : vector<2x128xf32> to vector<2x1x128xf32>
    %302 = vector.shape_cast %90 : vector<2x128xf32> to vector<2x1x128xf32>
    %303 = vector.shape_cast %125 : vector<2x128xf32> to vector<2x1x128xf32>
    %304 = vector.shape_cast %160 : vector<2x128xf32> to vector<2x1x128xf32>
    %305 = vector.shape_cast %195 : vector<2x128xf32> to vector<2x1x128xf32>
    %306 = vector.shape_cast %230 : vector<2x128xf32> to vector<2x1x128xf32>
    %307 = vector.shape_cast %265 : vector<2x128xf32> to vector<2x1x128xf32>
    %308 = vector.shape_cast %300 : vector<2x128xf32> to vector<2x1x128xf32>
    %309 = tpu.concatenate %301, %302, %303, %304, %305, %306, %307, %308 in 1 : vector<2x1x128xf32>, vector<2x1x128xf32>, vector<2x1x128xf32>, vector<2x1x128xf32>, vector<2x1x128xf32>, vector<2x1x128xf32>, vector<2x1x128xf32>, vector<2x1x128xf32> -> vector<2x8x128xf32>
    %c0_100 = arith.constant 0 : index
    %310 = arith.index_cast %16 : i32 to index
    %c0_101 = arith.constant 0 : index
    %311 = vector.load %arg6[%c0_100, %310, %c0_101] : memref<2x8x128xf32, #tpu.memory_space<vmem>>, vector<2x8x128xf32>
    tpu.vector_store %arg6[%c0_100, %310, %c0_101], %309 {strides = array<i32>} : memref<2x8x128xf32, #tpu.memory_space<vmem>>, vector<2x8x128xf32>,
    %c0_102 = arith.constant 0 : index
    %c0_103 = arith.constant 0 : index
    %312 = vector.load %arg10[%c0_102, %c0_103] : memref<2x128xf32, #tpu.memory_space<vmem>>, vector<2x128xf32>
    tpu.vector_store %arg10[%c0_102, %c0_103], %300 {strides = array<i32>} : memref<2x128xf32, #tpu.memory_space<vmem>>, vector<2x128xf32>,
    %c0_104 = arith.constant 0 : index
    %c0_105 = arith.constant 0 : index
    %313 = vector.load %arg11[%c0_104, %c0_105] : memref<2x128xf32, #tpu.memory_space<vmem>>, vector<2x128xf32>
    tpu.vector_store %arg11[%c0_104, %c0_105], %298 {strides = array<i32>} : memref<2x128xf32, #tpu.memory_space<vmem>>, vector<2x128xf32>,
    %c1_i32_106 = arith.constant 1 : i32
    %c0_i32_107 = arith.constant 0 : i32
    %314 = arith.cmpi eq, %arg1, %c0_i32_107 : i32
    %315 = arith.extui %314 : i1 to i32
    %c0_i32_108 = arith.constant 0 : i32
    %316 = arith.cmpi ne, %315, %c0_i32_108 : i32
    scf.if %316 {
      %c0_109 = arith.constant 0 : index
      %c0_110 = arith.constant 0 : index
      %317 = vector.load %arg10[%c0_109, %c0_110] : memref<2x128xf32, #tpu.memory_space<vmem>>, vector<2x128xf32>
      %c0_111 = arith.constant 0 : index
      %c0_112 = arith.constant 0 : index
      %318 = vector.load %arg7[%c0_111, %c0_112] : memref<2x128xf32, #tpu.memory_space<vmem>>, vector<2x128xf32>
      tpu.vector_store %arg7[%c0_111, %c0_112], %317 {strides = array<i32>} : memref<2x128xf32, #tpu.memory_space<vmem>>, vector<2x128xf32>,
      %c0_113 = arith.constant 0 : index
      %c0_114 = arith.constant 0 : index
      %319 = vector.load %arg11[%c0_113, %c0_114] : memref<2x128xf32, #tpu.memory_space<vmem>>, vector<2x128xf32>
      %c0_115 = arith.constant 0 : index
      %c0_116 = arith.constant 0 : index
      %320 = vector.load %arg8[%c0_115, %c0_116] : memref<2x128xf32, #tpu.memory_space<vmem>>, vector<2x128xf32>
      tpu.vector_store %arg8[%c0_115, %c0_116], %319 {strides = array<i32>} : memref<2x128xf32, #tpu.memory_space<vmem>>, vector<2x128xf32>,
    } else {
    }
    return
  }
  func.func @transform_0(%arg0: i32, %arg1: i32) -> (i32, i32, i32) {
    %c0_i32 = arith.constant 0 : i32
    %c0_i32_0 = arith.constant 0 : i32
    return %arg0, %arg1, %c0_i32 : i32, i32, i32
  }
  func.func @transform_1(%arg0: i32, %arg1: i32) -> (i32, i32) {
    %c0_i32 = arith.constant 0 : i32
    %c0_i32_0 = arith.constant 0 : i32
    %c0_i32_1 = arith.constant 0 : i32
    return %c0_i32, %c0_i32_0 : i32, i32
  }
  func.func @transform_2(%arg0: i32, %arg1: i32) -> (i32, i32) {
    %c0_i32 = arith.constant 0 : i32
    %c0_i32_0 = arith.constant 0 : i32
    %c0_i32_1 = arith.constant 0 : i32
    return %c0_i32, %c0_i32_0 : i32, i32
  }
  func.func @transform_3(%arg0: i32, %arg1: i32) -> (i32, i32) {
    %c0_i32 = arith.constant 0 : i32
    %c0_i32_0 = arith.constant 0 : i32
    %c0_i32_1 = arith.constant 0 : i32
    return %c0_i32, %c0_i32_0 : i32, i32
  }
  func.func @transform_4(%arg0: i32, %arg1: i32) -> (i32, i32, i32) {
    %c0_i32 = arith.constant 0 : i32
    %c0_i32_0 = arith.constant 0 : i32
    return %arg0, %arg1, %c0_i32 : i32, i32, i32
  }
  func.func @transform_5(%arg0: i32, %arg1: i32) -> (i32, i32) {
    %c0_i32 = arith.constant 0 : i32
    %c0_i32_0 = arith.constant 0 : i32
    return %arg0, %c0_i32 : i32, i32
  }
  func.func @transform_6(%arg0: i32, %arg1: i32) -> (i32, i32) {
    %c0_i32 = arith.constant 0 : i32
    %c0_i32_0 = arith.constant 0 : i32
    return %arg0, %c0_i32 : i32, i32
  }
}

module attributes {stable_mosaic.version = 11 : i64} {
  func.func @_lstm_chunk_kernel(%arg0: i32, %arg1: i32, %arg2: memref<2x8x4xf32, #tpu.memory_space<vmem>>, %arg3: memref<4x512xf32, #tpu.memory_space<vmem>>, %arg4: memref<128x512xf32, #tpu.memory_space<vmem>>, %arg5: memref<1x512xf32, #tpu.memory_space<vmem>>, %arg6: memref<2x8x128xf32, #tpu.memory_space<vmem>>, %arg7: memref<2x128xf32, #tpu.memory_space<vmem>>, %arg8: memref<2x128xf32, #tpu.memory_space<vmem>>, %arg9: memref<2x8x512xf32, #tpu.memory_space<vmem>>, %arg10: memref<2x128xf32, #tpu.memory_space<vmem>>, %arg11: memref<2x128xf32, #tpu.memory_space<vmem>>) attributes {dimension_semantics = [#tpu.dimension_semantics<parallel>, #tpu.dimension_semantics<arbitrary>], iteration_bounds = array<i64: 1, 1>, scalar_prefetch = 0 : i64, scratch_operands = 3 : i64, tpu.core_type = #tpu.core_type<tc>, window_params = [{transform_indices = @transform_0, window_bounds = array<i64: 2, 8, 4>}, {pipeline_mode = #tpu.pipeline_mode<synchronous>, transform_indices = @transform_1, window_bounds = array<i64: 4, 512>}, {pipeline_mode = #tpu.pipeline_mode<synchronous>, transform_indices = @transform_2, window_bounds = array<i64: 128, 512>}, {pipeline_mode = #tpu.pipeline_mode<synchronous>, transform_indices = @transform_3, window_bounds = array<i64: 1, 512>}, {transform_indices = @transform_4, window_bounds = array<i64: 2, 8, 128>}, {transform_indices = @transform_5, window_bounds = array<i64: 2, 128>}, {transform_indices = @transform_6, window_bounds = array<i64: 2, 128>}]} {
    %c0_i32 = arith.constant 0 : i32
    %0 = arith.cmpi eq, %arg1, %c0_i32 : i32
    %1 = arith.extui %0 : i1 to i32
    %c0_i32_0 = arith.constant 0 : i32
    %2 = arith.cmpi ne, %1, %c0_i32_0 : i32
    scf.if %2 {
      %cst_109 = arith.constant 0.000000e+00 : f32
      %317 = vector.broadcast %cst_109 : f32 to vector<2x128xf32>
      %c0_110 = arith.constant 0 : index
      %c0_111 = arith.constant 0 : index
      %318 = vector.load %arg10[%c0_110, %c0_111] : memref<2x128xf32, #tpu.memory_space<vmem>>, vector<2x128xf32>
      tpu.vector_store %arg10[%c0_110, %c0_111], %317 {strides = array<i32>} : memref<2x128xf32, #tpu.memory_space<vmem>>, vector<2x128xf32>,
      %cst_112 = arith.constant 0.000000e+00 : f32
      %319 = vector.broadcast %cst_112 : f32 to vector<2x128xf32>
      %c0_113 = arith.constant 0 : index
      %c0_114 = arith.constant 0 : index
      %320 = vector.load %arg11[%c0_113, %c0_114] : memref<2x128xf32, #tpu.memory_space<vmem>>, vector<2x128xf32>
      tpu.vector_store %arg11[%c0_113, %c0_114], %319 {strides = array<i32>} : memref<2x128xf32, #tpu.memory_space<vmem>>, vector<2x128xf32>,
    } else {
    }
    %c0 = arith.constant 0 : index
    %c0_1 = arith.constant 0 : index
    %3 = vector.load %arg4[%c0, %c0_1] : memref<128x512xf32, #tpu.memory_space<vmem>>, vector<128x512xf32>
    %c0_2 = arith.constant 0 : index
    %c0_3 = arith.constant 0 : index
    %c0_4 = arith.constant 0 : index
    %4 = vector.load %arg2[%c0_2, %c0_3, %c0_4] : memref<2x8x4xf32, #tpu.memory_space<vmem>>, vector<2x8x4xf32>
    %5 = vector.shape_cast %4 : vector<2x8x4xf32> to vector<16x4xf32>
    %c0_5 = arith.constant 0 : index
    %c0_6 = arith.constant 0 : index
    %6 = vector.load %arg3[%c0_5, %c0_6] : memref<4x512xf32, #tpu.memory_space<vmem>>, vector<4x512xf32>
    %cst = arith.constant dense<0.000000e+00> : vector<16x512xf32>
    %7 = tpu.matmul %5, %6, %cst {dimension_numbers = #tpu.dot_dimension_numbers<[1], [0], [0], [1], [0, 0, 1, 1], [], []>} : vector<16x4xf32>, vector<4x512xf32>, vector<16x512xf32> -> vector<16x512xf32>
    %c0_7 = arith.constant 0 : index
    %c0_8 = arith.constant 0 : index
    %8 = vector.load %arg5[%c0_7, %c0_8] : memref<1x512xf32, #tpu.memory_space<vmem>>, vector<1x512xf32>
    %9 = vector.broadcast %8 : vector<1x512xf32> to vector<16x512xf32>
    %10 = arith.addf %7, %9 : vector<16x512xf32>
    %11 = vector.shape_cast %10 : vector<16x512xf32> to vector<2x8x512xf32>
    %c0_9 = arith.constant 0 : index
    %c0_10 = arith.constant 0 : index
    %c0_11 = arith.constant 0 : index
    %12 = vector.load %arg9[%c0_9, %c0_10, %c0_11] : memref<2x8x512xf32, #tpu.memory_space<vmem>>, vector<2x8x512xf32>
    tpu.vector_store %arg9[%c0_9, %c0_10, %c0_11], %11 {strides = array<i32>} : memref<2x8x512xf32, #tpu.memory_space<vmem>>, vector<2x8x512xf32>,
    %c0_i32_12 = arith.constant 0 : i32
    %c1_i32 = arith.constant 1 : i32
    %13 = arith.muli %c0_i32_12, %c1_i32 : i32
    %c0_i32_13 = arith.constant 0 : i32
    %14 = arith.addi %c0_i32_13, %13 : i32
    %c8_i32 = arith.constant 8 : i32
    %15 = arith.muli %14, %c8_i32 : i32
    %16 = tpu.assume_multiple %15, 8 : i32
    %c0_14 = arith.constant 0 : index
    %17 = arith.index_cast %16 : i32 to index
    %c0_15 = arith.constant 0 : index
    %18 = vector.load %arg9[%c0_14, %17, %c0_15] : memref<2x8x512xf32, #tpu.memory_space<vmem>>, vector<2x8x512xf32>
    %c0_16 = arith.constant 0 : index
    %c0_17 = arith.constant 0 : index
    %19 = vector.load %arg10[%c0_16, %c0_17] : memref<2x128xf32, #tpu.memory_space<vmem>>, vector<2x128xf32>
    %c0_18 = arith.constant 0 : index
    %c0_19 = arith.constant 0 : index
    %20 = vector.load %arg11[%c0_18, %c0_19] : memref<2x128xf32, #tpu.memory_space<vmem>>, vector<2x128xf32>
    %21 = vector.extract_strided_slice %18 {offsets = [0, 0, 0], sizes = [2, 1, 512], strides = [1, 1, 1]} : vector<2x8x512xf32> to vector<2x1x512xf32>
    %22 = vector.shape_cast %21 : vector<2x1x512xf32> to vector<2x512xf32>
    %cst_20 = arith.constant dense<0.000000e+00> : vector<2x512xf32>
    %23 = tpu.matmul %19, %3, %cst_20 {dimension_numbers = #tpu.dot_dimension_numbers<[1], [0], [0], [1], [0, 0, 1, 1], [], []>} : vector<2x128xf32>, vector<128x512xf32>, vector<2x512xf32> -> vector<2x512xf32>
    %24 = arith.addf %22, %23 : vector<2x512xf32>
    %25 = vector.extract_strided_slice %24 {offsets = [0, 0], sizes = [2, 128], strides = [1, 1]} : vector<2x512xf32> to vector<2x128xf32>
    %cst_21 = arith.constant 5.000000e-01 : f32
    %26 = vector.broadcast %cst_21 : f32 to vector<2x128xf32>
    %27 = arith.mulf %26, %25 : vector<2x128xf32>
    %28 = math.tanh %27 : vector<2x128xf32>
    %cst_22 = arith.constant 1.000000e+00 : f32
    %29 = vector.broadcast %cst_22 : f32 to vector<2x128xf32>
    %30 = arith.addf %28, %29 : vector<2x128xf32>
    %cst_23 = arith.constant 5.000000e-01 : f32
    %31 = vector.broadcast %cst_23 : f32 to vector<2x128xf32>
    %32 = arith.mulf %31, %30 : vector<2x128xf32>
    %33 = vector.extract_strided_slice %24 {offsets = [0, 128], sizes = [2, 128], strides = [1, 1]} : vector<2x512xf32> to vector<2x128xf32>
    %cst_24 = arith.constant 5.000000e-01 : f32
    %34 = vector.broadcast %cst_24 : f32 to vector<2x128xf32>
    %35 = arith.mulf %34, %33 : vector<2x128xf32>
    %36 = math.tanh %35 : vector<2x128xf32>
    %cst_25 = arith.constant 1.000000e+00 : f32
    %37 = vector.broadcast %cst_25 : f32 to vector<2x128xf32>
    %38 = arith.addf %36, %37 : vector<2x128xf32>
    %cst_26 = arith.constant 5.000000e-01 : f32
    %39 = vector.broadcast %cst_26 : f32 to vector<2x128xf32>
    %40 = arith.mulf %39, %38 : vector<2x128xf32>
    %41 = vector.extract_strided_slice %24 {offsets = [0, 256], sizes = [2, 128], strides = [1, 1]} : vector<2x512xf32> to vector<2x128xf32>
    %42 = math.tanh %41 : vector<2x128xf32>
    %43 = vector.extract_strided_slice %24 {offsets = [0, 384], sizes = [2, 128], strides = [1, 1]} : vector<2x512xf32> to vector<2x128xf32>
    %cst_27 = arith.constant 5.000000e-01 : f32
    %44 = vector.broadcast %cst_27 : f32 to vector<2x128xf32>
    %45 = arith.mulf %44, %43 : vector<2x128xf32>
    %46 = math.tanh %45 : vector<2x128xf32>
    %cst_28 = arith.constant 1.000000e+00 : f32
    %47 = vector.broadcast %cst_28 : f32 to vector<2x128xf32>
    %48 = arith.addf %46, %47 : vector<2x128xf32>
    %cst_29 = arith.constant 5.000000e-01 : f32
    %49 = vector.broadcast %cst_29 : f32 to vector<2x128xf32>
    %50 = arith.mulf %49, %48 : vector<2x128xf32>
    %51 = arith.mulf %40, %20 : vector<2x128xf32>
    %52 = arith.mulf %32, %42 : vector<2x128xf32>
    %53 = arith.addf %51, %52 : vector<2x128xf32>
    %54 = math.tanh %53 : vector<2x128xf32>
    %55 = arith.mulf %50, %54 : vector<2x128xf32>
    %56 = vector.extract_strided_slice %18 {offsets = [0, 1, 0], sizes = [2, 1, 512], strides = [1, 1, 1]} : vector<2x8x512xf32> to vector<2x1x512xf32>
    %57 = vector.shape_cast %56 : vector<2x1x512xf32> to vector<2x512xf32>
    %cst_30 = arith.constant dense<0.000000e+00> : vector<2x512xf32>
    %58 = tpu.matmul %55, %3, %cst_30 {dimension_numbers = #tpu.dot_dimension_numbers<[1], [0], [0], [1], [0, 0, 1, 1], [], []>} : vector<2x128xf32>, vector<128x512xf32>, vector<2x512xf32> -> vector<2x512xf32>
    %59 = arith.addf %57, %58 : vector<2x512xf32>
    %60 = vector.extract_strided_slice %59 {offsets = [0, 0], sizes = [2, 128], strides = [1, 1]} : vector<2x512xf32> to vector<2x128xf32>
    %cst_31 = arith.constant 5.000000e-01 : f32
    %61 = vector.broadcast %cst_31 : f32 to vector<2x128xf32>
    %62 = arith.mulf %61, %60 : vector<2x128xf32>
    %63 = math.tanh %62 : vector<2x128xf32>
    %cst_32 = arith.constant 1.000000e+00 : f32
    %64 = vector.broadcast %cst_32 : f32 to vector<2x128xf32>
    %65 = arith.addf %63, %64 : vector<2x128xf32>
    %cst_33 = arith.constant 5.000000e-01 : f32
    %66 = vector.broadcast %cst_33 : f32 to vector<2x128xf32>
    %67 = arith.mulf %66, %65 : vector<2x128xf32>
    %68 = vector.extract_strided_slice %59 {offsets = [0, 128], sizes = [2, 128], strides = [1, 1]} : vector<2x512xf32> to vector<2x128xf32>
    %cst_34 = arith.constant 5.000000e-01 : f32
    %69 = vector.broadcast %cst_34 : f32 to vector<2x128xf32>
    %70 = arith.mulf %69, %68 : vector<2x128xf32>
    %71 = math.tanh %70 : vector<2x128xf32>
    %cst_35 = arith.constant 1.000000e+00 : f32
    %72 = vector.broadcast %cst_35 : f32 to vector<2x128xf32>
    %73 = arith.addf %71, %72 : vector<2x128xf32>
    %cst_36 = arith.constant 5.000000e-01 : f32
    %74 = vector.broadcast %cst_36 : f32 to vector<2x128xf32>
    %75 = arith.mulf %74, %73 : vector<2x128xf32>
    %76 = vector.extract_strided_slice %59 {offsets = [0, 256], sizes = [2, 128], strides = [1, 1]} : vector<2x512xf32> to vector<2x128xf32>
    %77 = math.tanh %76 : vector<2x128xf32>
    %78 = vector.extract_strided_slice %59 {offsets = [0, 384], sizes = [2, 128], strides = [1, 1]} : vector<2x512xf32> to vector<2x128xf32>
    %cst_37 = arith.constant 5.000000e-01 : f32
    %79 = vector.broadcast %cst_37 : f32 to vector<2x128xf32>
    %80 = arith.mulf %79, %78 : vector<2x128xf32>
    %81 = math.tanh %80 : vector<2x128xf32>
    %cst_38 = arith.constant 1.000000e+00 : f32
    %82 = vector.broadcast %cst_38 : f32 to vector<2x128xf32>
    %83 = arith.addf %81, %82 : vector<2x128xf32>
    %cst_39 = arith.constant 5.000000e-01 : f32
    %84 = vector.broadcast %cst_39 : f32 to vector<2x128xf32>
    %85 = arith.mulf %84, %83 : vector<2x128xf32>
    %86 = arith.mulf %75, %53 : vector<2x128xf32>
    %87 = arith.mulf %67, %77 : vector<2x128xf32>
    %88 = arith.addf %86, %87 : vector<2x128xf32>
    %89 = math.tanh %88 : vector<2x128xf32>
    %90 = arith.mulf %85, %89 : vector<2x128xf32>
    %91 = vector.extract_strided_slice %18 {offsets = [0, 2, 0], sizes = [2, 1, 512], strides = [1, 1, 1]} : vector<2x8x512xf32> to vector<2x1x512xf32>
    %92 = vector.shape_cast %91 : vector<2x1x512xf32> to vector<2x512xf32>
    %cst_40 = arith.constant dense<0.000000e+00> : vector<2x512xf32>
    %93 = tpu.matmul %90, %3, %cst_40 {dimension_numbers = #tpu.dot_dimension_numbers<[1], [0], [0], [1], [0, 0, 1, 1], [], []>} : vector<2x128xf32>, vector<128x512xf32>, vector<2x512xf32> -> vector<2x512xf32>
    %94 = arith.addf %92, %93 : vector<2x512xf32>
    %95 = vector.extract_strided_slice %94 {offsets = [0, 0], sizes = [2, 128], strides = [1, 1]} : vector<2x512xf32> to vector<2x128xf32>
    %cst_41 = arith.constant 5.000000e-01 : f32
    %96 = vector.broadcast %cst_41 : f32 to vector<2x128xf32>
    %97 = arith.mulf %96, %95 : vector<2x128xf32>
    %98 = math.tanh %97 : vector<2x128xf32>
    %cst_42 = arith.constant 1.000000e+00 : f32
    %99 = vector.broadcast %cst_42 : f32 to vector<2x128xf32>
    %100 = arith.addf %98, %99 : vector<2x128xf32>
    %cst_43 = arith.constant 5.000000e-01 : f32
    %101 = vector.broadcast %cst_43 : f32 to vector<2x128xf32>
    %102 = arith.mulf %101, %100 : vector<2x128xf32>
    %103 = vector.extract_strided_slice %94 {offsets = [0, 128], sizes = [2, 128], strides = [1, 1]} : vector<2x512xf32> to vector<2x128xf32>
    %cst_44 = arith.constant 5.000000e-01 : f32
    %104 = vector.broadcast %cst_44 : f32 to vector<2x128xf32>
    %105 = arith.mulf %104, %103 : vector<2x128xf32>
    %106 = math.tanh %105 : vector<2x128xf32>
    %cst_45 = arith.constant 1.000000e+00 : f32
    %107 = vector.broadcast %cst_45 : f32 to vector<2x128xf32>
    %108 = arith.addf %106, %107 : vector<2x128xf32>
    %cst_46 = arith.constant 5.000000e-01 : f32
    %109 = vector.broadcast %cst_46 : f32 to vector<2x128xf32>
    %110 = arith.mulf %109, %108 : vector<2x128xf32>
    %111 = vector.extract_strided_slice %94 {offsets = [0, 256], sizes = [2, 128], strides = [1, 1]} : vector<2x512xf32> to vector<2x128xf32>
    %112 = math.tanh %111 : vector<2x128xf32>
    %113 = vector.extract_strided_slice %94 {offsets = [0, 384], sizes = [2, 128], strides = [1, 1]} : vector<2x512xf32> to vector<2x128xf32>
    %cst_47 = arith.constant 5.000000e-01 : f32
    %114 = vector.broadcast %cst_47 : f32 to vector<2x128xf32>
    %115 = arith.mulf %114, %113 : vector<2x128xf32>
    %116 = math.tanh %115 : vector<2x128xf32>
    %cst_48 = arith.constant 1.000000e+00 : f32
    %117 = vector.broadcast %cst_48 : f32 to vector<2x128xf32>
    %118 = arith.addf %116, %117 : vector<2x128xf32>
    %cst_49 = arith.constant 5.000000e-01 : f32
    %119 = vector.broadcast %cst_49 : f32 to vector<2x128xf32>
    %120 = arith.mulf %119, %118 : vector<2x128xf32>
    %121 = arith.mulf %110, %88 : vector<2x128xf32>
    %122 = arith.mulf %102, %112 : vector<2x128xf32>
    %123 = arith.addf %121, %122 : vector<2x128xf32>
    %124 = math.tanh %123 : vector<2x128xf32>
    %125 = arith.mulf %120, %124 : vector<2x128xf32>
    %126 = vector.extract_strided_slice %18 {offsets = [0, 3, 0], sizes = [2, 1, 512], strides = [1, 1, 1]} : vector<2x8x512xf32> to vector<2x1x512xf32>
    %127 = vector.shape_cast %126 : vector<2x1x512xf32> to vector<2x512xf32>
    %cst_50 = arith.constant dense<0.000000e+00> : vector<2x512xf32>
    %128 = tpu.matmul %125, %3, %cst_50 {dimension_numbers = #tpu.dot_dimension_numbers<[1], [0], [0], [1], [0, 0, 1, 1], [], []>} : vector<2x128xf32>, vector<128x512xf32>, vector<2x512xf32> -> vector<2x512xf32>
    %129 = arith.addf %127, %128 : vector<2x512xf32>
    %130 = vector.extract_strided_slice %129 {offsets = [0, 0], sizes = [2, 128], strides = [1, 1]} : vector<2x512xf32> to vector<2x128xf32>
    %cst_51 = arith.constant 5.000000e-01 : f32
    %131 = vector.broadcast %cst_51 : f32 to vector<2x128xf32>
    %132 = arith.mulf %131, %130 : vector<2x128xf32>
    %133 = math.tanh %132 : vector<2x128xf32>
    %cst_52 = arith.constant 1.000000e+00 : f32
    %134 = vector.broadcast %cst_52 : f32 to vector<2x128xf32>
    %135 = arith.addf %133, %134 : vector<2x128xf32>
    %cst_53 = arith.constant 5.000000e-01 : f32
    %136 = vector.broadcast %cst_53 : f32 to vector<2x128xf32>
    %137 = arith.mulf %136, %135 : vector<2x128xf32>
    %138 = vector.extract_strided_slice %129 {offsets = [0, 128], sizes = [2, 128], strides = [1, 1]} : vector<2x512xf32> to vector<2x128xf32>
    %cst_54 = arith.constant 5.000000e-01 : f32
    %139 = vector.broadcast %cst_54 : f32 to vector<2x128xf32>
    %140 = arith.mulf %139, %138 : vector<2x128xf32>
    %141 = math.tanh %140 : vector<2x128xf32>
    %cst_55 = arith.constant 1.000000e+00 : f32
    %142 = vector.broadcast %cst_55 : f32 to vector<2x128xf32>
    %143 = arith.addf %141, %142 : vector<2x128xf32>
    %cst_56 = arith.constant 5.000000e-01 : f32
    %144 = vector.broadcast %cst_56 : f32 to vector<2x128xf32>
    %145 = arith.mulf %144, %143 : vector<2x128xf32>
    %146 = vector.extract_strided_slice %129 {offsets = [0, 256], sizes = [2, 128], strides = [1, 1]} : vector<2x512xf32> to vector<2x128xf32>
    %147 = math.tanh %146 : vector<2x128xf32>
    %148 = vector.extract_strided_slice %129 {offsets = [0, 384], sizes = [2, 128], strides = [1, 1]} : vector<2x512xf32> to vector<2x128xf32>
    %cst_57 = arith.constant 5.000000e-01 : f32
    %149 = vector.broadcast %cst_57 : f32 to vector<2x128xf32>
    %150 = arith.mulf %149, %148 : vector<2x128xf32>
    %151 = math.tanh %150 : vector<2x128xf32>
    %cst_58 = arith.constant 1.000000e+00 : f32
    %152 = vector.broadcast %cst_58 : f32 to vector<2x128xf32>
    %153 = arith.addf %151, %152 : vector<2x128xf32>
    %cst_59 = arith.constant 5.000000e-01 : f32
    %154 = vector.broadcast %cst_59 : f32 to vector<2x128xf32>
    %155 = arith.mulf %154, %153 : vector<2x128xf32>
    %156 = arith.mulf %145, %123 : vector<2x128xf32>
    %157 = arith.mulf %137, %147 : vector<2x128xf32>
    %158 = arith.addf %156, %157 : vector<2x128xf32>
    %159 = math.tanh %158 : vector<2x128xf32>
    %160 = arith.mulf %155, %159 : vector<2x128xf32>
    %161 = vector.extract_strided_slice %18 {offsets = [0, 4, 0], sizes = [2, 1, 512], strides = [1, 1, 1]} : vector<2x8x512xf32> to vector<2x1x512xf32>
    %162 = vector.shape_cast %161 : vector<2x1x512xf32> to vector<2x512xf32>
    %cst_60 = arith.constant dense<0.000000e+00> : vector<2x512xf32>
    %163 = tpu.matmul %160, %3, %cst_60 {dimension_numbers = #tpu.dot_dimension_numbers<[1], [0], [0], [1], [0, 0, 1, 1], [], []>} : vector<2x128xf32>, vector<128x512xf32>, vector<2x512xf32> -> vector<2x512xf32>
    %164 = arith.addf %162, %163 : vector<2x512xf32>
    %165 = vector.extract_strided_slice %164 {offsets = [0, 0], sizes = [2, 128], strides = [1, 1]} : vector<2x512xf32> to vector<2x128xf32>
    %cst_61 = arith.constant 5.000000e-01 : f32
    %166 = vector.broadcast %cst_61 : f32 to vector<2x128xf32>
    %167 = arith.mulf %166, %165 : vector<2x128xf32>
    %168 = math.tanh %167 : vector<2x128xf32>
    %cst_62 = arith.constant 1.000000e+00 : f32
    %169 = vector.broadcast %cst_62 : f32 to vector<2x128xf32>
    %170 = arith.addf %168, %169 : vector<2x128xf32>
    %cst_63 = arith.constant 5.000000e-01 : f32
    %171 = vector.broadcast %cst_63 : f32 to vector<2x128xf32>
    %172 = arith.mulf %171, %170 : vector<2x128xf32>
    %173 = vector.extract_strided_slice %164 {offsets = [0, 128], sizes = [2, 128], strides = [1, 1]} : vector<2x512xf32> to vector<2x128xf32>
    %cst_64 = arith.constant 5.000000e-01 : f32
    %174 = vector.broadcast %cst_64 : f32 to vector<2x128xf32>
    %175 = arith.mulf %174, %173 : vector<2x128xf32>
    %176 = math.tanh %175 : vector<2x128xf32>
    %cst_65 = arith.constant 1.000000e+00 : f32
    %177 = vector.broadcast %cst_65 : f32 to vector<2x128xf32>
    %178 = arith.addf %176, %177 : vector<2x128xf32>
    %cst_66 = arith.constant 5.000000e-01 : f32
    %179 = vector.broadcast %cst_66 : f32 to vector<2x128xf32>
    %180 = arith.mulf %179, %178 : vector<2x128xf32>
    %181 = vector.extract_strided_slice %164 {offsets = [0, 256], sizes = [2, 128], strides = [1, 1]} : vector<2x512xf32> to vector<2x128xf32>
    %182 = math.tanh %181 : vector<2x128xf32>
    %183 = vector.extract_strided_slice %164 {offsets = [0, 384], sizes = [2, 128], strides = [1, 1]} : vector<2x512xf32> to vector<2x128xf32>
    %cst_67 = arith.constant 5.000000e-01 : f32
    %184 = vector.broadcast %cst_67 : f32 to vector<2x128xf32>
    %185 = arith.mulf %184, %183 : vector<2x128xf32>
    %186 = math.tanh %185 : vector<2x128xf32>
    %cst_68 = arith.constant 1.000000e+00 : f32
    %187 = vector.broadcast %cst_68 : f32 to vector<2x128xf32>
    %188 = arith.addf %186, %187 : vector<2x128xf32>
    %cst_69 = arith.constant 5.000000e-01 : f32
    %189 = vector.broadcast %cst_69 : f32 to vector<2x128xf32>
    %190 = arith.mulf %189, %188 : vector<2x128xf32>
    %191 = arith.mulf %180, %158 : vector<2x128xf32>
    %192 = arith.mulf %172, %182 : vector<2x128xf32>
    %193 = arith.addf %191, %192 : vector<2x128xf32>
    %194 = math.tanh %193 : vector<2x128xf32>
    %195 = arith.mulf %190, %194 : vector<2x128xf32>
    %196 = vector.extract_strided_slice %18 {offsets = [0, 5, 0], sizes = [2, 1, 512], strides = [1, 1, 1]} : vector<2x8x512xf32> to vector<2x1x512xf32>
    %197 = vector.shape_cast %196 : vector<2x1x512xf32> to vector<2x512xf32>
    %cst_70 = arith.constant dense<0.000000e+00> : vector<2x512xf32>
    %198 = tpu.matmul %195, %3, %cst_70 {dimension_numbers = #tpu.dot_dimension_numbers<[1], [0], [0], [1], [0, 0, 1, 1], [], []>} : vector<2x128xf32>, vector<128x512xf32>, vector<2x512xf32> -> vector<2x512xf32>
    %199 = arith.addf %197, %198 : vector<2x512xf32>
    %200 = vector.extract_strided_slice %199 {offsets = [0, 0], sizes = [2, 128], strides = [1, 1]} : vector<2x512xf32> to vector<2x128xf32>
    %cst_71 = arith.constant 5.000000e-01 : f32
    %201 = vector.broadcast %cst_71 : f32 to vector<2x128xf32>
    %202 = arith.mulf %201, %200 : vector<2x128xf32>
    %203 = math.tanh %202 : vector<2x128xf32>
    %cst_72 = arith.constant 1.000000e+00 : f32
    %204 = vector.broadcast %cst_72 : f32 to vector<2x128xf32>
    %205 = arith.addf %203, %204 : vector<2x128xf32>
    %cst_73 = arith.constant 5.000000e-01 : f32
    %206 = vector.broadcast %cst_73 : f32 to vector<2x128xf32>
    %207 = arith.mulf %206, %205 : vector<2x128xf32>
    %208 = vector.extract_strided_slice %199 {offsets = [0, 128], sizes = [2, 128], strides = [1, 1]} : vector<2x512xf32> to vector<2x128xf32>
    %cst_74 = arith.constant 5.000000e-01 : f32
    %209 = vector.broadcast %cst_74 : f32 to vector<2x128xf32>
    %210 = arith.mulf %209, %208 : vector<2x128xf32>
    %211 = math.tanh %210 : vector<2x128xf32>
    %cst_75 = arith.constant 1.000000e+00 : f32
    %212 = vector.broadcast %cst_75 : f32 to vector<2x128xf32>
    %213 = arith.addf %211, %212 : vector<2x128xf32>
    %cst_76 = arith.constant 5.000000e-01 : f32
    %214 = vector.broadcast %cst_76 : f32 to vector<2x128xf32>
    %215 = arith.mulf %214, %213 : vector<2x128xf32>
    %216 = vector.extract_strided_slice %199 {offsets = [0, 256], sizes = [2, 128], strides = [1, 1]} : vector<2x512xf32> to vector<2x128xf32>
    %217 = math.tanh %216 : vector<2x128xf32>
    %218 = vector.extract_strided_slice %199 {offsets = [0, 384], sizes = [2, 128], strides = [1, 1]} : vector<2x512xf32> to vector<2x128xf32>
    %cst_77 = arith.constant 5.000000e-01 : f32
    %219 = vector.broadcast %cst_77 : f32 to vector<2x128xf32>
    %220 = arith.mulf %219, %218 : vector<2x128xf32>
    %221 = math.tanh %220 : vector<2x128xf32>
    %cst_78 = arith.constant 1.000000e+00 : f32
    %222 = vector.broadcast %cst_78 : f32 to vector<2x128xf32>
    %223 = arith.addf %221, %222 : vector<2x128xf32>
    %cst_79 = arith.constant 5.000000e-01 : f32
    %224 = vector.broadcast %cst_79 : f32 to vector<2x128xf32>
    %225 = arith.mulf %224, %223 : vector<2x128xf32>
    %226 = arith.mulf %215, %193 : vector<2x128xf32>
    %227 = arith.mulf %207, %217 : vector<2x128xf32>
    %228 = arith.addf %226, %227 : vector<2x128xf32>
    %229 = math.tanh %228 : vector<2x128xf32>
    %230 = arith.mulf %225, %229 : vector<2x128xf32>
    %231 = vector.extract_strided_slice %18 {offsets = [0, 6, 0], sizes = [2, 1, 512], strides = [1, 1, 1]} : vector<2x8x512xf32> to vector<2x1x512xf32>
    %232 = vector.shape_cast %231 : vector<2x1x512xf32> to vector<2x512xf32>
    %cst_80 = arith.constant dense<0.000000e+00> : vector<2x512xf32>
    %233 = tpu.matmul %230, %3, %cst_80 {dimension_numbers = #tpu.dot_dimension_numbers<[1], [0], [0], [1], [0, 0, 1, 1], [], []>} : vector<2x128xf32>, vector<128x512xf32>, vector<2x512xf32> -> vector<2x512xf32>
    %234 = arith.addf %232, %233 : vector<2x512xf32>
    %235 = vector.extract_strided_slice %234 {offsets = [0, 0], sizes = [2, 128], strides = [1, 1]} : vector<2x512xf32> to vector<2x128xf32>
    %cst_81 = arith.constant 5.000000e-01 : f32
    %236 = vector.broadcast %cst_81 : f32 to vector<2x128xf32>
    %237 = arith.mulf %236, %235 : vector<2x128xf32>
    %238 = math.tanh %237 : vector<2x128xf32>
    %cst_82 = arith.constant 1.000000e+00 : f32
    %239 = vector.broadcast %cst_82 : f32 to vector<2x128xf32>
    %240 = arith.addf %238, %239 : vector<2x128xf32>
    %cst_83 = arith.constant 5.000000e-01 : f32
    %241 = vector.broadcast %cst_83 : f32 to vector<2x128xf32>
    %242 = arith.mulf %241, %240 : vector<2x128xf32>
    %243 = vector.extract_strided_slice %234 {offsets = [0, 128], sizes = [2, 128], strides = [1, 1]} : vector<2x512xf32> to vector<2x128xf32>
    %cst_84 = arith.constant 5.000000e-01 : f32
    %244 = vector.broadcast %cst_84 : f32 to vector<2x128xf32>
    %245 = arith.mulf %244, %243 : vector<2x128xf32>
    %246 = math.tanh %245 : vector<2x128xf32>
    %cst_85 = arith.constant 1.000000e+00 : f32
    %247 = vector.broadcast %cst_85 : f32 to vector<2x128xf32>
    %248 = arith.addf %246, %247 : vector<2x128xf32>
    %cst_86 = arith.constant 5.000000e-01 : f32
    %249 = vector.broadcast %cst_86 : f32 to vector<2x128xf32>
    %250 = arith.mulf %249, %248 : vector<2x128xf32>
    %251 = vector.extract_strided_slice %234 {offsets = [0, 256], sizes = [2, 128], strides = [1, 1]} : vector<2x512xf32> to vector<2x128xf32>
    %252 = math.tanh %251 : vector<2x128xf32>
    %253 = vector.extract_strided_slice %234 {offsets = [0, 384], sizes = [2, 128], strides = [1, 1]} : vector<2x512xf32> to vector<2x128xf32>
    %cst_87 = arith.constant 5.000000e-01 : f32
    %254 = vector.broadcast %cst_87 : f32 to vector<2x128xf32>
    %255 = arith.mulf %254, %253 : vector<2x128xf32>
    %256 = math.tanh %255 : vector<2x128xf32>
    %cst_88 = arith.constant 1.000000e+00 : f32
    %257 = vector.broadcast %cst_88 : f32 to vector<2x128xf32>
    %258 = arith.addf %256, %257 : vector<2x128xf32>
    %cst_89 = arith.constant 5.000000e-01 : f32
    %259 = vector.broadcast %cst_89 : f32 to vector<2x128xf32>
    %260 = arith.mulf %259, %258 : vector<2x128xf32>
    %261 = arith.mulf %250, %228 : vector<2x128xf32>
    %262 = arith.mulf %242, %252 : vector<2x128xf32>
    %263 = arith.addf %261, %262 : vector<2x128xf32>
    %264 = math.tanh %263 : vector<2x128xf32>
    %265 = arith.mulf %260, %264 : vector<2x128xf32>
    %266 = vector.extract_strided_slice %18 {offsets = [0, 7, 0], sizes = [2, 1, 512], strides = [1, 1, 1]} : vector<2x8x512xf32> to vector<2x1x512xf32>
    %267 = vector.shape_cast %266 : vector<2x1x512xf32> to vector<2x512xf32>
    %cst_90 = arith.constant dense<0.000000e+00> : vector<2x512xf32>
    %268 = tpu.matmul %265, %3, %cst_90 {dimension_numbers = #tpu.dot_dimension_numbers<[1], [0], [0], [1], [0, 0, 1, 1], [], []>} : vector<2x128xf32>, vector<128x512xf32>, vector<2x512xf32> -> vector<2x512xf32>
    %269 = arith.addf %267, %268 : vector<2x512xf32>
    %270 = vector.extract_strided_slice %269 {offsets = [0, 0], sizes = [2, 128], strides = [1, 1]} : vector<2x512xf32> to vector<2x128xf32>
    %cst_91 = arith.constant 5.000000e-01 : f32
    %271 = vector.broadcast %cst_91 : f32 to vector<2x128xf32>
    %272 = arith.mulf %271, %270 : vector<2x128xf32>
    %273 = math.tanh %272 : vector<2x128xf32>
    %cst_92 = arith.constant 1.000000e+00 : f32
    %274 = vector.broadcast %cst_92 : f32 to vector<2x128xf32>
    %275 = arith.addf %273, %274 : vector<2x128xf32>
    %cst_93 = arith.constant 5.000000e-01 : f32
    %276 = vector.broadcast %cst_93 : f32 to vector<2x128xf32>
    %277 = arith.mulf %276, %275 : vector<2x128xf32>
    %278 = vector.extract_strided_slice %269 {offsets = [0, 128], sizes = [2, 128], strides = [1, 1]} : vector<2x512xf32> to vector<2x128xf32>
    %cst_94 = arith.constant 5.000000e-01 : f32
    %279 = vector.broadcast %cst_94 : f32 to vector<2x128xf32>
    %280 = arith.mulf %279, %278 : vector<2x128xf32>
    %281 = math.tanh %280 : vector<2x128xf32>
    %cst_95 = arith.constant 1.000000e+00 : f32
    %282 = vector.broadcast %cst_95 : f32 to vector<2x128xf32>
    %283 = arith.addf %281, %282 : vector<2x128xf32>
    %cst_96 = arith.constant 5.000000e-01 : f32
    %284 = vector.broadcast %cst_96 : f32 to vector<2x128xf32>
    %285 = arith.mulf %284, %283 : vector<2x128xf32>
    %286 = vector.extract_strided_slice %269 {offsets = [0, 256], sizes = [2, 128], strides = [1, 1]} : vector<2x512xf32> to vector<2x128xf32>
    %287 = math.tanh %286 : vector<2x128xf32>
    %288 = vector.extract_strided_slice %269 {offsets = [0, 384], sizes = [2, 128], strides = [1, 1]} : vector<2x512xf32> to vector<2x128xf32>
    %cst_97 = arith.constant 5.000000e-01 : f32
    %289 = vector.broadcast %cst_97 : f32 to vector<2x128xf32>
    %290 = arith.mulf %289, %288 : vector<2x128xf32>
    %291 = math.tanh %290 : vector<2x128xf32>
    %cst_98 = arith.constant 1.000000e+00 : f32
    %292 = vector.broadcast %cst_98 : f32 to vector<2x128xf32>
    %293 = arith.addf %291, %292 : vector<2x128xf32>
    %cst_99 = arith.constant 5.000000e-01 : f32
    %294 = vector.broadcast %cst_99 : f32 to vector<2x128xf32>
    %295 = arith.mulf %294, %293 : vector<2x128xf32>
    %296 = arith.mulf %285, %263 : vector<2x128xf32>
    %297 = arith.mulf %277, %287 : vector<2x128xf32>
    %298 = arith.addf %296, %297 : vector<2x128xf32>
    %299 = math.tanh %298 : vector<2x128xf32>
    %300 = arith.mulf %295, %299 : vector<2x128xf32>
    %301 = vector.shape_cast %55 : vector<2x128xf32> to vector<2x1x128xf32>
    %302 = vector.shape_cast %90 : vector<2x128xf32> to vector<2x1x128xf32>
    %303 = vector.shape_cast %125 : vector<2x128xf32> to vector<2x1x128xf32>
    %304 = vector.shape_cast %160 : vector<2x128xf32> to vector<2x1x128xf32>
    %305 = vector.shape_cast %195 : vector<2x128xf32> to vector<2x1x128xf32>
    %306 = vector.shape_cast %230 : vector<2x128xf32> to vector<2x1x128xf32>
    %307 = vector.shape_cast %265 : vector<2x128xf32> to vector<2x1x128xf32>
    %308 = vector.shape_cast %300 : vector<2x128xf32> to vector<2x1x128xf32>
    %309 = tpu.concatenate %301, %302, %303, %304, %305, %306, %307, %308 in 1 : vector<2x1x128xf32>, vector<2x1x128xf32>, vector<2x1x128xf32>, vector<2x1x128xf32>, vector<2x1x128xf32>, vector<2x1x128xf32>, vector<2x1x128xf32>, vector<2x1x128xf32> -> vector<2x8x128xf32>
    %c0_100 = arith.constant 0 : index
    %310 = arith.index_cast %16 : i32 to index
    %c0_101 = arith.constant 0 : index
    %311 = vector.load %arg6[%c0_100, %310, %c0_101] : memref<2x8x128xf32, #tpu.memory_space<vmem>>, vector<2x8x128xf32>
    tpu.vector_store %arg6[%c0_100, %310, %c0_101], %309 {strides = array<i32>} : memref<2x8x128xf32, #tpu.memory_space<vmem>>, vector<2x8x128xf32>,
    %c0_102 = arith.constant 0 : index
    %c0_103 = arith.constant 0 : index
    %312 = vector.load %arg10[%c0_102, %c0_103] : memref<2x128xf32, #tpu.memory_space<vmem>>, vector<2x128xf32>
    tpu.vector_store %arg10[%c0_102, %c0_103], %300 {strides = array<i32>} : memref<2x128xf32, #tpu.memory_space<vmem>>, vector<2x128xf32>,
    %c0_104 = arith.constant 0 : index
    %c0_105 = arith.constant 0 : index
    %313 = vector.load %arg11[%c0_104, %c0_105] : memref<2x128xf32, #tpu.memory_space<vmem>>, vector<2x128xf32>
    tpu.vector_store %arg11[%c0_104, %c0_105], %298 {strides = array<i32>} : memref<2x128xf32, #tpu.memory_space<vmem>>, vector<2x128xf32>,
    %c1_i32_106 = arith.constant 1 : i32
    %c0_i32_107 = arith.constant 0 : i32
    %314 = arith.cmpi eq, %arg1, %c0_i32_107 : i32
    %315 = arith.extui %314 : i1 to i32
    %c0_i32_108 = arith.constant 0 : i32
    %316 = arith.cmpi ne, %315, %c0_i32_108 : i32
    scf.if %316 {
      %c0_109 = arith.constant 0 : index
      %c0_110 = arith.constant 0 : index
      %317 = vector.load %arg10[%c0_109, %c0_110] : memref<2x128xf32, #tpu.memory_space<vmem>>, vector<2x128xf32>
      %c0_111 = arith.constant 0 : index
      %c0_112 = arith.constant 0 : index
      %318 = vector.load %arg7[%c0_111, %c0_112] : memref<2x128xf32, #tpu.memory_space<vmem>>, vector<2x128xf32>
      tpu.vector_store %arg7[%c0_111, %c0_112], %317 {strides = array<i32>} : memref<2x128xf32, #tpu.memory_space<vmem>>, vector<2x128xf32>,
      %c0_113 = arith.constant 0 : index
      %c0_114 = arith.constant 0 : index
      %319 = vector.load %arg11[%c0_113, %c0_114] : memref<2x128xf32, #tpu.memory_space<vmem>>, vector<2x128xf32>
      %c0_115 = arith.constant 0 : index
      %c0_116 = arith.constant 0 : index
      %320 = vector.load %arg8[%c0_115, %c0_116] : memref<2x128xf32, #tpu.memory_space<vmem>>, vector<2x128xf32>
      tpu.vector_store %arg8[%c0_115, %c0_116], %319 {strides = array<i32>} : memref<2x128xf32, #tpu.memory_space<vmem>>, vector<2x128xf32>,
    } else {
    }
    return
  }
  func.func @transform_0(%arg0: i32, %arg1: i32) -> (i32, i32, i32) {
    %c0_i32 = arith.constant 0 : i32
    %c0_i32_0 = arith.constant 0 : i32
    return %arg0, %arg1, %c0_i32 : i32, i32, i32
  }
  func.func @transform_1(%arg0: i32, %arg1: i32) -> (i32, i32) {
    %c0_i32 = arith.constant 0 : i32
    %c0_i32_0 = arith.constant 0 : i32
    %c0_i32_1 = arith.constant 0 : i32
    return %c0_i32, %c0_i32_0 : i32, i32
  }
  func.func @transform_2(%arg0: i32, %arg1: i32) -> (i32, i32) {
    %c0_i32 = arith.constant 0 : i32
    %c0_i32_0 = arith.constant 0 : i32
    %c0_i32_1 = arith.constant 0 : i32
    return %c0_i32, %c0_i32_0 : i32, i32
  }
  func.func @transform_3(%arg0: i32, %arg1: i32) -> (i32, i32) {
    %c0_i32 = arith.constant 0 : i32
    %c0_i32_0 = arith.constant 0 : i32
    %c0_i32_1 = arith.constant 0 : i32
    return %c0_i32, %c0_i32_0 : i32, i32
  }
  func.func @transform_4(%arg0: i32, %arg1: i32) -> (i32, i32, i32) {
    %c0_i32 = arith.constant 0 : i32
    %c0_i32_0 = arith.constant 0 : i32
    return %arg0, %arg1, %c0_i32 : i32, i32, i32
  }
  func.func @transform_5(%arg0: i32, %arg1: i32) -> (i32, i32) {
    %c0_i32 = arith.constant 0 : i32
    %c0_i32_0 = arith.constant 0 : i32
    return %arg0, %c0_i32 : i32, i32
  }
  func.func @transform_6(%arg0: i32, %arg1: i32) -> (i32, i32) {
    %c0_i32 = arith.constant 0 : i32
    %c0_i32_0 = arith.constant 0 : i32
    return %arg0, %c0_i32 : i32, i32
  }
}

</mosaic_0001>

<bundles_post_ra>
// kernel: tpu_custom_call.1
= control target key start
LH: loop header
LB: loop body
LE: loop exit
PB: predicated region body
PF: predicated region fallthrough
CT: control target
= control target key end

     0   :  { %12 = vsyncpa [#allocation6], 0  ;;  %s3530_s0 = inlined_call_operand.vmem [shape: f32[2,8,4], index: 0, kind: input, shape index: {}]   ;;  %s3531_s1 = inlined_call_operand.vmem [shape: f32[4,512], index: 1, kind: input, shape index: {}]   ;;  %s3532_s2 = inlined_call_operand.hbm [shape: f32[128,512], index: 2, kind: input, shape index: {}]   ;;  %s3533_s3 = inlined_call_operand.vmem [shape: f32[1,512], index: 3, kind: input, shape index: {}]   ;;  %s3534_s4 = inlined_call_operand.hbm [shape: f32[2,8,128], index: 4, kind: output, shape index: {0}]   ;;  %s3535_s5 = inlined_call_operand.hbm [shape: f32[2,128], index: 5, kind: output, shape index: {1}]   ;;  %s3536_s6 = inlined_call_operand.hbm [shape: f32[2,128], index: 6, kind: output, shape index: {2}]  }
   0x1   :  { %13 = vsyncpa [#allocation7], 0 }
   0x2   :  { %14 = vsyncpa [#allocation10], 0  ;;  %s2470_s21 = smov [#allocation5]  }
   0x3   :  { %s24_s22 = sshll.u32 %s2470_s21, 4  ;;  %s25_s22 = int_to_ptr.vmem [resolvable:$true] %s24_s22 }
   0x4   :  { %s2392_s23 = scalar_lea.vmem %s25_s22, 8192  ;;  %p2397_p1 = scmp.lt.s32.totalorder %s25_s22, %s25_s22 }
   0x5   :  { %p2393_p0 = scmp.ne.s32.totalorder %s25_s22, %s2392_s23  ;;  %p2398_p2 = scmp.lt.s32.totalorder %s2392_s23, %s2392_s23 }
   0x7   :  { %p2399_p3 = por %p2398_p2, %p2397_p1 }
   0x9   :  { %p2400_p4 = pnand %p2399_p3, %p2393_p0 }
   0xb   :  { %2403 = shalt.err (!%p2400_p4)
}
   0xc   :  { %s2471_s24 = smov 512   ;;  %s2472_s25 = smov 32  }
   0xd   :  { %30 = dma.hbm_to_vmem [thread:$0]  %s3532_s2, 8192, %s25_s22, [#allocation6], %s2471_s24, %s2471_s24, %s2472_s25  }
   0xe   :  { %2464 = dma.done.wait [#allocation6], 8192  }
   0xf   :  { %2465 = vsyncadd [#allocation6], 4294959104  ;;  %v3539_v0 = vmov 0.0   ;;  %v108_v1 = vld [vmem:[%s3531_s1] sm:$0xff]  ;;  %vm143_vm0 = vcmask 1043456   ;;  %v109_v2 = vld [vmem:[%s3531_s1 + $0x8] sm:$0xff] }
  0x10   :  { %216 = vmatprep.mubr.f32.mxu0 %v3539_v0  ;;  %40 = vst [vmem:[#allocation3] sm:$0x3] %v3539_v0  ;;  %41 = vst [vmem:[#allocation4] sm:$0x3] %v3539_v0  ;;  %293 = vmatprep.mubr.f32.mxu1 %v3539_v0  ;;  %v134_v3 = vcombine.high %v108_v1, %v108_v1  ;;  %v135_v4 = vcombine.high %v109_v2, %v109_v2  ;;  %v106_v5 = vld [vmem:[%s3530_s0] sm:$0xff]  ;;  %vm136_vm1 = vcmask 31744  }
  0x11   :  { %v2530_v6 = vld [vmem:[#allocation5 + $0x1e8] sm:$0xff]  ;;  %v2534_v7 = vld [vmem:[#allocation5 + $0x1f8] sm:$0xff]  ;;  %v2538_v8 = vld [vmem:[#allocation5 + $0x1e0] sm:$0xff]  ;;  %vm536_vm2 = vcmask 1041409   ;;  %vm2054_vm3 = vcmask 1040384   ;;  %vm2057_vm4 = vcmask 1041408  }
  0x12   :  { %3680 = vst [vmem:[#allocation15_spill] sm:$0xff] %v2530_v6  ;;  %2141 = vmatprep.subr.msk.mxu0 %vm143_vm0, %v134_v3  ;;  %2145 = vmatprep.subr.msk.mxu1 %vm143_vm0, %v135_v4  ;;  %3681 = vst [vmem:[#allocation16_spill] sm:$0xff] %v2534_v7  ;;  %v2540_v9 = vld [vmem:[#allocation5 + $0x1f0] sm:$0xff]  ;;  %v2544_v10 = vld [vmem:[#allocation5 + $0x1c8] sm:$0xff]  ;;  %vm2060_vm5 = vcmask 1042432   ;;  %vm2065_vm6 = vcmask 1044480  }
  0x13   :  { %2142 = vmatpush1.msk.msra.mxu0 %vm143_vm0, %v108_v1  ;;  %2146 = vmatpush1.msk.msra.mxu1 %vm143_vm0, %v109_v2  ;;  %v2546_v11 = vld [vmem:[#allocation5 + $0x1d8] sm:$0xff]  ;;  %v2550_v12 = vld [vmem:[#allocation5 + $0x1c0] sm:$0xff]  ;;  %v2552_v13 = vld [vmem:[#allocation5 + $0x1d0] sm:$0xff]  ;;  %vm2068_vm7 = vcmask 1045504   ;;  %vm2071_vm8 = vcmask 1046528  }
  0x14   :  { %2143 = vmatmul.mubr.msk.f32.vlgmr.msra.gmra.mxu0 %vm136_vm1, %v106_v5  ;;  %327 = vmatprep.subr.mxu0 %v2530_v6  ;;  %v2556_v14 = vld [vmem:[#allocation5 + $0x1a8] sm:$0xff]  ;;  %v2558_v15 = vld [vmem:[#allocation5 + $0x1b8] sm:$0xff]  ;;  %v2562_v16 = vld [vmem:[#allocation5 + $0x1a0] sm:$0xff] }
  0x15   :  { %398 = vmatprep.subr.mxu1 %v2534_v7  ;;  %2147 = vmatmul.mubr.msk.f32.vlgmr.msra.gmra.mxu1 %vm136_vm1, %v106_v5  ;;  %v2564_v17 = vld [vmem:[#allocation5 + $0x1b0] sm:$0xff]  ;;  %v2568_v18 = vld [vmem:[#allocation5 + $0x188] sm:$0xff]  ;;  %v2570_v19 = vld [vmem:[#allocation5 + $0x198] sm:$0xff] }
  0x16   :  { %328 = vmatpush1.msra.mxu0 %v2538_v8  ;;  %399 = vmatpush1.msra.mxu1 %v2540_v9  ;;  %v2574_v20 = vld [vmem:[#allocation5 + $0x180] sm:$0xff]  ;;  %v2576_v21 = vld [vmem:[#allocation5 + $0x190] sm:$0xff]  ;;  %v2580_v22 = vld [vmem:[#allocation5 + $0x168] sm:$0xff] }
  0x17   :  { %329 = vmatprep.subr.mxu0 %v2544_v10  ;;  %400 = vmatprep.subr.mxu1 %v2546_v11  ;;  %v2582_v23 = vld [vmem:[#allocation5 + $0x178] sm:$0xff]  ;;  %v2586_v24 = vld [vmem:[#allocation5 + $0x160] sm:$0xff]  ;;  %v2588_v25 = vld [vmem:[#allocation5 + $0x170] sm:$0xff] }
  0x18   :  { %330 = vmatpush1.msra.mxu0 %v2550_v12  ;;  %401 = vmatpush1.msra.mxu1 %v2552_v13  ;;  %v2592_v26 = vld [vmem:[#allocation5 + $0x148] sm:$0xff]  ;;  %v2594_v27 = vld [vmem:[#allocation5 + $0x158] sm:$0xff]  ;;  %v2598_v28 = vld [vmem:[#allocation5 + $0x140] sm:$0xff] }
  0x19   :  { %331 = vmatprep.subr.mxu0 %v2556_v14  ;;  %402 = vmatprep.subr.mxu1 %v2558_v15  ;;  %v2600_v29 = vld [vmem:[#allocation5 + $0x150] sm:$0xff]  ;;  %v2604_v30 = vld [vmem:[#allocation5 + $0x128] sm:$0xff]  ;;  %v2606_v31 = vld [vmem:[#allocation5 + $0x138] sm:$0xff] }
  0x1a   :  { %332 = vmatpush1.msra.mxu0 %v2562_v16  ;;  %403 = vmatpush1.msra.mxu1 %v2564_v17  ;;  %v2610_v32 = vld [vmem:[#allocation5 + $0x120] sm:$0xff]  ;;  %v2612_v33 = vld [vmem:[#allocation5 + $0x130] sm:$0xff]  ;;  %v2616_v34 = vld [vmem:[#allocation5 + $0x108] sm:$0xff] }
  0x1b   :  { %333 = vmatprep.subr.mxu0 %v2568_v18  ;;  %404 = vmatprep.subr.mxu1 %v2570_v19  ;;  %v2618_v35 = vld [vmem:[#allocation5 + $0x118] sm:$0xff]  ;;  %v2622_v36 = vld [vmem:[#allocation5 + $0x100] sm:$0xff]  ;;  %v2624_v37 = vld [vmem:[#allocation5 + $0x110] sm:$0xff] }
  0x1c   :  { %334 = vmatpush1.msra.mxu0 %v2574_v20  ;;  %405 = vmatpush1.msra.mxu1 %v2576_v21  ;;  %v2628_v38 = vld [vmem:[#allocation5 + $0xe8] sm:$0xff]  ;;  %v2630_v39 = vld [vmem:[#allocation5 + $0xf8] sm:$0xff]  ;;  %v2634_v40 = vld [vmem:[#allocation5 + $0xe0] sm:$0xff] }
  0x1d   :  { %335 = vmatprep.subr.mxu0 %v2580_v22  ;;  %406 = vmatprep.subr.mxu1 %v2582_v23  ;;  %v2636_v41 = vld [vmem:[#allocation5 + $0xf0] sm:$0xff]  ;;  %v2640_v42 = vld [vmem:[#allocation5 + $0xc8] sm:$0xff]  ;;  %v2642_v43 = vld [vmem:[#allocation5 + $0xd8] sm:$0xff] }
  0x1e   :  { %336 = vmatpush1.msra.mxu0 %v2586_v24  ;;  %407 = vmatpush1.msra.mxu1 %v2588_v25  ;;  %v2646_v44 = vld [vmem:[#allocation5 + $0xc0] sm:$0xff]  ;;  %v2648_v45 = vld [vmem:[#allocation5 + $0xd0] sm:$0xff]  ;;  %v2652_v46 = vld [vmem:[#allocation5 + $0xa8] sm:$0xff] }
  0x1f   :  { %337 = vmatprep.subr.mxu0 %v2592_v26  ;;  %408 = vmatprep.subr.mxu1 %v2594_v27  ;;  %3682 = vst [vmem:[#allocation17_spill] sm:$0xff] %v2648_v45  ;;  %3683 = vst [vmem:[#allocation18_spill] sm:$0xff] %v2652_v46  ;;  %v2654_v47 = vld [vmem:[#allocation5 + $0xb8] sm:$0xff]  ;;  %v2658_v48 = vld [vmem:[#allocation5 + $0xa0] sm:$0xff] }
  0x20   :  { %338 = vmatpush1.msra.mxu0 %v2598_v28  ;;  %409 = vmatpush1.msra.mxu1 %v2600_v29  ;;  %3684 = vst [vmem:[#allocation19_spill] sm:$0xff] %v2654_v47  ;;  %3685 = vst [vmem:[#allocation20_spill] sm:$0xff] %v2658_v48  ;;  %v2660_v49 = vld [vmem:[#allocation5 + $0xb0] sm:$0xff]  ;;  %v2664_v50 = vld [vmem:[#allocation5 + $0x88] sm:$0xff] }
  0x21   :  { %339 = vmatprep.subr.mxu0 %v2604_v30  ;;  %410 = vmatprep.subr.mxu1 %v2606_v31  ;;  %3686 = vst [vmem:[#allocation21_spill] sm:$0xff] %v2660_v49  ;;  %3687 = vst [vmem:[#allocation22_spill] sm:$0xff] %v2664_v50  ;;  %v2666_v51 = vld [vmem:[#allocation5 + $0x98] sm:$0xff]  ;;  %v2670_v52 = vld [vmem:[#allocation5 + $0x80] sm:$0xff] }
  0x22   :  { %340 = vmatpush1.msra.mxu0 %v2610_v32  ;;  %411 = vmatpush1.msra.mxu1 %v2612_v33  ;;  %3688 = vst [vmem:[#allocation23_spill] sm:$0xff] %v2666_v51  ;;  %3689 = vst [vmem:[#allocation24_spill] sm:$0xff] %v2670_v52  ;;  %v2672_v53 = vld [vmem:[#allocation5 + $0x90] sm:$0xff]  ;;  %v2676_v54 = vld [vmem:[#allocation5 + $0x68] sm:$0xff] }
  0x23   :  { %341 = vmatprep.subr.mxu0 %v2616_v34  ;;  %412 = vmatprep.subr.mxu1 %v2618_v35  ;;  %3690 = vst [vmem:[#allocation25_spill] sm:$0xff] %v2672_v53  ;;  %3691 = vst [vmem:[#allocation26_spill] sm:$0xff] %v2676_v54  ;;  %v2678_v55 = vld [vmem:[#allocation5 + $0x78] sm:$0xff]  ;;  %v2682_v56 = vld [vmem:[#allocation5 + $0x60] sm:$0xff] }
  0x24   :  { %342 = vmatpush1.msra.mxu0 %v2622_v36  ;;  %413 = vmatpush1.msra.mxu1 %v2624_v37  ;;  %3692 = vst [vmem:[#allocation27_spill] sm:$0xff] %v2678_v55  ;;  %3693 = vst [vmem:[#allocation28_spill] sm:$0xff] %v2682_v56  ;;  %v2686_v57 = vld [vmem:[#allocation5 + $0x70] sm:$0xff]  ;;  %v107_v58 = vld [vmem:[%s3530_s0 + $0x8] sm:$0xff] }
  0x25   :  { %343 = vmatprep.subr.mxu0 %v2628_v38  ;;  %414 = vmatprep.subr.mxu1 %v2630_v39  ;;  %3694 = vst [vmem:[#allocation29_spill] sm:$0xff] %v2686_v57  ;;  %v2693_v59 = vld [vmem:[#allocation5 + $0x48] sm:$0xff]  ;;  %v2695_v60 = vld [vmem:[#allocation5 + $0x58] sm:$0xff]  ;;  %v2699_v61 = vld [vmem:[#allocation5 + $0x40] sm:$0xff] }
  0x26   :  { %344 = vmatpush1.msra.mxu0 %v2634_v40  ;;  %415 = vmatpush1.msra.mxu1 %v2636_v41  ;;  %3695 = vst [vmem:[#allocation30_spill] sm:$0xff] %v2693_v59  ;;  %3696 = vst [vmem:[#allocation31_spill] sm:$0xff] %v2695_v60  ;;  %v2703_v62 = vld [vmem:[#allocation5 + $0x50] sm:$0xff]  ;;  %v2705_v63 = vld [vmem:[#allocation5 + $0x28] sm:$0xff] }
  0x27   :  { %345 = vmatprep.subr.mxu0 %v2640_v42  ;;  %416 = vmatprep.subr.mxu1 %v2642_v43  ;;  %3697 = vst [vmem:[#allocation32_spill] sm:$0xff] %v2699_v61  ;;  %3698 = vst [vmem:[#allocation33_spill] sm:$0xff] %v2703_v62  ;;  %v2709_v1 = vld [vmem:[#allocation5 + $0x38] sm:$0xff]  ;;  %v2713_v2 = vld [vmem:[#allocation5 + $0x20] sm:$0xff] }
  0x28   :  { %346 = vmatpush1.msra.mxu0 %v2646_v44  ;;  %417 = vmatpush1.msra.mxu1 %v2648_v45  ;;  %3699 = vst [vmem:[#allocation34_spill] sm:$0xff] %v2705_v63  ;;  %3700 = vst [vmem:[#allocation35_spill] sm:$0xff] %v2709_v1  ;;  %v2715_v3 = vld [vmem:[#allocation5 + $0x30] sm:$0xff]  ;;  %v2719_v4 = vld [vmem:[#allocation5 + $0x8] sm:$0xff] }
  0x29   :  { %347 = vmatprep.subr.mxu0 %v2652_v46  ;;  %418 = vmatprep.subr.mxu1 %v2654_v47  ;;  %3701 = vst [vmem:[#allocation36_spill] sm:$0xff] %v2713_v2  ;;  %3702 = vst [vmem:[#allocation37_spill] sm:$0xff] %v2715_v3  ;;  %v2721_v5 = vld [vmem:[#allocation5 + $0x18] sm:$0xff] }
  0x2a   :  { %348 = vmatpush1.msra.mxu0 %v2658_v48  ;;  %419 = vmatpush1.msra.mxu1 %v2660_v49  ;;  %3703 = vst [vmem:[#allocation38_spill] sm:$0xff] %v2719_v4  ;;  %3704 = vst [vmem:[#allocation39_spill] sm:$0xff] %v2721_v5 }
  0x2b   :  { %349 = vmatprep.subr.mxu0 %v2664_v50  ;;  %420 = vmatprep.subr.mxu1 %v2666_v51 }
  0x2c   :  { %350 = vmatpush1.msra.mxu0 %v2670_v52  ;;  %421 = vmatpush1.msra.mxu1 %v2672_v53 }
  0x2d   :  { %351 = vmatprep.subr.mxu0 %v2676_v54  ;;  %422 = vmatprep.subr.mxu1 %v2678_v55 }
  0x2e   :  { %222 = vmatprep.mubr.f32.mxu0 %v3539_v0  ;;  %352 = vmatpush1.msra.mxu0 %v2682_v56 }
  0x2f   :  { %423 = vmatpush1.msra.mxu1 %v2686_v57  ;;  %2144 = vmatmul.mubr.msk.f32.gmra.mxu0 %vm136_vm1, %v107_v58 }
  0x30   :  { %353 = vmatprep.subr.mxu0 %v2693_v59  ;;  %424 = vmatprep.subr.mxu1 %v2695_v60  ;;  %v2725_v60 = vld [vmem:[#allocation5] sm:$0xff] }
  0x31   :  { %299 = vmatprep.mubr.f32.mxu1 %v3539_v0  ;;  %354 = vmatpush1.msra.mxu0 %v2699_v61  ;;  %3705 = vst [vmem:[#allocation40_spill] sm:$0xff] %v2725_v60  ;;  %v2729_v0 = vld [vmem:[#allocation5 + $0x10] sm:$0xff] }
  0x32   :  { %425 = vmatpush1.msra.mxu1 %v2703_v62  ;;  %355 = vmatprep.subr.mxu0 %v2705_v63  ;;  %3706 = vst [vmem:[#allocation41_spill] sm:$0xff] %v2729_v0  ;;  %v325_v63 = vld [vmem:[#allocation3] sm:$0x3]  ;;  %v3707_v62 = vmov 0.0  }
  0x33   :  { %2148 = vmatmul.mubr.msk.f32.gmra.mxu1 %vm136_vm1, %v107_v58  ;;  %426 = vmatprep.subr.mxu1 %v2709_v1  ;;  %v3708_v58 = vld [vmem:[#allocation31_spill] sm:$0xff] }
  0x34   :  { %356 = vmatpush1.msra.mxu0 %v2713_v2  ;;  %427 = vmatpush1.msra.mxu1 %v2715_v3 }
  0x35   :  { %357 = vmatprep.subr.mxu0 %v2719_v4  ;;  %428 = vmatprep.subr.mxu1 %v2721_v5 }
  0x36   :  { %358 = vmatpush1.msra.mxu0 %v2725_v60  ;;  %391 = vmatprep.mubr.f32.mxu0 %v3707_v62 }
  0x37   :  { %429 = vmatpush1.msra.mxu1 %v2729_v0  ;;  %462 = vmatprep.mubr.f32.mxu1 %v3707_v62 }
  0x38   :  { %392 = vmatmul.mubr.f32.vlgmr.msra.gmra.mxu0 %v325_v63  ;;  %463 = vmatmul.mubr.f32.vlgmr.msra.gmra.mxu1 %v325_v63  ;;  %v3709_v63 = vld [vmem:[#allocation33_spill] sm:$0xff] }
  0x39   :  { %539 = vmatprep.subr.mxu0 %v2530_v6  ;;  %610 = vmatprep.subr.mxu1 %v2534_v7 }
  0x3a   :  { %540 = vmatpush1.msra.mxu0 %v2538_v8  ;;  %611 = vmatpush1.msra.mxu1 %v2540_v9 }
  0x3b   :  { %541 = vmatprep.subr.mxu0 %v2544_v10  ;;  %612 = vmatprep.subr.mxu1 %v2546_v11 }
  0x3c   :  { %542 = vmatpush1.msra.mxu0 %v2550_v12  ;;  %613 = vmatpush1.msra.mxu1 %v2552_v13 }
  0x3d   :  { %543 = vmatprep.subr.mxu0 %v2556_v14  ;;  %614 = vmatprep.subr.mxu1 %v2558_v15 }
  0x3e   :  { %544 = vmatpush1.msra.mxu0 %v2562_v16  ;;  %615 = vmatpush1.msra.mxu1 %v2564_v17 }
  0x3f   :  { %545 = vmatprep.subr.mxu0 %v2568_v18  ;;  %616 = vmatprep.subr.mxu1 %v2570_v19 }
  0x40   :  { %546 = vmatpush1.msra.mxu0 %v2574_v20  ;;  %617 = vmatpush1.msra.mxu1 %v2576_v21 }
  0x41   :  { %547 = vmatprep.subr.mxu0 %v2580_v22  ;;  %618 = vmatprep.subr.mxu1 %v2582_v23 }
  0x42   :  { %548 = vmatpush1.msra.mxu0 %v2586_v24  ;;  %619 = vmatpush1.msra.mxu1 %v2588_v25 }
  0x43   :  { %549 = vmatprep.subr.mxu0 %v2592_v26  ;;  %620 = vmatprep.subr.mxu1 %v2594_v27 }
  0x44   :  { %550 = vmatpush1.msra.mxu0 %v2598_v28  ;;  %621 = vmatpush1.msra.mxu1 %v2600_v29 }
  0x45   :  { %551 = vmatprep.subr.mxu0 %v2604_v30  ;;  %622 = vmatprep.subr.mxu1 %v2606_v31 }
  0x46   :  { %552 = vmatpush1.msra.mxu0 %v2610_v32  ;;  %623 = vmatpush1.msra.mxu1 %v2612_v33 }
  0x47   :  { %553 = vmatprep.subr.mxu0 %v2616_v34  ;;  %624 = vmatprep.subr.mxu1 %v2618_v35 }
  0x48   :  { %554 = vmatpush1.msra.mxu0 %v2622_v36  ;;  %625 = vmatpush1.msra.mxu1 %v2624_v37 }
  0x49   :  { %555 = vmatprep.subr.mxu0 %v2628_v38  ;;  %626 = vmatprep.subr.mxu1 %v2630_v39 }
  0x4a   :  { %556 = vmatpush1.msra.mxu0 %v2634_v40  ;;  %627 = vmatpush1.msra.mxu1 %v2636_v41 }
  0x4b   :  { %557 = vmatprep.subr.mxu0 %v2640_v42  ;;  %628 = vmatprep.subr.mxu1 %v2642_v43 }
  0x4c   :  { %558 = vmatpush1.msra.mxu0 %v2646_v44  ;;  %629 = vmatpush1.msra.mxu1 %v2648_v45 }
  0x4d   :  { %559 = vmatprep.subr.mxu0 %v2652_v46  ;;  %630 = vmatprep.subr.mxu1 %v2654_v47 }
  0x4e   :  { %560 = vmatpush1.msra.mxu0 %v2658_v48  ;;  %631 = vmatpush1.msra.mxu1 %v2660_v49 }
  0x4f   :  { %561 = vmatprep.subr.mxu0 %v2664_v50  ;;  %632 = vmatprep.subr.mxu1 %v2666_v51  ;;  %v3710_v51 = vld [vmem:[#allocation34_spill] sm:$0xff] }
  0x50   :  { %562 = vmatpush1.msra.mxu0 %v2670_v52  ;;  %633 = vmatpush1.msra.mxu1 %v2672_v53 }
  0x51   :  { %563 = vmatprep.subr.mxu0 %v2676_v54  ;;  %634 = vmatprep.subr.mxu1 %v2678_v55 }
  0x52   :  { %564 = vmatpush1.msra.mxu0 %v2682_v56  ;;  %635 = vmatpush1.msra.mxu1 %v2686_v57 }
  0x53   :  { %565 = vmatprep.subr.mxu0 %v2693_v59  ;;  %636 = vmatprep.subr.mxu1 %v3708_v58 }
  0x54   :  { %566 = vmatpush1.msra.mxu0 %v2699_v61  ;;  %637 = vmatpush1.msra.mxu1 %v3709_v63 }
  0x55   :  { %567 = vmatprep.subr.mxu0 %v3710_v51  ;;  %638 = vmatprep.subr.mxu1 %v2709_v1  ;;  %v112_v1 = vlaneseq }
  0x56   :  { %568 = vmatpush1.msra.mxu0 %v2713_v2  ;;  %639 = vmatpush1.msra.mxu1 %v2715_v3 }
  0x57   :  { %569 = vmatprep.subr.mxu0 %v2719_v4  ;;  %640 = vmatprep.subr.mxu1 %v2721_v5  ;;  %v113_v2 = vshrl.u32 %v112_v1, 7  ;;  %v110_v5 = vld [vmem:[%s3533_s3] sm:$0xf]  ;;  %s2474_s3 = smov [#allocation8]  }
  0x58   :  { %570 = vmatpush1.msra.mxu0 %v2725_v60  ;;  %603 = vmatprep.mubr.f32.mxu0 %v3707_v62  ;;  %s2102_s11 = sshll.u32 %s2474_s3, 4  ;;  %s2103_s11 = int_to_ptr.vmem [resolvable:$true] %s2102_s11 }
  0x59   :  { %641 = vmatpush1.msra.mxu1 %v2729_v0  ;;  %674 = vmatprep.mubr.f32.mxu1 %v3707_v62  ;;  %v114_v3 = vsub.s32 0, %v113_v2  ;;  %v118_v4 = vsub.s32 1, %v113_v2  ;;  %v122_v59 = vsub.s32 2, %v113_v2  ;;  %s2404_s12 = scalar_lea.vmem %s2103_s11, 256  ;;  %p2409_p6 = scmp.lt.s32.totalorder %s2103_s11, %s2103_s11 }
  0x5a   :  { %752 = vmatprep.subr.mxu0 %v2530_v6  ;;  %823 = vmatprep.subr.mxu1 %v2534_v7  ;;  %p2405_p5 = scmp.ne.s32.totalorder %s2103_s11, %s2404_s12  ;;  %p2410_p7 = scmp.lt.s32.totalorder %s2404_s12, %s2404_s12 }
  0x5b   :  { %v115_v58 = vrot.slane %v110_v5, %v114_v3  ;;  %v119_v57 = vrot.slane %v110_v5, %v118_v4  ;;  %v123_v1 = vrot.slane %v110_v5, %v122_v59  ;;  %v126_v59 = vsub.s32 3, %v113_v2 }
  0x5c   :  { %p2411_p8 = por %p2410_p7, %p2409_p6 }
  0x5e   :  { %p2412_p9 = pnand %p2411_p8, %p2405_p5 }
  0xd4   :  { %v218_v51 = vpop.f32.mrf.mxu0 }
  0xd5   :  { %v295_v63 = vpop.f32.mrf.mxu1  ;;  %v2808_v56 = vadd.f32 %v218_v51, %v115_v58 }
  0xd6   :  { %v220_v60 = vpop.f32.mrf.mxu0  ;;  %v2819_v46 = vadd.f32 %v295_v63, %v123_v1 }
  0xd7   :  { %v297_v0 = vpop.f32.mrf.mxu1  ;;  %3711 = vst [vmem:[#allocation42_spill] sm:$0xff] %v2808_v56  ;;  %v2813_v50 = vadd.f32 %v220_v60, %v119_v57 }
  0xd8   :  { %3715 = vst [vmem:[#allocation46_spill] sm:$0xff] %v2819_v46 }
  0xd9   :  { %3713 = vst [vmem:[#allocation44_spill] sm:$0xff] %v2813_v50 }
  0xef   :  { %v224_v61 = vpop.f32.mrf.mxu0 }
  0xf0   :  { %v2810_v55 = vadd.f32 %v224_v61, %v115_v58 }
  0xf1   :  { %v226_v6 = vpop.f32.mrf.mxu0 }
  0xf2   :  { %3712 = vst [vmem:[#allocation43_spill] sm:$0xff] %v2810_v55  ;;  %v2816_v47 = vadd.f32 %v226_v6, %v119_v57 }
  0xf3   :  { %v301_v62 = vpop.f32.mrf.mxu1 }
  0xf4   :  { %3714 = vst [vmem:[#allocation45_spill] sm:$0xff] %v2816_v47  ;;  %v2821_v45 = vadd.f32 %v301_v62, %v123_v1 }
  0xf5   :  { %v303_v54 = vpop.f32.mrf.mxu1 }
  0xf6   :  { %3716 = vst [vmem:[#allocation47_spill] sm:$0xff] %v2821_v45 }
  0xf8   :  { %v393_v7 = vpop.f32.mrf.mxu0  ;;  %v464_v58 = vpop.f32.mrf.mxu1 }
  0xf9   :  { %v473_v53 = vrot.slane %v393_v7, 1  ;;  %v485_v52 = vadd.f32 %v393_v7, %v2808_v56  ;;  %v475_v7 = vrot.slane %v464_v58, 1 }
  0xfa   :  { %v395_v49 = vpop.f32.mrf.mxu0  ;;  %v466_v57 = vpop.f32.mrf.mxu1 }
  0xfb   :  { %v489_v3 = vadd.f32 %v473_v53, %v2810_v55  ;;  %v493_v48 = vmul.f32 0.5, %v485_v52  ;;  %v474_v4 = vrot.slane %v395_v49, 1  ;;  %v486_v51 = vadd.f32 %v395_v49, %v2813_v50 }
  0xfc   :  { %v487_v52 = vadd.f32 %v464_v58, %v2819_v46  ;;  %v127_v53 = vrot.slane %v110_v5, %v126_v59  ;;  %v491_v49 = vadd.f32 %v475_v7, %v2821_v45 }
  0xfd   :  { %v494_v61 = vmul.f32 0.5, %v489_v3  ;;  %2160 = vtanh.f32 %v493_v48  ;;  %v490_v60 = vadd.f32 %v474_v4, %v2816_v47  ;;  %v501_v56 = vmul.f32 0.5, %v486_v51 }
  0xfe   :  { %v2826_v2 = vadd.f32 %v303_v54, %v127_v53  ;;  %v476_v48 = vrot.slane %v466_v57, 1  ;;  %v2828_v62 = vadd.f32 %v297_v0, %v127_v53 }
  0xff   :  { %2162 = vtanh.f32 %v494_v61  ;;  %v502_v6 = vmul.f32 0.5, %v490_v60 }
 0x100   :  { %2164 = vtanh.f32 %v501_v56  ;;  %3717 = vst [vmem:[#allocation48_spill] sm:$0xff] %v2826_v2  ;;  %3718 = vst [vmem:[#allocation49_spill] sm:$0xff] %v2828_v62  ;;  %v492_v63 = vadd.f32 %v476_v48, %v2826_v2  ;;  %v488_v3 = vadd.f32 %v466_v57, %v2828_v62  ;;  %v326_v56 = vld [vmem:[#allocation4] sm:$0x3] }
 0x101   :  { %2166 = vtanh.f32 %v502_v6 }
 0x102   :  { %2168 = vtanh.f32 %v487_v52  ;;  %v512_v5 = vmul.f32 0.5, %v492_v63  ;;  %v511_v54 = vmul.f32 0.5, %v488_v3  ;;  %v520_v52 = vrot.slane %v326_v56, 1 }
 0x103   :  { %2170 = vtanh.f32 %v491_v49 }
 0x104   :  { %2172 = vtanh.f32 %v512_v5 }
 0x105   :  { %2174 = vtanh.f32 %v511_v54 }
 0x10a   :  { %v2161_v1 = vpop.eup %2160 }
 0x10b   :  { %v497_v4 = vadd.f32 1.0, %v2161_v1 }
 0x10c   :  { %v2163_v51 = vpop.eup %2162 }
 0x10d   :  { %v2165_v59 = vpop.eup %2164  ;;  %v498_v61 = vadd.f32 1.0, %v2163_v51  ;;  %v499_v58 = vmul.f32 0.5, %v497_v4 }
 0x10e   :  { %v505_v7 = vadd.f32 1.0, %v2165_v59  ;;  %v2167_v60 = vpop.eup %2166 }
 0x10f   :  { %v500_v6 = vmul.f32 0.5, %v498_v61  ;;  %v506_v49 = vadd.f32 1.0, %v2167_v60  ;;  %v2169_v53 = vpop.eup %2168 }
 0x110   :  { %v507_v0 = vmul.f32 0.5, %v505_v7  ;;  %v525_v46 = vmul.f32 %v2169_v53, %v499_v58  ;;  %v2171_v57 = vpop.eup %2170  ;;  %v3726_v53 = vld [vmem:[#allocation22_spill] sm:$0xff] }
 0x111   :  { %v508_v48 = vmul.f32 0.5, %v506_v49  ;;  %v526_v62 = vmul.f32 %v2171_v57, %v500_v6  ;;  %v2173_v3 = vpop.eup %2172  ;;  %v3723_v6 = vld [vmem:[#allocation19_spill] sm:$0xff]  ;;  %v3724_v49 = vld [vmem:[#allocation20_spill] sm:$0xff] }
 0x112   :  { %v523_v2 = vmul.f32 %v507_v0, %v326_v56  ;;  %v2175_v4 = vpop.eup %2174  ;;  %v516_v59 = vadd.f32 1.0, %v2173_v3  ;;  %v3725_v0 = vld [vmem:[#allocation21_spill] sm:$0xff]  ;;  %v3728_v57 = vld [vmem:[#allocation24_spill] sm:$0xff]  ;;  %v3730_v3 = vld [vmem:[#allocation26_spill] sm:$0xff] }
 0x113   :  { %v524_v1 = vmul.f32 %v520_v52, %v508_v48  ;;  %v515_v5 = vadd.f32 1.0, %v2175_v4  ;;  %v3722_v52 = vld [vmem:[#allocation18_spill] sm:$0xff]  ;;  %v3727_v48 = vld [vmem:[#allocation23_spill] sm:$0xff] }
 0x114   :  { %v2832_v63 = vadd.f32 %v525_v46, %v523_v2  ;;  %v518_v7 = vmul.f32 0.5, %v516_v59  ;;  %v3731_v4 = vld [vmem:[#allocation27_spill] sm:$0xff]  ;;  %v3732_v59 = vld [vmem:[#allocation28_spill] sm:$0xff] }
 0x115   :  { %v2834_v51 = vadd.f32 %v526_v62, %v524_v1  ;;  %v517_v58 = vmul.f32 0.5, %v515_v5  ;;  %v3721_v62 = vld [vmem:[#allocation17_spill] sm:$0xff] }
 0x116   :  { %2176 = vtanh.f32 %v2832_v63  ;;  %v3729_v1 = vld [vmem:[#allocation25_spill] sm:$0xff] }
 0x117   :  { %2178 = vtanh.f32 %v2834_v51  ;;  %v3733_v5 = vld [vmem:[#allocation29_spill] sm:$0xff] }
 0x123   :  { %v2177_v61 = vpop.eup %2176 }
 0x124   :  { %v2179_v56 = vpop.eup %2178  ;;  %v2840_v60 = vmul.f32 %v2177_v61, %v517_v58  ;;  %v3734_v61 = vld [vmem:[#allocation30_spill] sm:$0xff]  ;;  %v3737_v58 = vld [vmem:[#allocation33_spill] sm:$0xff] }
 0x125   :  { %v2838_v54 = vmul.f32 %v2179_v56, %v518_v7  ;;  %v3735_v7 = vld [vmem:[#allocation31_spill] sm:$0xff]  ;;  %v3736_v56 = vld [vmem:[#allocation32_spill] sm:$0xff] }
 0x126   :  { %3720 = vst [vmem:[#allocation51_spill] sm:$0xff] %v2840_v60 }
 0x127   :  { %3719 = vst [vmem:[#allocation50_spill] sm:$0xff] %v2838_v54  ;;  %v535_v46 = vrot.slane %v2838_v54, 7  ;;  %v3740_v54 = vld [vmem:[#allocation36_spill] sm:$0xff] }
 0x129   :  { %v537_v2 = vsel %vm536_vm2, %v535_v46, %v2840_v60  ;;  %v3738_v46 = vld [vmem:[#allocation34_spill] sm:$0xff]  ;;  %v3741_v60 = vld [vmem:[#allocation37_spill] sm:$0xff] }
 0x12a   :  { %604 = vmatmul.mubr.f32.vlgmr.msra.gmra.mxu0 %v537_v2  ;;  %675 = vmatmul.mubr.f32.vlgmr.msra.gmra.mxu1 %v537_v2  ;;  %v3739_v2 = vld [vmem:[#allocation35_spill] sm:$0xff] }
 0x12b   :  { %753 = vmatpush1.msra.mxu0 %v2538_v8  ;;  %824 = vmatpush1.msra.mxu1 %v2540_v9 }
 0x12c   :  { %754 = vmatprep.subr.mxu0 %v2544_v10  ;;  %825 = vmatprep.subr.mxu1 %v2546_v11 }
 0x12d   :  { %755 = vmatpush1.msra.mxu0 %v2550_v12  ;;  %826 = vmatpush1.msra.mxu1 %v2552_v13 }
 0x12e   :  { %756 = vmatprep.subr.mxu0 %v2556_v14  ;;  %827 = vmatprep.subr.mxu1 %v2558_v15 }
 0x12f   :  { %757 = vmatpush1.msra.mxu0 %v2562_v16  ;;  %828 = vmatpush1.msra.mxu1 %v2564_v17 }
 0x130   :  { %758 = vmatprep.subr.mxu0 %v2568_v18  ;;  %829 = vmatprep.subr.mxu1 %v2570_v19 }
 0x131   :  { %759 = vmatpush1.msra.mxu0 %v2574_v20  ;;  %830 = vmatpush1.msra.mxu1 %v2576_v21 }
 0x132   :  { %760 = vmatprep.subr.mxu0 %v2580_v22  ;;  %831 = vmatprep.subr.mxu1 %v2582_v23 }
 0x133   :  { %761 = vmatpush1.msra.mxu0 %v2586_v24  ;;  %832 = vmatpush1.msra.mxu1 %v2588_v25 }
 0x134   :  { %762 = vmatprep.subr.mxu0 %v2592_v26  ;;  %833 = vmatprep.subr.mxu1 %v2594_v27 }
 0x135   :  { %763 = vmatpush1.msra.mxu0 %v2598_v28  ;;  %834 = vmatpush1.msra.mxu1 %v2600_v29 }
 0x136   :  { %764 = vmatprep.subr.mxu0 %v2604_v30  ;;  %835 = vmatprep.subr.mxu1 %v2606_v31 }
 0x137   :  { %765 = vmatpush1.msra.mxu0 %v2610_v32  ;;  %836 = vmatpush1.msra.mxu1 %v2612_v33 }
 0x138   :  { %766 = vmatprep.subr.mxu0 %v2616_v34  ;;  %837 = vmatprep.subr.mxu1 %v2618_v35 }
 0x139   :  { %767 = vmatpush1.msra.mxu0 %v2622_v36  ;;  %838 = vmatpush1.msra.mxu1 %v2624_v37 }
 0x13a   :  { %768 = vmatprep.subr.mxu0 %v2628_v38  ;;  %839 = vmatprep.subr.mxu1 %v2630_v39 }
 0x13b   :  { %769 = vmatpush1.msra.mxu0 %v2634_v40  ;;  %840 = vmatpush1.msra.mxu1 %v2636_v41 }
 0x13c   :  { %770 = vmatprep.subr.mxu0 %v2640_v42  ;;  %841 = vmatprep.subr.mxu1 %v2642_v43 }
 0x13d   :  { %771 = vmatpush1.msra.mxu0 %v2646_v44  ;;  %842 = vmatpush1.msra.mxu1 %v3721_v62 }
 0x13e   :  { %772 = vmatprep.subr.mxu0 %v3722_v52  ;;  %843 = vmatprep.subr.mxu1 %v3723_v6 }
 0x13f   :  { %773 = vmatpush1.msra.mxu0 %v3724_v49  ;;  %844 = vmatpush1.msra.mxu1 %v3725_v0 }
 0x140   :  { %774 = vmatprep.subr.mxu0 %v3726_v53  ;;  %845 = vmatprep.subr.mxu1 %v3727_v48 }
 0x141   :  { %775 = vmatpush1.msra.mxu0 %v3728_v57  ;;  %846 = vmatpush1.msra.mxu1 %v3729_v1 }
 0x142   :  { %776 = vmatprep.subr.mxu0 %v3730_v3  ;;  %847 = vmatprep.subr.mxu1 %v3731_v4  ;;  %v3742_v4 = vld [vmem:[#allocation38_spill] sm:$0xff] }
 0x143   :  { %777 = vmatpush1.msra.mxu0 %v3732_v59  ;;  %848 = vmatpush1.msra.mxu1 %v3733_v5  ;;  %v3743_v59 = vld [vmem:[#allocation39_spill] sm:$0xff]  ;;  %v3744_v5 = vld [vmem:[#allocation40_spill] sm:$0xff] }
 0x144   :  { %778 = vmatprep.subr.mxu0 %v3734_v61  ;;  %849 = vmatprep.subr.mxu1 %v3735_v7  ;;  %v3745_v61 = vmov 0.0   ;;  %v3746_v7 = vld [vmem:[#allocation41_spill] sm:$0xff] }
 0x145   :  { %779 = vmatpush1.msra.mxu0 %v3736_v56  ;;  %850 = vmatpush1.msra.mxu1 %v3737_v58  ;;  %v3747_v58 = vld [vmem:[#allocation15_spill] sm:$0xff] }
 0x146   :  { %780 = vmatprep.subr.mxu0 %v3738_v46  ;;  %851 = vmatprep.subr.mxu1 %v3739_v2  ;;  %v3748_v46 = vld [vmem:[#allocation16_spill] sm:$0xff] }
 0x147   :  { %781 = vmatpush1.msra.mxu0 %v3740_v54  ;;  %852 = vmatpush1.msra.mxu1 %v3741_v60 }
 0x148   :  { %782 = vmatprep.subr.mxu0 %v3742_v4  ;;  %853 = vmatprep.subr.mxu1 %v3743_v59  ;;  %v3749_v4 = vld [vmem:[#allocation42_spill] sm:$0xff] }
 0x149   :  { %783 = vmatpush1.msra.mxu0 %v3744_v5  ;;  %816 = vmatprep.mubr.f32.mxu0 %v3745_v61 }
 0x14a   :  { %854 = vmatpush1.msra.mxu1 %v3746_v7  ;;  %887 = vmatprep.mubr.f32.mxu1 %v3745_v61 }
 0x14b   :  { %970 = vmatprep.subr.mxu0 %v3747_v58  ;;  %1041 = vmatprep.subr.mxu1 %v3748_v46 }
 0x1ea   :  { %v605_v2 = vpop.f32.mrf.mxu0  ;;  %v676_v1 = vpop.f32.mrf.mxu1 }
 0x1eb   :  { %v685_v54 = vrot.slane %v605_v2, 7  ;;  %v701_v60 = vadd.f32 %v605_v2, %v2810_v55  ;;  %v687_v7 = vrot.slane %v676_v1, 7  ;;  %v703_v46 = vadd.f32 %v676_v1, %v2821_v45  ;;  %v3750_v55 = vld [vmem:[#allocation46_spill] sm:$0xff] }
 0x1ec   :  { %v607_v56 = vpop.f32.mrf.mxu0  ;;  %v678_v2 = vpop.f32.mrf.mxu1 }
 0x1ed   :  { %v697_v3 = vadd.f32 %v685_v54, %v3749_v4  ;;  %v706_v59 = vmul.f32 0.5, %v701_v60  ;;  %v686_v5 = vrot.slane %v607_v56, 7  ;;  %v702_v57 = vadd.f32 %v607_v56, %v2816_v47  ;;  %v3751_v60 = vld [vmem:[#allocation49_spill] sm:$0xff] }
 0x1ee   :  { %v699_v0 = vadd.f32 %v687_v7, %v3750_v55  ;;  %v688_v54 = vrot.slane %v678_v2, 7  ;;  %v734_v7 = vrot.slane %v2834_v51, 7 }
 0x1ef   :  { %v705_v48 = vmul.f32 0.5, %v697_v3  ;;  %2180 = vtanh.f32 %v706_v59  ;;  %v698_v61 = vadd.f32 %v686_v5, %v2813_v50  ;;  %v714_v58 = vmul.f32 0.5, %v702_v57  ;;  %v3752_v59 = vld [vmem:[#allocation48_spill] sm:$0xff] }
 0x1f0   :  { %v700_v56 = vadd.f32 %v688_v54, %v3751_v60  ;;  %v704_v47 = vadd.f32 %v678_v2, %v3752_v59  ;;  %v733_v54 = vrot.slane %v2832_v63, 7 }
 0x1f1   :  { %2182 = vtanh.f32 %v705_v48  ;;  %v713_v53 = vmul.f32 0.5, %v698_v61 }
 0x1f2   :  { %2184 = vtanh.f32 %v714_v58  ;;  %v723_v57 = vmul.f32 0.5, %v700_v56  ;;  %v724_v58 = vmul.f32 0.5, %v704_v47 }
 0x1f3   :  { %2186 = vtanh.f32 %v713_v53 }
 0x1f4   :  { %2188 = vtanh.f32 %v703_v46 }
 0x1f5   :  { %2190 = vtanh.f32 %v699_v0 }
 0x1f6   :  { %2192 = vtanh.f32 %v723_v57 }
 0x1f7   :  { %2194 = vtanh.f32 %v724_v58 }
 0x1fc   :  { %v2181_v3 = vpop.eup %2180 }
 0x1fd   :  { %v710_v4 = vadd.f32 1.0, %v2181_v3 }
 0x1fe   :  { %v2183_v5 = vpop.eup %2182 }
 0x1ff   :  { %v2185_v48 = vpop.eup %2184  ;;  %v709_v50 = vadd.f32 1.0, %v2183_v5  ;;  %v712_v1 = vmul.f32 0.5, %v710_v4 }
 0x200   :  { %v718_v61 = vadd.f32 1.0, %v2185_v48  ;;  %v2187_v45 = vpop.eup %2186 }
 0x201   :  { %v711_v53 = vmul.f32 0.5, %v709_v50  ;;  %v717_v46 = vadd.f32 1.0, %v2187_v45  ;;  %v2189_v0 = vpop.eup %2188 }
 0x202   :  { %v720_v55 = vmul.f32 0.5, %v718_v61  ;;  %v740_v3 = vmul.f32 %v2189_v0, %v712_v1  ;;  %v2191_v56 = vpop.eup %2190 }
 0x203   :  { %v719_v60 = vmul.f32 0.5, %v717_v46  ;;  %v739_v5 = vmul.f32 %v2191_v56, %v711_v53  ;;  %v2193_v45 = vpop.eup %2192  ;;  %v3782_v56 = vld [vmem:[#allocation47_spill] sm:$0xff] }
 0x204   :  { %v738_v2 = vmul.f32 %v734_v7, %v720_v55  ;;  %v2195_v50 = vpop.eup %2194  ;;  %v727_v51 = vadd.f32 1.0, %v2193_v45 }
 0x205   :  { %v737_v59 = vmul.f32 %v733_v54, %v719_v60  ;;  %v728_v57 = vadd.f32 1.0, %v2195_v50 }
 0x206   :  { %v2921_v4 = vadd.f32 %v740_v3, %v738_v2  ;;  %v729_v48 = vmul.f32 0.5, %v727_v51  ;;  %v3781_v2 = vld [vmem:[#allocation46_spill] sm:$0xff]  ;;  %v3783_v51 = vld [vmem:[#allocation49_spill] sm:$0xff] }
 0x207   :  { %v2923_v47 = vadd.f32 %v739_v5, %v737_v59  ;;  %v730_v1 = vmul.f32 0.5, %v728_v57 }
 0x208   :  { %2196 = vtanh.f32 %v2921_v4 }
 0x209   :  { %2198 = vtanh.f32 %v2923_v47 }
 0x215   :  { %v2197_v63 = vpop.eup %2196 }
 0x216   :  { %v2199_v55 = vpop.eup %2198  ;;  %v2929_v60 = vmul.f32 %v2197_v63, %v730_v1  ;;  %v3784_v63 = vld [vmem:[#allocation48_spill] sm:$0xff] }
 0x217   :  { %v2927_v61 = vmul.f32 %v2199_v55, %v729_v48 }
 0x219   :  { %v749_v58 = vrot.slane %v2927_v61, 1 }
 0x21b   :  { %v750_v59 = vsel %vm536_vm2, %v2929_v60, %v749_v58 }
 0x21c   :  { %817 = vmatmul.mubr.f32.vlgmr.msra.gmra.mxu0 %v750_v59  ;;  %888 = vmatmul.mubr.f32.vlgmr.msra.gmra.mxu1 %v750_v59 }
 0x21d   :  { %971 = vmatpush1.msra.mxu0 %v2538_v8  ;;  %1042 = vmatpush1.msra.mxu1 %v2540_v9  ;;  %v3753_v8 = vld [vmem:[#allocation21_spill] sm:$0xff]  ;;  %v3754_v9 = vld [vmem:[#allocation22_spill] sm:$0xff] }
 0x21e   :  { %972 = vmatprep.subr.mxu0 %v2544_v10  ;;  %1043 = vmatprep.subr.mxu1 %v2546_v11  ;;  %v3755_v10 = vld [vmem:[#allocation23_spill] sm:$0xff]  ;;  %v3756_v11 = vld [vmem:[#allocation24_spill] sm:$0xff] }
 0x21f   :  { %973 = vmatpush1.msra.mxu0 %v2550_v12  ;;  %1044 = vmatpush1.msra.mxu1 %v2552_v13  ;;  %v3757_v12 = vld [vmem:[#allocation25_spill] sm:$0xff]  ;;  %v3758_v13 = vld [vmem:[#allocation26_spill] sm:$0xff] }
 0x220   :  { %974 = vmatprep.subr.mxu0 %v2556_v14  ;;  %1045 = vmatprep.subr.mxu1 %v2558_v15  ;;  %v3759_v14 = vld [vmem:[#allocation27_spill] sm:$0xff]  ;;  %v3760_v15 = vld [vmem:[#allocation28_spill] sm:$0xff] }
 0x221   :  { %975 = vmatpush1.msra.mxu0 %v2562_v16  ;;  %1046 = vmatpush1.msra.mxu1 %v2564_v17  ;;  %v3761_v16 = vld [vmem:[#allocation29_spill] sm:$0xff]  ;;  %v3762_v17 = vld [vmem:[#allocation30_spill] sm:$0xff] }
 0x222   :  { %976 = vmatprep.subr.mxu0 %v2568_v18  ;;  %1047 = vmatprep.subr.mxu1 %v2570_v19  ;;  %v3763_v18 = vld [vmem:[#allocation31_spill] sm:$0xff]  ;;  %v3764_v19 = vld [vmem:[#allocation32_spill] sm:$0xff] }
 0x223   :  { %977 = vmatpush1.msra.mxu0 %v2574_v20  ;;  %1048 = vmatpush1.msra.mxu1 %v2576_v21  ;;  %v3765_v20 = vld [vmem:[#allocation33_spill] sm:$0xff]  ;;  %v3766_v21 = vld [vmem:[#allocation34_spill] sm:$0xff] }
 0x224   :  { %978 = vmatprep.subr.mxu0 %v2580_v22  ;;  %1049 = vmatprep.subr.mxu1 %v2582_v23  ;;  %v3767_v22 = vld [vmem:[#allocation35_spill] sm:$0xff]  ;;  %v3768_v23 = vld [vmem:[#allocation36_spill] sm:$0xff] }
 0x225   :  { %979 = vmatpush1.msra.mxu0 %v2586_v24  ;;  %1050 = vmatpush1.msra.mxu1 %v2588_v25  ;;  %v3769_v24 = vld [vmem:[#allocation37_spill] sm:$0xff]  ;;  %v3770_v25 = vld [vmem:[#allocation38_spill] sm:$0xff] }
 0x226   :  { %980 = vmatprep.subr.mxu0 %v2592_v26  ;;  %1051 = vmatprep.subr.mxu1 %v2594_v27  ;;  %v3771_v26 = vld [vmem:[#allocation39_spill] sm:$0xff]  ;;  %v3772_v27 = vld [vmem:[#allocation40_spill] sm:$0xff] }
 0x227   :  { %981 = vmatpush1.msra.mxu0 %v2598_v28  ;;  %1052 = vmatpush1.msra.mxu1 %v2600_v29  ;;  %v3773_v28 = vmov 0.0   ;;  %v3774_v29 = vld [vmem:[#allocation41_spill] sm:$0xff] }
 0x228   :  { %982 = vmatprep.subr.mxu0 %v2604_v30  ;;  %1053 = vmatprep.subr.mxu1 %v2606_v31  ;;  %v3775_v30 = vld [vmem:[#allocation15_spill] sm:$0xff]  ;;  %v3776_v31 = vld [vmem:[#allocation16_spill] sm:$0xff] }
 0x229   :  { %983 = vmatpush1.msra.mxu0 %v2610_v32  ;;  %1054 = vmatpush1.msra.mxu1 %v2612_v33 }
 0x22a   :  { %984 = vmatprep.subr.mxu0 %v2616_v34  ;;  %1055 = vmatprep.subr.mxu1 %v2618_v35 }
 0x22b   :  { %985 = vmatpush1.msra.mxu0 %v2622_v36  ;;  %1056 = vmatpush1.msra.mxu1 %v2624_v37  ;;  %v3777_v36 = vld [vmem:[#allocation42_spill] sm:$0xff] }
 0x22c   :  { %986 = vmatprep.subr.mxu0 %v2628_v38  ;;  %1057 = vmatprep.subr.mxu1 %v2630_v39  ;;  %v3778_v38 = vld [vmem:[#allocation43_spill] sm:$0xff] }
 0x22d   :  { %987 = vmatpush1.msra.mxu0 %v2634_v40  ;;  %1058 = vmatpush1.msra.mxu1 %v2636_v41 }
 0x22e   :  { %988 = vmatprep.subr.mxu0 %v2640_v42  ;;  %1059 = vmatprep.subr.mxu1 %v2642_v43 }
 0x22f   :  { %989 = vmatpush1.msra.mxu0 %v2646_v44  ;;  %1060 = vmatpush1.msra.mxu1 %v3721_v62 }
 0x230   :  { %990 = vmatprep.subr.mxu0 %v3722_v52  ;;  %1061 = vmatprep.subr.mxu1 %v3723_v6  ;;  %v3779_v52 = vld [vmem:[#allocation44_spill] sm:$0xff] }
 0x231   :  { %991 = vmatpush1.msra.mxu0 %v3724_v49  ;;  %1062 = vmatpush1.msra.mxu1 %v3753_v8  ;;  %v3780_v49 = vld [vmem:[#allocation45_spill] sm:$0xff] }
 0x232   :  { %992 = vmatprep.subr.mxu0 %v3754_v9  ;;  %1063 = vmatprep.subr.mxu1 %v3755_v10 }
 0x233   :  { %993 = vmatpush1.msra.mxu0 %v3756_v11  ;;  %1064 = vmatpush1.msra.mxu1 %v3757_v12 }
 0x234   :  { %994 = vmatprep.subr.mxu0 %v3758_v13  ;;  %1065 = vmatprep.subr.mxu1 %v3759_v14 }
 0x235   :  { %995 = vmatpush1.msra.mxu0 %v3760_v15  ;;  %1066 = vmatpush1.msra.mxu1 %v3761_v16 }
 0x236   :  { %996 = vmatprep.subr.mxu0 %v3762_v17  ;;  %1067 = vmatprep.subr.mxu1 %v3763_v18  ;;  %v950_v17 = vrot.slane %v2923_v47, 7 }
 0x237   :  { %997 = vmatpush1.msra.mxu0 %v3764_v19  ;;  %1068 = vmatpush1.msra.mxu1 %v3765_v20  ;;  %v951_v20 = vrot.slane %v2921_v4, 7 }
 0x238   :  { %998 = vmatprep.subr.mxu0 %v3766_v21  ;;  %1069 = vmatprep.subr.mxu1 %v3767_v22 }
 0x239   :  { %999 = vmatpush1.msra.mxu0 %v3768_v23  ;;  %1070 = vmatpush1.msra.mxu1 %v3769_v24 }
 0x23a   :  { %1000 = vmatprep.subr.mxu0 %v3770_v25  ;;  %1071 = vmatprep.subr.mxu1 %v3771_v26 }
 0x23b   :  { %1001 = vmatpush1.msra.mxu0 %v3772_v27  ;;  %1034 = vmatprep.mubr.f32.mxu0 %v3773_v28 }
 0x23c   :  { %1072 = vmatpush1.msra.mxu1 %v3774_v29  ;;  %1105 = vmatprep.mubr.f32.mxu1 %v3773_v28 }
 0x23d   :  { %1188 = vmatprep.subr.mxu0 %v3775_v30  ;;  %1259 = vmatprep.subr.mxu1 %v3776_v31 }
 0x2dc   :  { %v818_v32 = vpop.f32.mrf.mxu0  ;;  %v889_v40 = vpop.f32.mrf.mxu1 }
 0x2dd   :  { %v898_v33 = vrot.slane %v818_v32, 6  ;;  %v902_v34 = vrot.slane %v818_v32, 7  ;;  %v900_v62 = vrot.slane %v889_v40, 6  ;;  %v904_v53 = vrot.slane %v889_v40, 7 }
 0x2de   :  { %v820_v35 = vpop.f32.mrf.mxu0  ;;  %v891_v54 = vpop.f32.mrf.mxu1 }
 0x2df   :  { %v914_v37 = vadd.f32 %v898_v33, %v3777_v36  ;;  %v918_v39 = vadd.f32 %v902_v34, %v3778_v38  ;;  %v899_v41 = vrot.slane %v820_v35, 6  ;;  %v903_v42 = vrot.slane %v820_v35, 7 }
 0x2e0   :  { %v916_v3 = vadd.f32 %v900_v62, %v3781_v2  ;;  %v920_v5 = vadd.f32 %v904_v53, %v3782_v56  ;;  %v901_v45 = vrot.slane %v891_v54, 6  ;;  %v905_v50 = vrot.slane %v891_v54, 7  ;;  %v3025_v53 = vld [vmem:[#allocation5 + $0x1e0] sm:$0xff]  ;;  %v3040_v54 = vld [vmem:[#allocation5 + $0x1d0] sm:$0xff] }
 0x2e1   :  { %v922_v43 = vmul.f32 0.5, %v914_v37  ;;  %v923_v44 = vmul.f32 0.5, %v918_v39  ;;  %v915_v6 = vadd.f32 %v899_v41, %v3779_v52  ;;  %v919_v7 = vadd.f32 %v903_v42, %v3780_v49  ;;  %v3785_v37 = vld [vmem:[#allocation51_spill] sm:$0xff]  ;;  %v3786_v41 = vld [vmem:[#allocation50_spill] sm:$0xff] }
 0x2e2   :  { %v917_v57 = vadd.f32 %v901_v45, %v3783_v51  ;;  %v921_v48 = vadd.f32 %v905_v50, %v3784_v63  ;;  %v2055_v39 = vsel %vm2054_vm3, %v3785_v37, %v2927_v61  ;;  %v2056_v42 = vsel %vm2054_vm3, %v3786_v41, %v2929_v60  ;;  %v3031_v61 = vld [vmem:[#allocation5 + $0x1c8] sm:$0xff]  ;;  %v3034_v60 = vld [vmem:[#allocation5 + $0x1d8] sm:$0xff]  ;;  %v3049_v45 = vld [vmem:[#allocation5 + $0x1a0] sm:$0xff] }
 0x2e3   :  { %2200 = vtanh.f32 %v922_v43  ;;  %v930_v46 = vmul.f32 0.5, %v915_v6  ;;  %v931_v0 = vmul.f32 0.5, %v919_v7  ;;  %v3052_v50 = vld [vmem:[#allocation5 + $0x1b0] sm:$0xff]  ;;  %v3154_v37 = vld [vmem:[#allocation5 + $0x98] sm:$0xff]  ;;  %v3163_v41 = vld [vmem:[#allocation5 + $0x68] sm:$0xff] }
 0x2e4   :  { %2202 = vtanh.f32 %v923_v44  ;;  %v940_v1 = vmul.f32 0.5, %v917_v57  ;;  %v941_v8 = vmul.f32 0.5, %v921_v48  ;;  %v3055_v57 = vld [vmem:[#allocation5 + $0x188] sm:$0xff]  ;;  %v3058_v48 = vld [vmem:[#allocation5 + $0x198] sm:$0xff]  ;;  %3795 = vst [vmem:[#allocation25_spill] sm:$0xff] %v3154_v37  ;;  %3798 = vst [vmem:[#allocation28_spill] sm:$0xff] %v3163_v41 }
 0x2e5   :  { %2204 = vtanh.f32 %v930_v46  ;;  %v3028_v46 = vld [vmem:[#allocation5 + $0x1f0] sm:$0xff] }
 0x2e6   :  { %2206 = vtanh.f32 %v931_v0  ;;  %v3037_v0 = vld [vmem:[#allocation5 + $0x1c0] sm:$0xff] }
 0x2e7   :  { %2208 = vtanh.f32 %v916_v3  ;;  %v3043_v3 = vld [vmem:[#allocation5 + $0x1a8] sm:$0xff] }
 0x2e8   :  { %2210 = vtanh.f32 %v920_v5  ;;  %v3046_v5 = vld [vmem:[#allocation5 + $0x1b8] sm:$0xff] }
 0x2e9   :  { %2212 = vtanh.f32 %v940_v1  ;;  %v3064_v1 = vld [vmem:[#allocation5 + $0x190] sm:$0xff] }
 0x2ea   :  { %2214 = vtanh.f32 %v941_v8  ;;  %v3073_v8 = vld [vmem:[#allocation5 + $0x160] sm:$0xff] }
 0x2f0   :  { %v2201_v55 = vpop.eup %2200 }
 0x2f1   :  { %v2203_v58 = vpop.eup %2202  ;;  %v926_v59 = vadd.f32 1.0, %v2201_v55  ;;  %v3061_v55 = vld [vmem:[#allocation5 + $0x180] sm:$0xff] }
 0x2f2   :  { %v927_v9 = vadd.f32 1.0, %v2203_v58  ;;  %v2205_v10 = vpop.eup %2204  ;;  %v3067_v58 = vld [vmem:[#allocation5 + $0x168] sm:$0xff] }
 0x2f3   :  { %v2207_v11 = vpop.eup %2206  ;;  %v928_v12 = vmul.f32 0.5, %v926_v59  ;;  %v934_v13 = vadd.f32 1.0, %v2205_v10  ;;  %v3070_v59 = vld [vmem:[#allocation5 + $0x178] sm:$0xff]  ;;  %v3079_v10 = vld [vmem:[#allocation5 + $0x148] sm:$0xff] }
 0x2f4   :  { %v929_v14 = vmul.f32 0.5, %v927_v9  ;;  %v935_v15 = vadd.f32 1.0, %v2207_v11  ;;  %v2209_v18 = vpop.eup %2208  ;;  %v3076_v9 = vld [vmem:[#allocation5 + $0x170] sm:$0xff]  ;;  %v3082_v11 = vld [vmem:[#allocation5 + $0x158] sm:$0xff] }
 0x2f5   :  { %v936_v16 = vmul.f32 0.5, %v934_v13  ;;  %v2211_v21 = vpop.eup %2210  ;;  %v956_v23 = vmul.f32 %v2209_v18, %v928_v12  ;;  %v3085_v12 = vld [vmem:[#allocation5 + $0x140] sm:$0xff]  ;;  %v3088_v13 = vld [vmem:[#allocation5 + $0x150] sm:$0xff]  ;;  %v3103_v18 = vld [vmem:[#allocation5 + $0x108] sm:$0xff] }
 0x2f6   :  { %v937_v19 = vmul.f32 0.5, %v935_v15  ;;  %v957_v25 = vmul.f32 %v2211_v21, %v929_v14  ;;  %v2213_v29 = vpop.eup %2212  ;;  %v3091_v14 = vld [vmem:[#allocation5 + $0x128] sm:$0xff]  ;;  %v3094_v15 = vld [vmem:[#allocation5 + $0x138] sm:$0xff]  ;;  %v3112_v21 = vld [vmem:[#allocation5 + $0x110] sm:$0xff] }
 0x2f7   :  { %v954_v22 = vmul.f32 %v950_v17, %v936_v16  ;;  %v2215_v30 = vpop.eup %2214  ;;  %v944_v47 = vadd.f32 1.0, %v2213_v29  ;;  %v3097_v16 = vld [vmem:[#allocation5 + $0x120] sm:$0xff]  ;;  %v3100_v17 = vld [vmem:[#allocation5 + $0x130] sm:$0xff]  ;;  %v3127_v29 = vld [vmem:[#allocation5 + $0xc8] sm:$0xff] }
 0x2f8   :  { %v955_v24 = vmul.f32 %v951_v20, %v937_v19  ;;  %v945_v31 = vadd.f32 1.0, %v2215_v30  ;;  %v3106_v19 = vld [vmem:[#allocation5 + $0x118] sm:$0xff]  ;;  %v3109_v20 = vld [vmem:[#allocation5 + $0x100] sm:$0xff] }
 0x2f9   :  { %v3010_v26 = vadd.f32 %v956_v23, %v954_v22  ;;  %v946_v32 = vmul.f32 0.5, %v944_v47  ;;  %v3115_v22 = vld [vmem:[#allocation5 + $0xe8] sm:$0xff]  ;;  %v3118_v23 = vld [vmem:[#allocation5 + $0xf8] sm:$0xff]  ;;  %v3133_v47 = vld [vmem:[#allocation5 + $0xc0] sm:$0xff] }
 0x2fa   :  { %v3012_v27 = vadd.f32 %v957_v25, %v955_v24  ;;  %v947_v4 = vmul.f32 0.5, %v945_v31  ;;  %v3121_v24 = vld [vmem:[#allocation5 + $0xe0] sm:$0xff]  ;;  %v3124_v25 = vld [vmem:[#allocation5 + $0xf0] sm:$0xff]  ;;  %v3130_v30 = vld [vmem:[#allocation5 + $0xd8] sm:$0xff]  ;;  %3788 = vst [vmem:[#allocation18_spill] sm:$0xff] %v3133_v47 }
 0x2fb   :  { %2216 = vtanh.f32 %v3010_v26  ;;  %3787 = vst [vmem:[#allocation17_spill] sm:$0xff] %v3130_v30  ;;  %v3136_v31 = vld [vmem:[#allocation5 + $0xd0] sm:$0xff] }
 0x2fc   :  { %2218 = vtanh.f32 %v3012_v27  ;;  %3789 = vst [vmem:[#allocation19_spill] sm:$0xff] %v3136_v31 }
 0x308   :  { %v2217_v33 = vpop.eup %2216 }
 0x309   :  { %v2219_v34 = vpop.eup %2218  ;;  %v962_v35 = vmul.f32 %v2217_v33, %v946_v32  ;;  %v3139_v32 = vld [vmem:[#allocation5 + $0xa8] sm:$0xff]  ;;  %v3142_v33 = vld [vmem:[#allocation5 + $0xb8] sm:$0xff] }
 0x30a   :  { %v963_v40 = vmul.f32 %v2219_v34, %v947_v4  ;;  %3790 = vst [vmem:[#allocation20_spill] sm:$0xff] %v3139_v32  ;;  %3791 = vst [vmem:[#allocation21_spill] sm:$0xff] %v3142_v33  ;;  %v3145_v4 = vld [vmem:[#allocation5 + $0xa0] sm:$0xff]  ;;  %v3148_v34 = vld [vmem:[#allocation5 + $0xb0] sm:$0xff] }
 0x30b   :  { %v966_v43 = vrot.slane %v962_v35, 2  ;;  %v3020_v44 = vsel %vm2057_vm4, %v2055_v39, %v962_v35  ;;  %3792 = vst [vmem:[#allocation22_spill] sm:$0xff] %v3145_v4  ;;  %3793 = vst [vmem:[#allocation23_spill] sm:$0xff] %v3148_v34  ;;  %v3151_v35 = vld [vmem:[#allocation5 + $0x88] sm:$0xff]  ;;  %v3157_v39 = vld [vmem:[#allocation5 + $0x80] sm:$0xff] }
 0x30c   :  { %v967_v62 = vrot.slane %v963_v40, 1  ;;  %v3022_v6 = vsel %vm2057_vm4, %v2056_v42, %v963_v40  ;;  %3794 = vst [vmem:[#allocation24_spill] sm:$0xff] %v3151_v35  ;;  %3796 = vst [vmem:[#allocation26_spill] sm:$0xff] %v3157_v39  ;;  %v3160_v40 = vld [vmem:[#allocation5 + $0x90] sm:$0xff]  ;;  %v3166_v42 = vld [vmem:[#allocation5 + $0x78] sm:$0xff] }
 0x30d   :  { %3797 = vst [vmem:[#allocation27_spill] sm:$0xff] %v3160_v40  ;;  %3799 = vst [vmem:[#allocation29_spill] sm:$0xff] %v3166_v42 }
 0x30e   :  { %v968_v7 = vsel %vm536_vm2, %v967_v62, %v966_v43  ;;  %v3169_v43 = vld [vmem:[#allocation5 + $0x60] sm:$0xff]  ;;  %v3172_v62 = vld [vmem:[#allocation5 + $0x70] sm:$0xff] }
 0x30f   :  { %1035 = vmatmul.mubr.f32.vlgmr.msra.gmra.mxu0 %v968_v7  ;;  %1106 = vmatmul.mubr.f32.vlgmr.msra.gmra.mxu1 %v968_v7  ;;  %3800 = vst [vmem:[#allocation30_spill] sm:$0xff] %v3169_v43  ;;  %3801 = vst [vmem:[#allocation31_spill] sm:$0xff] %v3172_v62  ;;  %v3175_v7 = vld [vmem:[#allocation5 + $0x48] sm:$0xff] }
 0x310   :  { %1189 = vmatpush1.msra.mxu0 %v3025_v53  ;;  %1260 = vmatpush1.msra.mxu1 %v3028_v46  ;;  %3802 = vst [vmem:[#allocation32_spill] sm:$0xff] %v3175_v7 }
 0x311   :  { %1190 = vmatprep.subr.mxu0 %v3031_v61  ;;  %1261 = vmatprep.subr.mxu1 %v3034_v60 }
 0x312   :  { %1191 = vmatpush1.msra.mxu0 %v3037_v0  ;;  %1262 = vmatpush1.msra.mxu1 %v3040_v54 }
 0x313   :  { %1192 = vmatprep.subr.mxu0 %v3043_v3  ;;  %1263 = vmatprep.subr.mxu1 %v3046_v5 }
 0x314   :  { %1193 = vmatpush1.msra.mxu0 %v3049_v45  ;;  %1264 = vmatpush1.msra.mxu1 %v3052_v50 }
 0x315   :  { %1194 = vmatprep.subr.mxu0 %v3055_v57  ;;  %1265 = vmatprep.subr.mxu1 %v3058_v48 }
 0x316   :  { %1195 = vmatpush1.msra.mxu0 %v3061_v55  ;;  %1266 = vmatpush1.msra.mxu1 %v3064_v1 }
 0x317   :  { %1196 = vmatprep.subr.mxu0 %v3067_v58  ;;  %1267 = vmatprep.subr.mxu1 %v3070_v59 }
 0x318   :  { %1197 = vmatpush1.msra.mxu0 %v3073_v8  ;;  %1268 = vmatpush1.msra.mxu1 %v3076_v9 }
 0x319   :  { %1198 = vmatprep.subr.mxu0 %v3079_v10  ;;  %1269 = vmatprep.subr.mxu1 %v3082_v11 }
 0x31a   :  { %1199 = vmatpush1.msra.mxu0 %v3085_v12  ;;  %1270 = vmatpush1.msra.mxu1 %v3088_v13 }
 0x31b   :  { %1200 = vmatprep.subr.mxu0 %v3091_v14  ;;  %1271 = vmatprep.subr.mxu1 %v3094_v15 }
 0x31c   :  { %1201 = vmatpush1.msra.mxu0 %v3097_v16  ;;  %1272 = vmatpush1.msra.mxu1 %v3100_v17 }
 0x31d   :  { %1202 = vmatprep.subr.mxu0 %v3103_v18  ;;  %1273 = vmatprep.subr.mxu1 %v3106_v19 }
 0x31e   :  { %1203 = vmatpush1.msra.mxu0 %v3109_v20  ;;  %1274 = vmatpush1.msra.mxu1 %v3112_v21 }
 0x31f   :  { %1204 = vmatprep.subr.mxu0 %v3115_v22  ;;  %1275 = vmatprep.subr.mxu1 %v3118_v23 }
 0x320   :  { %1205 = vmatpush1.msra.mxu0 %v3121_v24  ;;  %1276 = vmatpush1.msra.mxu1 %v3124_v25 }
 0x321   :  { %1206 = vmatprep.subr.mxu0 %v3127_v29  ;;  %1277 = vmatprep.subr.mxu1 %v3130_v30 }
 0x322   :  { %1207 = vmatpush1.msra.mxu0 %v3133_v47  ;;  %1278 = vmatpush1.msra.mxu1 %v3136_v31 }
 0x323   :  { %1208 = vmatprep.subr.mxu0 %v3139_v32  ;;  %1279 = vmatprep.subr.mxu1 %v3142_v33 }
 0x324   :  { %1209 = vmatpush1.msra.mxu0 %v3145_v4  ;;  %1280 = vmatpush1.msra.mxu1 %v3148_v34 }
 0x325   :  { %1210 = vmatprep.subr.mxu0 %v3151_v35  ;;  %1281 = vmatprep.subr.mxu1 %v3154_v37 }
 0x326   :  { %1211 = vmatpush1.msra.mxu0 %v3157_v39  ;;  %1282 = vmatpush1.msra.mxu1 %v3160_v40  ;;  %v3178_v40 = vld [vmem:[#allocation5 + $0x58] sm:$0xff] }
 0x327   :  { %1212 = vmatprep.subr.mxu0 %v3163_v41  ;;  %1283 = vmatprep.subr.mxu1 %v3166_v42  ;;  %3803 = vst [vmem:[#allocation33_spill] sm:$0xff] %v3178_v40  ;;  %v3181_v41 = vld [vmem:[#allocation5 + $0x40] sm:$0xff]  ;;  %v3184_v42 = vld [vmem:[#allocation5 + $0x50] sm:$0xff] }
 0x328   :  { %1213 = vmatpush1.msra.mxu0 %v3169_v43  ;;  %1284 = vmatpush1.msra.mxu1 %v3172_v62  ;;  %3804 = vst [vmem:[#allocation34_spill] sm:$0xff] %v3181_v41  ;;  %3805 = vst [vmem:[#allocation35_spill] sm:$0xff] %v3184_v42  ;;  %v3187_v43 = vld [vmem:[#allocation5 + $0x28] sm:$0xff]  ;;  %v3190_v62 = vld [vmem:[#allocation5 + $0x38] sm:$0xff] }
 0x329   :  { %1214 = vmatprep.subr.mxu0 %v3175_v7  ;;  %1285 = vmatprep.subr.mxu1 %v3178_v40  ;;  %3806 = vst [vmem:[#allocation36_spill] sm:$0xff] %v3187_v43  ;;  %3807 = vst [vmem:[#allocation37_spill] sm:$0xff] %v3190_v62  ;;  %v3193_v7 = vld [vmem:[#allocation5 + $0x20] sm:$0xff]  ;;  %v3196_v40 = vld [vmem:[#allocation5 + $0x30] sm:$0xff] }
 0x32a   :  { %1215 = vmatpush1.msra.mxu0 %v3181_v41  ;;  %1286 = vmatpush1.msra.mxu1 %v3184_v42  ;;  %3808 = vst [vmem:[#allocation38_spill] sm:$0xff] %v3193_v7  ;;  %3809 = vst [vmem:[#allocation39_spill] sm:$0xff] %v3196_v40  ;;  %v3199_v41 = vld [vmem:[#allocation5 + $0x8] sm:$0xff]  ;;  %v3202_v42 = vld [vmem:[#allocation5 + $0x18] sm:$0xff] }
 0x32b   :  { %1216 = vmatprep.subr.mxu0 %v3187_v43  ;;  %1287 = vmatprep.subr.mxu1 %v3190_v62  ;;  %3810 = vst [vmem:[#allocation40_spill] sm:$0xff] %v3199_v41  ;;  %3811 = vst [vmem:[#allocation41_spill] sm:$0xff] %v3202_v42  ;;  %v3205_v43 = vld [vmem:[#allocation5] sm:$0xff]  ;;  %v3209_v62 = vld [vmem:[#allocation5 + $0x10] sm:$0xff] }
 0x32c   :  { %1217 = vmatpush1.msra.mxu0 %v3193_v7  ;;  %1288 = vmatpush1.msra.mxu1 %v3196_v40  ;;  %3812 = vst [vmem:[#allocation15_spill] sm:$0xff] %v3205_v43  ;;  %3813 = vst [vmem:[#allocation16_spill] sm:$0xff] %v3209_v62  ;;  %v3213_v40 = vld [vmem:[#allocation5 + $0x1e8] sm:$0xff] }
 0x32d   :  { %1218 = vmatprep.subr.mxu0 %v3199_v41  ;;  %1289 = vmatprep.subr.mxu1 %v3202_v42  ;;  %3814 = vst [vmem:[#allocation42_spill] sm:$0xff] %v3213_v40  ;;  %v3216_v41 = vld [vmem:[#allocation5 + $0x1f8] sm:$0xff] }
 0x32e   :  { %1219 = vmatpush1.msra.mxu0 %v3205_v43  ;;  %1252 = vmatprep.mubr.f32.mxu0 %v3773_v28  ;;  %3815 = vst [vmem:[#allocation47_spill] sm:$0xff] %v3216_v41 }
 0x32f   :  { %1290 = vmatpush1.msra.mxu1 %v3209_v62  ;;  %1323 = vmatprep.mubr.f32.mxu1 %v3773_v28 }
 0x330   :  { %1406 = vmatprep.subr.mxu0 %v3213_v40  ;;  %1477 = vmatprep.subr.mxu1 %v3216_v41 }
 0x3cf   :  { %v1036_v42 = vpop.f32.mrf.mxu0  ;;  %v1107_v34 = vpop.f32.mrf.mxu1 }
 0x3d0   :  { %v1116_v7 = vrot.slane %v1036_v42, 5  ;;  %v1120_v39 = vrot.slane %v1036_v42, 6  ;;  %v1118_v32 = vrot.slane %v1107_v34, 5  ;;  %v1122_v41 = vrot.slane %v1107_v34, 6 }
 0x3d1   :  { %v1038_v43 = vpop.f32.mrf.mxu0  ;;  %v1109_v30 = vpop.f32.mrf.mxu1 }
 0x3d2   :  { %v1132_v37 = vadd.f32 %v1116_v7, %v3777_v36  ;;  %v1136_v35 = vadd.f32 %v1120_v39, %v3778_v38  ;;  %v1117_v62 = vrot.slane %v1038_v43, 5  ;;  %v1121_v4 = vrot.slane %v1038_v43, 6 }
 0x3d3   :  { %v1134_v7 = vadd.f32 %v1118_v32, %v3781_v2  ;;  %v1138_v39 = vadd.f32 %v1122_v41, %v3782_v56  ;;  %v1119_v43 = vrot.slane %v1109_v30, 5 }
 0x3d4   :  { %v1140_v28 = vmul.f32 0.5, %v1132_v37  ;;  %v1141_v33 = vmul.f32 0.5, %v1136_v35  ;;  %v1133_v40 = vadd.f32 %v1117_v62, %v3779_v52  ;;  %v1137_v31 = vadd.f32 %v1121_v4, %v3780_v49 }
 0x3d5   :  { %v1123_v37 = vrot.slane %v1109_v30, 6  ;;  %v1135_v35 = vadd.f32 %v1119_v43, %v3783_v51 }
 0x3d6   :  { %2220 = vtanh.f32 %v1140_v28  ;;  %v1148_v47 = vmul.f32 0.5, %v1133_v40  ;;  %v1149_v42 = vmul.f32 0.5, %v1137_v31 }
 0x3d7   :  { %2222 = vtanh.f32 %v1141_v33  ;;  %v1139_v4 = vadd.f32 %v1123_v37, %v3784_v63  ;;  %v1158_v34 = vmul.f32 0.5, %v1135_v35  ;;  %v1169_v37 = vrot.slane %v3012_v27, 7 }
 0x3d8   :  { %2224 = vtanh.f32 %v1148_v47 }
 0x3d9   :  { %2226 = vtanh.f32 %v1149_v42  ;;  %v1159_v31 = vmul.f32 0.5, %v1139_v4 }
 0x3da   :  { %2228 = vtanh.f32 %v1134_v7  ;;  %v1168_v7 = vrot.slane %v3010_v26, 7 }
 0x3db   :  { %2230 = vtanh.f32 %v1138_v39 }
 0x3dc   :  { %2232 = vtanh.f32 %v1158_v34 }
 0x3dd   :  { %2234 = vtanh.f32 %v1159_v31 }
 0x3e3   :  { %v2221_v28 = vpop.eup %2220 }
 0x3e4   :  { %v2223_v33 = vpop.eup %2222  ;;  %v1144_v40 = vadd.f32 1.0, %v2221_v28 }
 0x3e5   :  { %v1145_v62 = vadd.f32 1.0, %v2223_v33  ;;  %v2225_v49 = vpop.eup %2224 }
 0x3e6   :  { %v2227_v32 = vpop.eup %2226  ;;  %v1146_v47 = vmul.f32 0.5, %v1144_v40  ;;  %v1152_v2 = vadd.f32 1.0, %v2225_v49 }
 0x3e7   :  { %v1147_v41 = vmul.f32 0.5, %v1145_v62  ;;  %v1153_v42 = vadd.f32 1.0, %v2227_v32  ;;  %v2229_v39 = vpop.eup %2228 }
 0x3e8   :  { %v1154_v30 = vmul.f32 0.5, %v1152_v2  ;;  %v2231_v35 = vpop.eup %2230  ;;  %v1174_v28 = vmul.f32 %v2229_v39, %v1146_v47 }
 0x3e9   :  { %v1155_v43 = vmul.f32 0.5, %v1153_v42  ;;  %v1175_v33 = vmul.f32 %v2231_v35, %v1147_v41  ;;  %v2233_v49 = vpop.eup %2232  ;;  %v3820_v35 = vld [vmem:[#allocation21_spill] sm:$0xff] }
 0x3ea   :  { %v1172_v63 = vmul.f32 %v1168_v7, %v1154_v30  ;;  %v2235_v2 = vpop.eup %2234  ;;  %v1162_v26 = vadd.f32 1.0, %v2233_v49  ;;  %v3824_v49 = vld [vmem:[#allocation25_spill] sm:$0xff] }
 0x3eb   :  { %v1173_v4 = vmul.f32 %v1169_v37, %v1155_v43  ;;  %v1163_v34 = vadd.f32 1.0, %v2235_v2  ;;  %v3818_v43 = vld [vmem:[#allocation19_spill] sm:$0xff]  ;;  %v3819_v37 = vld [vmem:[#allocation20_spill] sm:$0xff]  ;;  %v3825_v2 = vld [vmem:[#allocation26_spill] sm:$0xff] }
 0x3ec   :  { %v3229_v51 = vadd.f32 %v1174_v28, %v1172_v63  ;;  %v1164_v31 = vmul.f32 0.5, %v1162_v26  ;;  %v3821_v28 = vld [vmem:[#allocation22_spill] sm:$0xff]  ;;  %v3826_v26 = vld [vmem:[#allocation27_spill] sm:$0xff] }
 0x3ed   :  { %v3231_v40 = vadd.f32 %v1175_v33, %v1173_v4  ;;  %v1165_v27 = vmul.f32 0.5, %v1163_v34  ;;  %v3822_v4 = vld [vmem:[#allocation23_spill] sm:$0xff]  ;;  %v3823_v33 = vld [vmem:[#allocation24_spill] sm:$0xff] }
 0x3ee   :  { %2236 = vtanh.f32 %v3229_v51  ;;  %v3827_v34 = vld [vmem:[#allocation28_spill] sm:$0xff] }
 0x3ef   :  { %2238 = vtanh.f32 %v3231_v40 }
 0x3fb   :  { %v2237_v62 = vpop.eup %2236 }
 0x3fc   :  { %v2239_v32 = vpop.eup %2238  ;;  %v1180_v47 = vmul.f32 %v2237_v62, %v1164_v31  ;;  %v3828_v31 = vld [vmem:[#allocation29_spill] sm:$0xff]  ;;  %v3829_v62 = vld [vmem:[#allocation30_spill] sm:$0xff] }
 0x3fd   :  { %v1181_v42 = vmul.f32 %v2239_v32, %v1165_v27  ;;  %v3830_v27 = vld [vmem:[#allocation31_spill] sm:$0xff]  ;;  %v3831_v32 = vld [vmem:[#allocation32_spill] sm:$0xff] }
 0x3fe   :  { %v1184_v41 = vrot.slane %v1180_v47, 3  ;;  %v3236_v63 = vsel %vm2060_vm5, %v3020_v44, %v1180_v47  ;;  %v3816_v44 = vld [vmem:[#allocation17_spill] sm:$0xff] }
 0x3ff   :  { %v1185_v30 = vrot.slane %v1181_v42, 2  ;;  %v3239_v7 = vsel %vm2060_vm5, %v3022_v6, %v1181_v42  ;;  %v3817_v6 = vld [vmem:[#allocation18_spill] sm:$0xff]  ;;  %v3832_v47 = vld [vmem:[#allocation33_spill] sm:$0xff] }
 0x400   :  { %v3833_v42 = vld [vmem:[#allocation34_spill] sm:$0xff] }
 0x401   :  { %v1186_v39 = vsel %vm536_vm2, %v1185_v30, %v1184_v41  ;;  %v3834_v41 = vld [vmem:[#allocation35_spill] sm:$0xff]  ;;  %v3835_v30 = vld [vmem:[#allocation36_spill] sm:$0xff] }
 0x402   :  { %1253 = vmatmul.mubr.f32.vlgmr.msra.gmra.mxu0 %v1186_v39  ;;  %1324 = vmatmul.mubr.f32.vlgmr.msra.gmra.mxu1 %v1186_v39  ;;  %v3836_v39 = vld [vmem:[#allocation37_spill] sm:$0xff] }
 0x403   :  { %1407 = vmatpush1.msra.mxu0 %v3025_v53  ;;  %1478 = vmatpush1.msra.mxu1 %v3028_v46 }
 0x404   :  { %1408 = vmatprep.subr.mxu0 %v3031_v61  ;;  %1479 = vmatprep.subr.mxu1 %v3034_v60 }
 0x405   :  { %1409 = vmatpush1.msra.mxu0 %v3037_v0  ;;  %1480 = vmatpush1.msra.mxu1 %v3040_v54 }
 0x406   :  { %1410 = vmatprep.subr.mxu0 %v3043_v3  ;;  %1481 = vmatprep.subr.mxu1 %v3046_v5 }
 0x407   :  { %1411 = vmatpush1.msra.mxu0 %v3049_v45  ;;  %1482 = vmatpush1.msra.mxu1 %v3052_v50 }
 0x408   :  { %1412 = vmatprep.subr.mxu0 %v3055_v57  ;;  %1483 = vmatprep.subr.mxu1 %v3058_v48 }
 0x409   :  { %1413 = vmatpush1.msra.mxu0 %v3061_v55  ;;  %1484 = vmatpush1.msra.mxu1 %v3064_v1 }
 0x40a   :  { %1414 = vmatprep.subr.mxu0 %v3067_v58  ;;  %1485 = vmatprep.subr.mxu1 %v3070_v59 }
 0x40b   :  { %1415 = vmatpush1.msra.mxu0 %v3073_v8  ;;  %1486 = vmatpush1.msra.mxu1 %v3076_v9 }
 0x40c   :  { %1416 = vmatprep.subr.mxu0 %v3079_v10  ;;  %1487 = vmatprep.subr.mxu1 %v3082_v11 }
 0x40d   :  { %1417 = vmatpush1.msra.mxu0 %v3085_v12  ;;  %1488 = vmatpush1.msra.mxu1 %v3088_v13 }
 0x40e   :  { %1418 = vmatprep.subr.mxu0 %v3091_v14  ;;  %1489 = vmatprep.subr.mxu1 %v3094_v15 }
 0x40f   :  { %1419 = vmatpush1.msra.mxu0 %v3097_v16  ;;  %1490 = vmatpush1.msra.mxu1 %v3100_v17 }
 0x410   :  { %1420 = vmatprep.subr.mxu0 %v3103_v18  ;;  %1491 = vmatprep.subr.mxu1 %v3106_v19 }
 0x411   :  { %1421 = vmatpush1.msra.mxu0 %v3109_v20  ;;  %1492 = vmatpush1.msra.mxu1 %v3112_v21 }
 0x412   :  { %1422 = vmatprep.subr.mxu0 %v3115_v22  ;;  %1493 = vmatprep.subr.mxu1 %v3118_v23 }
 0x413   :  { %1423 = vmatpush1.msra.mxu0 %v3121_v24  ;;  %1494 = vmatpush1.msra.mxu1 %v3124_v25 }
 0x414   :  { %1424 = vmatprep.subr.mxu0 %v3127_v29  ;;  %1495 = vmatprep.subr.mxu1 %v3816_v44 }
 0x415   :  { %1425 = vmatpush1.msra.mxu0 %v3817_v6  ;;  %1496 = vmatpush1.msra.mxu1 %v3818_v43  ;;  %v3847_v43 = vld [vmem:[#allocation46_spill] sm:$0xff] }
 0x416   :  { %1426 = vmatprep.subr.mxu0 %v3819_v37  ;;  %1497 = vmatprep.subr.mxu1 %v3820_v35 }
 0x417   :  { %1427 = vmatpush1.msra.mxu0 %v3821_v28  ;;  %1498 = vmatpush1.msra.mxu1 %v3822_v4  ;;  %v3846_v28 = vld [vmem:[#allocation45_spill] sm:$0xff] }
 0x418   :  { %1428 = vmatprep.subr.mxu0 %v3823_v33  ;;  %1499 = vmatprep.subr.mxu1 %v3824_v49 }
 0x419   :  { %1429 = vmatpush1.msra.mxu0 %v3825_v2  ;;  %1500 = vmatpush1.msra.mxu1 %v3826_v26  ;;  %v3837_v26 = vld [vmem:[#allocation38_spill] sm:$0xff] }
 0x41a   :  { %1430 = vmatprep.subr.mxu0 %v3827_v34  ;;  %1501 = vmatprep.subr.mxu1 %v3828_v31  ;;  %v3838_v34 = vld [vmem:[#allocation39_spill] sm:$0xff]  ;;  %v3839_v31 = vld [vmem:[#allocation40_spill] sm:$0xff] }
 0x41b   :  { %1431 = vmatpush1.msra.mxu0 %v3829_v62  ;;  %1502 = vmatpush1.msra.mxu1 %v3830_v27  ;;  %v3840_v62 = vld [vmem:[#allocation41_spill] sm:$0xff]  ;;  %v3841_v27 = vld [vmem:[#allocation15_spill] sm:$0xff] }
 0x41c   :  { %1432 = vmatprep.subr.mxu0 %v3831_v32  ;;  %1503 = vmatprep.subr.mxu1 %v3832_v47  ;;  %v3842_v32 = vmov 0.0   ;;  %v3843_v47 = vld [vmem:[#allocation16_spill] sm:$0xff] }
 0x41d   :  { %1433 = vmatpush1.msra.mxu0 %v3833_v42  ;;  %1504 = vmatpush1.msra.mxu1 %v3834_v41  ;;  %v3844_v41 = vld [vmem:[#allocation42_spill] sm:$0xff] }
 0x41e   :  { %1434 = vmatprep.subr.mxu0 %v3835_v30  ;;  %1505 = vmatprep.subr.mxu1 %v3836_v39  ;;  %v3845_v30 = vld [vmem:[#allocation47_spill] sm:$0xff] }
 0x41f   :  { %1435 = vmatpush1.msra.mxu0 %v3837_v26  ;;  %1506 = vmatpush1.msra.mxu1 %v3838_v34 }
 0x420   :  { %1436 = vmatprep.subr.mxu0 %v3839_v31  ;;  %1507 = vmatprep.subr.mxu1 %v3840_v62 }
 0x421   :  { %1437 = vmatpush1.msra.mxu0 %v3841_v27  ;;  %1470 = vmatprep.mubr.f32.mxu0 %v3842_v32 }
 0x422   :  { %1508 = vmatpush1.msra.mxu1 %v3843_v47  ;;  %1541 = vmatprep.mubr.f32.mxu1 %v3842_v32 }
 0x423   :  { %1624 = vmatprep.subr.mxu0 %v3844_v41  ;;  %1695 = vmatprep.subr.mxu1 %v3845_v30 }
 0x4c2   :  { %v1254_v39 = vpop.f32.mrf.mxu0  ;;  %v1325_v2 = vpop.f32.mrf.mxu1 }
 0x4c3   :  { %v1334_v26 = vrot.slane %v1254_v39, 4  ;;  %v1338_v42 = vrot.slane %v1254_v39, 5  ;;  %v1336_v47 = vrot.slane %v1325_v2, 4  ;;  %v1340_v30 = vrot.slane %v1325_v2, 5 }
 0x4c4   :  { %v1256_v34 = vpop.f32.mrf.mxu0  ;;  %v1327_v37 = vpop.f32.mrf.mxu1 }
 0x4c5   :  { %v1350_v31 = vadd.f32 %v1334_v26, %v3777_v36  ;;  %v1354_v62 = vadd.f32 %v1338_v42, %v3778_v38  ;;  %v1335_v27 = vrot.slane %v1256_v34, 4  ;;  %v1339_v49 = vrot.slane %v1256_v34, 5 }
 0x4c6   :  { %v1352_v26 = vadd.f32 %v1336_v47, %v3847_v43  ;;  %v1356_v42 = vadd.f32 %v1340_v30, %v3782_v56  ;;  %v1337_v34 = vrot.slane %v1327_v37, 4 }
 0x4c7   :  { %v1358_v33 = vmul.f32 0.5, %v1350_v31  ;;  %v1359_v4 = vmul.f32 0.5, %v1354_v62  ;;  %v1351_v32 = vadd.f32 %v1335_v27, %v3779_v52  ;;  %v1355_v41 = vadd.f32 %v1339_v49, %v3846_v28  ;;  %v3848_v62 = vld [vmem:[#allocation49_spill] sm:$0xff]  ;;  %v3849_v52 = vld [vmem:[#allocation48_spill] sm:$0xff] }
 0x4c8   :  { %v1341_v31 = vrot.slane %v1327_v37, 5  ;;  %v1353_v27 = vadd.f32 %v1337_v34, %v3848_v62 }
 0x4c9   :  { %2240 = vtanh.f32 %v1358_v33  ;;  %v1366_v35 = vmul.f32 0.5, %v1351_v32  ;;  %v1367_v39 = vmul.f32 0.5, %v1355_v41 }
 0x4ca   :  { %2242 = vtanh.f32 %v1359_v4  ;;  %v1357_v49 = vadd.f32 %v1341_v31, %v3849_v52  ;;  %v1376_v2 = vmul.f32 0.5, %v1353_v27  ;;  %v1387_v31 = vrot.slane %v3231_v40, 7 }
 0x4cb   :  { %2244 = vtanh.f32 %v1366_v35 }
 0x4cc   :  { %2246 = vtanh.f32 %v1367_v39  ;;  %v1377_v41 = vmul.f32 0.5, %v1357_v49 }
 0x4cd   :  { %2248 = vtanh.f32 %v1352_v26  ;;  %v1386_v26 = vrot.slane %v3229_v51, 7 }
 0x4ce   :  { %2250 = vtanh.f32 %v1356_v42 }
 0x4cf   :  { %2252 = vtanh.f32 %v1376_v2 }
 0x4d0   :  { %2254 = vtanh.f32 %v1377_v41 }
 0x4d6   :  { %v2241_v33 = vpop.eup %2240 }
 0x4d7   :  { %v2243_v4 = vpop.eup %2242  ;;  %v1362_v32 = vadd.f32 1.0, %v2241_v33 }
 0x4d8   :  { %v1363_v28 = vadd.f32 1.0, %v2243_v4  ;;  %v2245_v38 = vpop.eup %2244 }
 0x4d9   :  { %v2247_v47 = vpop.eup %2246  ;;  %v1364_v35 = vmul.f32 0.5, %v1362_v32  ;;  %v1370_v43 = vadd.f32 1.0, %v2245_v38 }
 0x4da   :  { %v1365_v30 = vmul.f32 0.5, %v1363_v28  ;;  %v1371_v39 = vadd.f32 1.0, %v2247_v47  ;;  %v2249_v42 = vpop.eup %2248 }
 0x4db   :  { %v1372_v37 = vmul.f32 0.5, %v1370_v43  ;;  %v2251_v27 = vpop.eup %2250  ;;  %v1392_v33 = vmul.f32 %v2249_v42, %v1364_v35 }
 0x4dc   :  { %v1373_v34 = vmul.f32 0.5, %v1371_v39  ;;  %v1393_v4 = vmul.f32 %v2251_v27, %v1365_v30  ;;  %v2253_v38 = vpop.eup %2252  ;;  %v3854_v27 = vld [vmem:[#allocation23_spill] sm:$0xff] }
 0x4dd   :  { %v1390_v52 = vmul.f32 %v1386_v26, %v1372_v37  ;;  %v2255_v43 = vpop.eup %2254  ;;  %v1380_v51 = vadd.f32 1.0, %v2253_v38  ;;  %v3858_v38 = vld [vmem:[#allocation27_spill] sm:$0xff] }
 0x4de   :  { %v1391_v49 = vmul.f32 %v1387_v31, %v1373_v34  ;;  %v1381_v28 = vadd.f32 1.0, %v2255_v43  ;;  %v3852_v34 = vld [vmem:[#allocation21_spill] sm:$0xff]  ;;  %v3853_v31 = vld [vmem:[#allocation22_spill] sm:$0xff]  ;;  %v3859_v43 = vld [vmem:[#allocation28_spill] sm:$0xff] }
 0x4df   :  { %v3318_v62 = vadd.f32 %v1392_v33, %v1390_v52  ;;  %v1382_v2 = vmul.f32 0.5, %v1380_v51  ;;  %v3855_v33 = vld [vmem:[#allocation24_spill] sm:$0xff]  ;;  %v3860_v51 = vld [vmem:[#allocation29_spill] sm:$0xff] }
 0x4e0   :  { %v3320_v32 = vadd.f32 %v1393_v4, %v1391_v49  ;;  %v1383_v40 = vmul.f32 0.5, %v1381_v28  ;;  %v3856_v49 = vld [vmem:[#allocation25_spill] sm:$0xff]  ;;  %v3857_v4 = vld [vmem:[#allocation26_spill] sm:$0xff] }
 0x4e1   :  { %2256 = vtanh.f32 %v3318_v62  ;;  %v3861_v28 = vld [vmem:[#allocation30_spill] sm:$0xff] }
 0x4e2   :  { %2258 = vtanh.f32 %v3320_v32 }
 0x4ee   :  { %v2257_v41 = vpop.eup %2256 }
 0x4ef   :  { %v2259_v47 = vpop.eup %2258  ;;  %v1398_v39 = vmul.f32 %v2257_v41, %v1382_v2  ;;  %v3862_v2 = vld [vmem:[#allocation31_spill] sm:$0xff]  ;;  %v3863_v41 = vld [vmem:[#allocation32_spill] sm:$0xff] }
 0x4f0   :  { %v1399_v35 = vmul.f32 %v2259_v47, %v1383_v40  ;;  %v3864_v40 = vld [vmem:[#allocation33_spill] sm:$0xff]  ;;  %v3865_v47 = vld [vmem:[#allocation34_spill] sm:$0xff] }
 0x4f1   :  { %v1402_v37 = vrot.slane %v1398_v39, 4  ;;  %v3326_v52 = vsel %vm143_vm0, %v3236_v63, %v1398_v39  ;;  %v3850_v63 = vld [vmem:[#allocation19_spill] sm:$0xff] }
 0x4f2   :  { %v1403_v30 = vrot.slane %v1399_v35, 3  ;;  %v3330_v26 = vsel %vm143_vm0, %v3239_v7, %v1399_v35  ;;  %v3851_v7 = vld [vmem:[#allocation20_spill] sm:$0xff]  ;;  %v3866_v39 = vld [vmem:[#allocation35_spill] sm:$0xff] }
 0x4f3   :  { %v3867_v35 = vld [vmem:[#allocation36_spill] sm:$0xff] }
 0x4f4   :  { %v1404_v42 = vsel %vm536_vm2, %v1403_v30, %v1402_v37  ;;  %v3868_v37 = vld [vmem:[#allocation37_spill] sm:$0xff]  ;;  %v3869_v30 = vld [vmem:[#allocation38_spill] sm:$0xff] }
 0x4f5   :  { %1471 = vmatmul.mubr.f32.vlgmr.msra.gmra.mxu0 %v1404_v42  ;;  %1542 = vmatmul.mubr.f32.vlgmr.msra.gmra.mxu1 %v1404_v42  ;;  %v3870_v42 = vld [vmem:[#allocation39_spill] sm:$0xff] }
 0x4f6   :  { %1625 = vmatpush1.msra.mxu0 %v3025_v53  ;;  %1696 = vmatpush1.msra.mxu1 %v3028_v46 }
 0x4f7   :  { %1626 = vmatprep.subr.mxu0 %v3031_v61  ;;  %1697 = vmatprep.subr.mxu1 %v3034_v60 }
 0x4f8   :  { %1627 = vmatpush1.msra.mxu0 %v3037_v0  ;;  %1698 = vmatpush1.msra.mxu1 %v3040_v54 }
 0x4f9   :  { %1628 = vmatprep.subr.mxu0 %v3043_v3  ;;  %1699 = vmatprep.subr.mxu1 %v3046_v5 }
 0x4fa   :  { %1629 = vmatpush1.msra.mxu0 %v3049_v45  ;;  %1700 = vmatpush1.msra.mxu1 %v3052_v50 }
 0x4fb   :  { %1630 = vmatprep.subr.mxu0 %v3055_v57  ;;  %1701 = vmatprep.subr.mxu1 %v3058_v48 }
 0x4fc   :  { %1631 = vmatpush1.msra.mxu0 %v3061_v55  ;;  %1702 = vmatpush1.msra.mxu1 %v3064_v1 }
 0x4fd   :  { %1632 = vmatprep.subr.mxu0 %v3067_v58  ;;  %1703 = vmatprep.subr.mxu1 %v3070_v59 }
 0x4fe   :  { %1633 = vmatpush1.msra.mxu0 %v3073_v8  ;;  %1704 = vmatpush1.msra.mxu1 %v3076_v9 }
 0x4ff   :  { %1634 = vmatprep.subr.mxu0 %v3079_v10  ;;  %1705 = vmatprep.subr.mxu1 %v3082_v11 }
 0x500   :  { %1635 = vmatpush1.msra.mxu0 %v3085_v12  ;;  %1706 = vmatpush1.msra.mxu1 %v3088_v13 }
 0x501   :  { %1636 = vmatprep.subr.mxu0 %v3091_v14  ;;  %1707 = vmatprep.subr.mxu1 %v3094_v15 }
 0x502   :  { %1637 = vmatpush1.msra.mxu0 %v3097_v16  ;;  %1708 = vmatpush1.msra.mxu1 %v3100_v17 }
 0x503   :  { %1638 = vmatprep.subr.mxu0 %v3103_v18  ;;  %1709 = vmatprep.subr.mxu1 %v3106_v19 }
 0x504   :  { %1639 = vmatpush1.msra.mxu0 %v3109_v20  ;;  %1710 = vmatpush1.msra.mxu1 %v3112_v21 }
 0x505   :  { %1640 = vmatprep.subr.mxu0 %v3115_v22  ;;  %1711 = vmatprep.subr.mxu1 %v3118_v23 }
 0x506   :  { %1641 = vmatpush1.msra.mxu0 %v3121_v24  ;;  %1712 = vmatpush1.msra.mxu1 %v3124_v25 }
 0x507   :  { %1642 = vmatprep.subr.mxu0 %v3127_v29  ;;  %1713 = vmatprep.subr.mxu1 %v3816_v44 }
 0x508   :  { %1643 = vmatpush1.msra.mxu0 %v3817_v6  ;;  %1714 = vmatpush1.msra.mxu1 %v3850_v63  ;;  %v3881_v63 = vld [vmem:[#allocation46_spill] sm:$0xff] }
 0x509   :  { %1644 = vmatprep.subr.mxu0 %v3851_v7  ;;  %1715 = vmatprep.subr.mxu1 %v3852_v34 }
 0x50a   :  { %1645 = vmatpush1.msra.mxu0 %v3853_v31  ;;  %1716 = vmatpush1.msra.mxu1 %v3854_v27  ;;  %v3879_v27 = vld [vmem:[#allocation44_spill] sm:$0xff]  ;;  %v3880_v31 = vld [vmem:[#allocation45_spill] sm:$0xff] }
 0x50b   :  { %1646 = vmatprep.subr.mxu0 %v3855_v33  ;;  %1717 = vmatprep.subr.mxu1 %v3856_v49 }
 0x50c   :  { %1647 = vmatpush1.msra.mxu0 %v3857_v4  ;;  %1718 = vmatpush1.msra.mxu1 %v3858_v38 }
 0x50d   :  { %1648 = vmatprep.subr.mxu0 %v3859_v43  ;;  %1719 = vmatprep.subr.mxu1 %v3860_v51  ;;  %v3871_v51 = vld [vmem:[#allocation40_spill] sm:$0xff]  ;;  %v3878_v43 = vld [vmem:[#allocation43_spill] sm:$0xff] }
 0x50e   :  { %1649 = vmatpush1.msra.mxu0 %v3861_v28  ;;  %1720 = vmatpush1.msra.mxu1 %v3862_v2  ;;  %v3872_v28 = vld [vmem:[#allocation41_spill] sm:$0xff]  ;;  %v3873_v2 = vld [vmem:[#allocation15_spill] sm:$0xff] }
 0x50f   :  { %1650 = vmatprep.subr.mxu0 %v3863_v41  ;;  %1721 = vmatprep.subr.mxu1 %v3864_v40  ;;  %v3874_v41 = vmov 0.0   ;;  %v3875_v40 = vld [vmem:[#allocation16_spill] sm:$0xff] }
 0x510   :  { %1651 = vmatpush1.msra.mxu0 %v3865_v47  ;;  %1722 = vmatpush1.msra.mxu1 %v3866_v39  ;;  %v3876_v39 = vld [vmem:[#allocation42_spill] sm:$0xff] }
 0x511   :  { %1652 = vmatprep.subr.mxu0 %v3867_v35  ;;  %1723 = vmatprep.subr.mxu1 %v3868_v37  ;;  %v3877_v35 = vld [vmem:[#allocation47_spill] sm:$0xff] }
 0x512   :  { %1653 = vmatpush1.msra.mxu0 %v3869_v30  ;;  %1724 = vmatpush1.msra.mxu1 %v3870_v42 }
 0x513   :  { %1654 = vmatprep.subr.mxu0 %v3871_v51  ;;  %1725 = vmatprep.subr.mxu1 %v3872_v28 }
 0x514   :  { %1655 = vmatpush1.msra.mxu0 %v3873_v2  ;;  %1688 = vmatprep.mubr.f32.mxu0 %v3874_v41 }
 0x515   :  { %1726 = vmatpush1.msra.mxu1 %v3875_v40  ;;  %1759 = vmatprep.mubr.f32.mxu1 %v3874_v41 }
 0x516   :  { %1842 = vmatprep.subr.mxu0 %v3876_v39  ;;  %1913 = vmatprep.subr.mxu1 %v3877_v35 }
 0x5b5   :  { %v1472_v37 = vpop.f32.mrf.mxu0  ;;  %v1543_v38 = vpop.f32.mrf.mxu1 }
 0x5b6   :  { %v1552_v30 = vrot.slane %v1472_v37, 3  ;;  %v1556_v47 = vrot.slane %v1472_v37, 4  ;;  %v1554_v40 = vrot.slane %v1543_v38, 3  ;;  %v1558_v35 = vrot.slane %v1543_v38, 4 }
 0x5b7   :  { %v1474_v42 = vpop.f32.mrf.mxu0  ;;  %v1545_v7 = vpop.f32.mrf.mxu1 }
 0x5b8   :  { %v1568_v51 = vadd.f32 %v1552_v30, %v3777_v36  ;;  %v1572_v28 = vadd.f32 %v1556_v47, %v3878_v43  ;;  %v1553_v2 = vrot.slane %v1474_v42, 3  ;;  %v1557_v4 = vrot.slane %v1474_v42, 4 }
 0x5b9   :  { %v1570_v30 = vadd.f32 %v1554_v40, %v3881_v63  ;;  %v1574_v47 = vadd.f32 %v1558_v35, %v3782_v56  ;;  %v1555_v42 = vrot.slane %v1545_v7, 3 }
 0x5ba   :  { %v1576_v49 = vmul.f32 0.5, %v1568_v51  ;;  %v1577_v33 = vmul.f32 0.5, %v1572_v28  ;;  %v1569_v41 = vadd.f32 %v1553_v2, %v3879_v27  ;;  %v1573_v39 = vadd.f32 %v1557_v4, %v3880_v31  ;;  %v3882_v28 = vld [vmem:[#allocation49_spill] sm:$0xff]  ;;  %v3883_v27 = vld [vmem:[#allocation48_spill] sm:$0xff] }
 0x5bb   :  { %v1559_v51 = vrot.slane %v1545_v7, 4  ;;  %v1571_v2 = vadd.f32 %v1555_v42, %v3882_v28 }
 0x5bc   :  { %2260 = vtanh.f32 %v1576_v49  ;;  %v1584_v34 = vmul.f32 0.5, %v1569_v41  ;;  %v1585_v37 = vmul.f32 0.5, %v1573_v39 }
 0x5bd   :  { %2262 = vtanh.f32 %v1577_v33  ;;  %v1575_v4 = vadd.f32 %v1559_v51, %v3883_v27  ;;  %v1594_v38 = vmul.f32 0.5, %v1571_v2  ;;  %v1605_v51 = vrot.slane %v3320_v32, 7 }
 0x5be   :  { %2264 = vtanh.f32 %v1584_v34 }
 0x5bf   :  { %2266 = vtanh.f32 %v1585_v37  ;;  %v1595_v39 = vmul.f32 0.5, %v1575_v4 }
 0x5c0   :  { %2268 = vtanh.f32 %v1570_v30  ;;  %v1604_v30 = vrot.slane %v3318_v62, 7 }
 0x5c1   :  { %2270 = vtanh.f32 %v1574_v47 }
 0x5c2   :  { %2272 = vtanh.f32 %v1594_v38 }
 0x5c3   :  { %2274 = vtanh.f32 %v1595_v39 }
 0x5c9   :  { %v2261_v49 = vpop.eup %2260 }
 0x5ca   :  { %v2263_v33 = vpop.eup %2262  ;;  %v1580_v41 = vadd.f32 1.0, %v2261_v49 }
 0x5cb   :  { %v1581_v31 = vadd.f32 1.0, %v2263_v33  ;;  %v2265_v43 = vpop.eup %2264 }
 0x5cc   :  { %v2267_v40 = vpop.eup %2266  ;;  %v1582_v34 = vmul.f32 0.5, %v1580_v41  ;;  %v1588_v63 = vadd.f32 1.0, %v2265_v43 }
 0x5cd   :  { %v1583_v35 = vmul.f32 0.5, %v1581_v31  ;;  %v1589_v37 = vadd.f32 1.0, %v2267_v40  ;;  %v2269_v47 = vpop.eup %2268 }
 0x5ce   :  { %v1590_v7 = vmul.f32 0.5, %v1588_v63  ;;  %v2271_v2 = vpop.eup %2270  ;;  %v1610_v49 = vmul.f32 %v2269_v47, %v1582_v34 }
 0x5cf   :  { %v1591_v42 = vmul.f32 0.5, %v1589_v37  ;;  %v1611_v33 = vmul.f32 %v2271_v2, %v1583_v35  ;;  %v2273_v63 = vpop.eup %2272  ;;  %v3912_v2 = vld [vmem:[#allocation45_spill] sm:$0xff] }
 0x5d0   :  { %v1608_v27 = vmul.f32 %v1604_v30, %v1590_v7  ;;  %v2275_v31 = vpop.eup %2274  ;;  %v1598_v62 = vadd.f32 1.0, %v2273_v63 }
 0x5d1   :  { %v1609_v4 = vmul.f32 %v1605_v51, %v1591_v42  ;;  %v1599_v43 = vadd.f32 1.0, %v2275_v31  ;;  %v3911_v42 = vld [vmem:[#allocation44_spill] sm:$0xff] }
 0x5d2   :  { %v3409_v28 = vadd.f32 %v1610_v49, %v1608_v27  ;;  %v1600_v38 = vmul.f32 0.5, %v1598_v62  ;;  %v3913_v62 = vld [vmem:[#allocation46_spill] sm:$0xff] }
 0x5d3   :  { %v3411_v41 = vadd.f32 %v1611_v33, %v1609_v4  ;;  %v1601_v32 = vmul.f32 0.5, %v1599_v43 }
 0x5d4   :  { %2276 = vtanh.f32 %v3409_v28 }
 0x5d5   :  { %2278 = vtanh.f32 %v3411_v41 }
 0x5e1   :  { %v2277_v39 = vpop.eup %2276 }
 0x5e2   :  { %v2279_v40 = vpop.eup %2278  ;;  %v1616_v34 = vmul.f32 %v2277_v39, %v1600_v38 }
 0x5e3   :  { %v1617_v37 = vmul.f32 %v2279_v40, %v1601_v32  ;;  %v3914_v40 = vld [vmem:[#allocation49_spill] sm:$0xff] }
 0x5e4   :  { %v1620_v35 = vrot.slane %v1616_v34, 5  ;;  %v3416_v27 = vsel %vm2065_vm6, %v3326_v52, %v1616_v34 }
 0x5e5   :  { %v1621_v7 = vrot.slane %v1617_v37, 4  ;;  %v3419_v30 = vsel %vm2065_vm6, %v3330_v26, %v1617_v37  ;;  %v3915_v37 = vld [vmem:[#allocation48_spill] sm:$0xff] }
 0x5e7   :  { %v1622_v47 = vsel %vm536_vm2, %v1621_v7, %v1620_v35 }
 0x5e8   :  { %1689 = vmatmul.mubr.f32.vlgmr.msra.gmra.mxu0 %v1622_v47  ;;  %1760 = vmatmul.mubr.f32.vlgmr.msra.gmra.mxu1 %v1622_v47 }
 0x5e9   :  { %1843 = vmatpush1.msra.mxu0 %v3025_v53  ;;  %1914 = vmatpush1.msra.mxu1 %v3028_v46  ;;  %v3884_v53 = vld [vmem:[#allocation19_spill] sm:$0xff]  ;;  %v3885_v46 = vld [vmem:[#allocation20_spill] sm:$0xff] }
 0x5ea   :  { %1844 = vmatprep.subr.mxu0 %v3031_v61  ;;  %1915 = vmatprep.subr.mxu1 %v3034_v60  ;;  %v3886_v61 = vld [vmem:[#allocation21_spill] sm:$0xff]  ;;  %v3887_v60 = vld [vmem:[#allocation22_spill] sm:$0xff] }
 0x5eb   :  { %1845 = vmatpush1.msra.mxu0 %v3037_v0  ;;  %1916 = vmatpush1.msra.mxu1 %v3040_v54  ;;  %v3888_v0 = vld [vmem:[#allocation23_spill] sm:$0xff]  ;;  %v3889_v54 = vld [vmem:[#allocation24_spill] sm:$0xff] }
 0x5ec   :  { %1846 = vmatprep.subr.mxu0 %v3043_v3  ;;  %1917 = vmatprep.subr.mxu1 %v3046_v5  ;;  %v3890_v3 = vld [vmem:[#allocation25_spill] sm:$0xff]  ;;  %v3891_v5 = vld [vmem:[#allocation26_spill] sm:$0xff] }
 0x5ed   :  { %1847 = vmatpush1.msra.mxu0 %v3049_v45  ;;  %1918 = vmatpush1.msra.mxu1 %v3052_v50  ;;  %v3892_v45 = vld [vmem:[#allocation27_spill] sm:$0xff]  ;;  %v3893_v50 = vld [vmem:[#allocation28_spill] sm:$0xff] }
 0x5ee   :  { %1848 = vmatprep.subr.mxu0 %v3055_v57  ;;  %1919 = vmatprep.subr.mxu1 %v3058_v48  ;;  %v3894_v57 = vld [vmem:[#allocation29_spill] sm:$0xff]  ;;  %v3895_v48 = vld [vmem:[#allocation30_spill] sm:$0xff] }
 0x5ef   :  { %1849 = vmatpush1.msra.mxu0 %v3061_v55  ;;  %1920 = vmatpush1.msra.mxu1 %v3064_v1  ;;  %v3896_v55 = vld [vmem:[#allocation31_spill] sm:$0xff]  ;;  %v3897_v1 = vld [vmem:[#allocation32_spill] sm:$0xff] }
 0x5f0   :  { %1850 = vmatprep.subr.mxu0 %v3067_v58  ;;  %1921 = vmatprep.subr.mxu1 %v3070_v59  ;;  %v3898_v58 = vld [vmem:[#allocation33_spill] sm:$0xff]  ;;  %v3899_v59 = vld [vmem:[#allocation34_spill] sm:$0xff] }
 0x5f1   :  { %1851 = vmatpush1.msra.mxu0 %v3073_v8  ;;  %1922 = vmatpush1.msra.mxu1 %v3076_v9  ;;  %v3900_v8 = vld [vmem:[#allocation35_spill] sm:$0xff]  ;;  %v3901_v9 = vld [vmem:[#allocation36_spill] sm:$0xff] }
 0x5f2   :  { %1852 = vmatprep.subr.mxu0 %v3079_v10  ;;  %1923 = vmatprep.subr.mxu1 %v3082_v11  ;;  %v3902_v10 = vld [vmem:[#allocation37_spill] sm:$0xff]  ;;  %v3903_v11 = vld [vmem:[#allocation38_spill] sm:$0xff] }
 0x5f3   :  { %1853 = vmatpush1.msra.mxu0 %v3085_v12  ;;  %1924 = vmatpush1.msra.mxu1 %v3088_v13  ;;  %v3904_v12 = vld [vmem:[#allocation39_spill] sm:$0xff]  ;;  %v3905_v13 = vld [vmem:[#allocation40_spill] sm:$0xff] }
 0x5f4   :  { %1854 = vmatprep.subr.mxu0 %v3091_v14  ;;  %1925 = vmatprep.subr.mxu1 %v3094_v15  ;;  %v3906_v14 = vld [vmem:[#allocation41_spill] sm:$0xff]  ;;  %v3907_v15 = vld [vmem:[#allocation15_spill] sm:$0xff] }
 0x5f5   :  { %1855 = vmatpush1.msra.mxu0 %v3097_v16  ;;  %1926 = vmatpush1.msra.mxu1 %v3100_v17  ;;  %v3908_v16 = vmov 0.0   ;;  %v3909_v17 = vld [vmem:[#allocation16_spill] sm:$0xff] }
 0x5f6   :  { %1856 = vmatprep.subr.mxu0 %v3103_v18  ;;  %1927 = vmatprep.subr.mxu1 %v3106_v19 }
 0x5f7   :  { %1857 = vmatpush1.msra.mxu0 %v3109_v20  ;;  %1928 = vmatpush1.msra.mxu1 %v3112_v21 }
 0x5f8   :  { %1858 = vmatprep.subr.mxu0 %v3115_v22  ;;  %1929 = vmatprep.subr.mxu1 %v3118_v23  ;;  %v3910_v23 = vld [vmem:[#allocation43_spill] sm:$0xff] }
 0x5f9   :  { %1859 = vmatpush1.msra.mxu0 %v3121_v24  ;;  %1930 = vmatpush1.msra.mxu1 %v3124_v25 }
 0x5fa   :  { %1860 = vmatprep.subr.mxu0 %v3127_v29  ;;  %1931 = vmatprep.subr.mxu1 %v3816_v44 }
 0x5fb   :  { %1861 = vmatpush1.msra.mxu0 %v3817_v6  ;;  %1932 = vmatpush1.msra.mxu1 %v3884_v53 }
 0x5fc   :  { %1862 = vmatprep.subr.mxu0 %v3885_v46  ;;  %1933 = vmatprep.subr.mxu1 %v3886_v61 }
 0x5fd   :  { %1863 = vmatpush1.msra.mxu0 %v3887_v60  ;;  %1934 = vmatpush1.msra.mxu1 %v3888_v0 }
 0x5fe   :  { %1864 = vmatprep.subr.mxu0 %v3889_v54  ;;  %1935 = vmatprep.subr.mxu1 %v3890_v3 }
 0x5ff   :  { %1865 = vmatpush1.msra.mxu0 %v3891_v5  ;;  %1936 = vmatpush1.msra.mxu1 %v3892_v45 }
 0x600   :  { %1866 = vmatprep.subr.mxu0 %v3893_v50  ;;  %1937 = vmatprep.subr.mxu1 %v3894_v57 }
 0x601   :  { %1867 = vmatpush1.msra.mxu0 %v3895_v48  ;;  %1938 = vmatpush1.msra.mxu1 %v3896_v55  ;;  %v1822_v48 = vrot.slane %v3409_v28, 7 }
 0x602   :  { %1868 = vmatprep.subr.mxu0 %v3897_v1  ;;  %1939 = vmatprep.subr.mxu1 %v3898_v58  ;;  %v1823_v58 = vrot.slane %v3411_v41, 7 }
 0x603   :  { %1869 = vmatpush1.msra.mxu0 %v3899_v59  ;;  %1940 = vmatpush1.msra.mxu1 %v3900_v8 }
 0x604   :  { %1870 = vmatprep.subr.mxu0 %v3901_v9  ;;  %1941 = vmatprep.subr.mxu1 %v3902_v10 }
 0x605   :  { %1871 = vmatpush1.msra.mxu0 %v3903_v11  ;;  %1942 = vmatpush1.msra.mxu1 %v3904_v12 }
 0x606   :  { %1872 = vmatprep.subr.mxu0 %v3905_v13  ;;  %1943 = vmatprep.subr.mxu1 %v3906_v14 }
 0x607   :  { %1873 = vmatpush1.msra.mxu0 %v3907_v15  ;;  %1906 = vmatprep.mubr.f32.mxu0 %v3908_v16 }
 0x608   :  { %1944 = vmatpush1.msra.mxu1 %v3909_v17  ;;  %1977 = vmatprep.mubr.f32.mxu1 %v3908_v16 }
 0x6a8   :  { %v1690_v18 = vpop.f32.mrf.mxu0  ;;  %v1761_v25 = vpop.f32.mrf.mxu1 }
 0x6a9   :  { %v1770_v19 = vrot.slane %v1690_v18, 2  ;;  %v1774_v20 = vrot.slane %v1690_v18, 3  ;;  %v1772_v26 = vrot.slane %v1761_v25, 2  ;;  %v1776_v4 = vrot.slane %v1761_v25, 3 }
 0x6aa   :  { %v1692_v21 = vpop.f32.mrf.mxu0  ;;  %v1763_v31 = vpop.f32.mrf.mxu1 }
 0x6ab   :  { %v1786_v22 = vadd.f32 %v1770_v19, %v3777_v36  ;;  %v1790_v24 = vadd.f32 %v1774_v20, %v3910_v23  ;;  %v1771_v29 = vrot.slane %v1692_v21, 2  ;;  %v1775_v44 = vrot.slane %v1692_v21, 3 }
 0x6ac   :  { %v1788_v43 = vadd.f32 %v1772_v26, %v3913_v62  ;;  %v1792_v38 = vadd.f32 %v1776_v4, %v3782_v56  ;;  %v1773_v39 = vrot.slane %v1763_v31, 2  ;;  %v1777_v32 = vrot.slane %v1763_v31, 3 }
 0x6ad   :  { %v1794_v6 = vmul.f32 0.5, %v1786_v22  ;;  %v1795_v52 = vmul.f32 0.5, %v1790_v24  ;;  %v1787_v51 = vadd.f32 %v1771_v29, %v3911_v42  ;;  %v1791_v49 = vadd.f32 %v1775_v44, %v3912_v2 }
 0x6ae   :  { %v1789_v34 = vadd.f32 %v1773_v39, %v3914_v40  ;;  %v1793_v35 = vadd.f32 %v1777_v32, %v3915_v37 }
 0x6af   :  { %2280 = vtanh.f32 %v1794_v6  ;;  %v1802_v33 = vmul.f32 0.5, %v1787_v51  ;;  %v1803_v63 = vmul.f32 0.5, %v1791_v49 }
 0x6b0   :  { %2282 = vtanh.f32 %v1795_v52  ;;  %v1812_v47 = vmul.f32 0.5, %v1789_v34  ;;  %v1813_v61 = vmul.f32 0.5, %v1793_v35 }
 0x6b1   :  { %2284 = vtanh.f32 %v1802_v33 }
 0x6b2   :  { %2286 = vtanh.f32 %v1803_v63 }
 0x6b3   :  { %2288 = vtanh.f32 %v1788_v43 }
 0x6b4   :  { %2290 = vtanh.f32 %v1792_v38 }
 0x6b5   :  { %2292 = vtanh.f32 %v1812_v47 }
 0x6b6   :  { %2294 = vtanh.f32 %v1813_v61 }
 0x6bc   :  { %v2281_v7 = vpop.eup %2280 }
 0x6bd   :  { %v2283_v53 = vpop.eup %2282  ;;  %v1798_v46 = vadd.f32 1.0, %v2281_v7 }
 0x6be   :  { %v1799_v60 = vadd.f32 1.0, %v2283_v53  ;;  %v2285_v0 = vpop.eup %2284 }
 0x6bf   :  { %v2287_v54 = vpop.eup %2286  ;;  %v1800_v3 = vmul.f32 0.5, %v1798_v46  ;;  %v1806_v5 = vadd.f32 1.0, %v2285_v0 }
 0x6c0   :  { %v1801_v45 = vmul.f32 0.5, %v1799_v60  ;;  %v1807_v50 = vadd.f32 1.0, %v2287_v54  ;;  %v2289_v55 = vpop.eup %2288 }
 0x6c1   :  { %v1808_v57 = vmul.f32 0.5, %v1806_v5  ;;  %v2291_v59 = vpop.eup %2290  ;;  %v1828_v9 = vmul.f32 %v2289_v55, %v1800_v3 }
 0x6c2   :  { %v1809_v1 = vmul.f32 0.5, %v1807_v50  ;;  %v1829_v11 = vmul.f32 %v2291_v59, %v1801_v45  ;;  %v2293_v14 = vpop.eup %2292 }
 0x6c3   :  { %v1826_v8 = vmul.f32 %v1822_v48, %v1808_v57  ;;  %v2295_v15 = vpop.eup %2294  ;;  %v1816_v28 = vadd.f32 1.0, %v2293_v14 }
 0x6c4   :  { %v1827_v10 = vmul.f32 %v1823_v58, %v1809_v1  ;;  %v1817_v16 = vadd.f32 1.0, %v2295_v15 }
 0x6c5   :  { %v3496_v12 = vadd.f32 %v1828_v9, %v1826_v8  ;;  %v1818_v17 = vmul.f32 0.5, %v1816_v28 }
 0x6c6   :  { %v3498_v13 = vadd.f32 %v1829_v11, %v1827_v10  ;;  %v1819_v41 = vmul.f32 0.5, %v1817_v16 }
 0x6c7   :  { %2296 = vtanh.f32 %v3496_v12  ;;  %v2040_v55 = vrot.slane %v3496_v12, 7 }
 0x6c8   :  { %2298 = vtanh.f32 %v3498_v13 }
 0x6d4   :  { %v2297_v18 = vpop.eup %2296 }
 0x6d5   :  { %v2299_v19 = vpop.eup %2298  ;;  %v1834_v20 = vmul.f32 %v2297_v18, %v1818_v17 }
 0x6d6   :  { %v1835_v21 = vmul.f32 %v2299_v19, %v1819_v41 }
 0x6d7   :  { %v1838_v22 = vrot.slane %v1834_v20, 6  ;;  %v3503_v24 = vsel %vm2068_vm7, %v3416_v27, %v1834_v20 }
 0x6d8   :  { %v1839_v25 = vrot.slane %v1835_v21, 5  ;;  %v3506_v29 = vsel %vm2068_vm7, %v3419_v30, %v1835_v21 }
 0x6da   :  { %v1840_v44 = vsel %vm536_vm2, %v1839_v25, %v1838_v22 }
 0x6db   :  { %1907 = vmatmul.mubr.f32.vlgmr.msra.gmra.mxu0 %v1840_v44  ;;  %1978 = vmatmul.mubr.f32.vlgmr.msra.gmra.mxu1 %v1840_v44 }
 0x79b   :  { %v1908_v6 = vpop.f32.mrf.mxu0  ;;  %v1979_v33 = vpop.f32.mrf.mxu1 }
 0x79c   :  { %v1988_v52 = vrot.slane %v1908_v6, 1  ;;  %v1992_v26 = vrot.slane %v1908_v6, 2  ;;  %v1990_v38 = vrot.slane %v1979_v33, 1  ;;  %v1994_v32 = vrot.slane %v1979_v33, 2 }
 0x79d   :  { %v1910_v51 = vpop.f32.mrf.mxu0  ;;  %v1981_v7 = vpop.f32.mrf.mxu1 }
 0x79e   :  { %v2004_v49 = vadd.f32 %v1988_v52, %v3777_v36  ;;  %v2008_v4 = vadd.f32 %v1992_v26, %v3910_v23  ;;  %v1989_v63 = vrot.slane %v1910_v51, 1  ;;  %v1993_v27 = vrot.slane %v1910_v51, 2 }
 0x79f   :  { %v2006_v36 = vadd.f32 %v1990_v38, %v3913_v62  ;;  %v2010_v23 = vadd.f32 %v1994_v32, %v3782_v56  ;;  %v1991_v47 = vrot.slane %v1981_v7, 1  ;;  %v1995_v53 = vrot.slane %v1981_v7, 2 }
 0x7a0   :  { %v2012_v31 = vmul.f32 0.5, %v2004_v49  ;;  %v2013_v43 = vmul.f32 0.5, %v2008_v4  ;;  %v2005_v30 = vadd.f32 %v1989_v63, %v3911_v42  ;;  %v2009_v39 = vadd.f32 %v1993_v27, %v3912_v2 }
 0x7a1   :  { %v2007_v42 = vadd.f32 %v1991_v47, %v3914_v40  ;;  %v2011_v2 = vadd.f32 %v1995_v53, %v3915_v37  ;;  %v2041_v37 = vrot.slane %v3498_v13, 7 }
 0x7a2   :  { %2300 = vtanh.f32 %v2012_v31  ;;  %v2020_v34 = vmul.f32 0.5, %v2005_v30  ;;  %v2021_v35 = vmul.f32 0.5, %v2009_v39 }
 0x7a3   :  { %2302 = vtanh.f32 %v2013_v43  ;;  %v2030_v61 = vmul.f32 0.5, %v2007_v42  ;;  %v2031_v54 = vmul.f32 0.5, %v2011_v2 }
 0x7a4   :  { %2304 = vtanh.f32 %v2020_v34 }
 0x7a5   :  { %2306 = vtanh.f32 %v2021_v35 }
 0x7a6   :  { %2308 = vtanh.f32 %v2006_v36 }
 0x7a7   :  { %2310 = vtanh.f32 %v2010_v23 }
 0x7a8   :  { %2312 = vtanh.f32 %v2030_v61 }
 0x7a9   :  { %2314 = vtanh.f32 %v2031_v54 }
 0x7af   :  { %v2301_v46 = vpop.eup %2300 }
 0x7b0   :  { %v2303_v60 = vpop.eup %2302  ;;  %v2016_v0 = vadd.f32 1.0, %v2301_v46 }
 0x7b1   :  { %v2017_v3 = vadd.f32 1.0, %v2303_v60  ;;  %v2305_v5 = vpop.eup %2304 }
 0x7b2   :  { %v2307_v62 = vpop.eup %2306  ;;  %v2018_v45 = vmul.f32 0.5, %v2016_v0  ;;  %v2024_v50 = vadd.f32 1.0, %v2305_v5 }
 0x7b3   :  { %v2019_v56 = vmul.f32 0.5, %v2017_v3  ;;  %v2025_v57 = vadd.f32 1.0, %v2307_v62  ;;  %v2309_v40 = vpop.eup %2308 }
 0x7b4   :  { %v2026_v48 = vmul.f32 0.5, %v2024_v50  ;;  %v2311_v58 = vpop.eup %2310  ;;  %v2046_v8 = vmul.f32 %v2309_v40, %v2018_v45 }
 0x7b5   :  { %v2027_v1 = vmul.f32 0.5, %v2025_v57  ;;  %v2047_v10 = vmul.f32 %v2311_v58, %v2019_v56  ;;  %v2313_v28 = vpop.eup %2312 }
 0x7b6   :  { %v2044_v59 = vmul.f32 %v2040_v55, %v2026_v48  ;;  %v2315_v16 = vpop.eup %2314  ;;  %v2034_v17 = vadd.f32 1.0, %v2313_v28 }
 0x7b7   :  { %v2045_v9 = vmul.f32 %v2041_v37, %v2027_v1  ;;  %v2035_v12 = vadd.f32 1.0, %v2315_v16 }
 0x7b8   :  { %v2048_v11 = vadd.f32 %v2046_v8, %v2044_v59  ;;  %v2036_v41 = vmul.f32 0.5, %v2034_v17 }
 0x7b9   :  { %v2049_v14 = vadd.f32 %v2047_v10, %v2045_v9  ;;  %v2037_v19 = vmul.f32 0.5, %v2035_v12 }
 0x7ba   :  { %2316 = vtanh.f32 %v2048_v11  ;;  %2088 = vst [vmem:[#allocation4 - $0x7] sm:$0x80] %v2048_v11 }
 0x7bb   :  { %2318 = vtanh.f32 %v2049_v14  ;;  %v2085_v15 = vrot.slane %v2049_v14, 7 }
 0x7bd   :  { %2089 = vst [vmem:[#allocation4 + $0x1] sm:$0x1] %v2085_v15 }
 0x7c4   :  { %v2095_v18 = vld [vmem:[#allocation4] sm:$0x3] }
 0x7c5   :  { %2096 = vst [vmem:[#allocation11] sm:$0x3] %v2095_v18 }
 0x7c7   :  { %v2317_v13 = vpop.eup %2316 }
 0x7c8   :  { %v2319_v20 = vpop.eup %2318  ;;  %v2052_v21 = vmul.f32 %v2317_v13, %v2036_v41 }
 0x7c9   :  { %v2053_v22 = vmul.f32 %v2319_v20, %v2037_v19 }
 0x7ca   :  { %2081 = vst [vmem:[#allocation3 - $0x7] sm:$0x80] %v2052_v21  ;;  %v2072_v25 = vsel %vm2071_vm8, %v3503_v24, %v2052_v21 }
 0x7cb   :  { %v2078_v44 = vrot.slane %v2053_v22, 7  ;;  %v2073_v6 = vsel %vm2071_vm8, %v3506_v29, %v2053_v22  ;;  %2074 = vst [vmem:[#allocation8] sm:$0xff] %v2072_v25 }
 0x7cc   :  { %2075 = vst [vmem:[#allocation8 + $0x8] sm:$0xff] %v2073_v6 }
 0x7cd   :  { %2082 = vst [vmem:[#allocation3 + $0x1] sm:$0x1] %v2078_v44 }
 0x7ce   :  { %2415 = shalt.err (!%p2412_p9)
}
 0x7cf   :  { %s2475_s13 = smov 128   ;;  %s2476_s14 = smov 8  }
 0x7d0   :  { %2108 = dma.vmem_to_hbm [thread:$0]  %s2103_s11, 256, %s3534_s4, [#allocation7], %s2475_s13, %s2475_s13, %s2476_s14  }
 0x7d1   :  { %s2477_s17 = smov [#allocation9]   ;;  %s2478_s19 = smov [#allocation11]  }
 0x7d2   :  { %s2115_s18 = sshll.u32 %s2477_s17, 4  ;;  %s2125_s20 = sshll.u32 %s2478_s19, 4  ;;  %s2116_s18 = int_to_ptr.vmem [resolvable:$true] %s2115_s18  ;;  %s2126_s20 = int_to_ptr.vmem [resolvable:$true] %s2125_s20 }
 0x7d3   :  { %s2424_s21 = scalar_lea.vmem %s2116_s18, 32  ;;  %p2429_p11 = scmp.lt.s32.totalorder %s2116_s18, %s2116_s18 }
 0x7d4   :  { %v2093_v24 = vld [vmem:[#allocation3] sm:$0x3]  ;;  %p2425_p10 = scmp.ne.s32.totalorder %s2116_s18, %s2424_s21  ;;  %p2430_p12 = scmp.lt.s32.totalorder %s2424_s21, %s2424_s21 }
 0x7d5   :  { %2094 = vst [vmem:[#allocation9] sm:$0x3] %v2093_v24 }
 0x7d6   :  { %p2431_p13 = por %p2430_p12, %p2429_p11 }
 0x7d8   :  { %p2432_p0 = pnand %p2431_p13, %p2425_p10 }
 0x7da   :  { %2435 = shalt.err (!%p2432_p0)
}
 0x7db   :  { %2118 = dma.vmem_to_hbm [thread:$0]  %s2116_s18, 32, %s3535_s5, [#allocation10]  }
 0x7dc   :  { %s2444_s4 = scalar_lea.vmem %s2126_s20, 32  ;;  %p2449_p2 = scmp.lt.s32.totalorder %s2126_s20, %s2126_s20 }
 0x7dd   :  { %p2445_p1 = scmp.ne.s32.totalorder %s2126_s20, %s2444_s4  ;;  %p2450_p3 = scmp.lt.s32.totalorder %s2444_s4, %s2444_s4 }
 0x7df   :  { %p2451_p4 = por %p2450_p3, %p2449_p2 }
 0x7e1   :  { %p2452_p5 = pnand %p2451_p4, %p2445_p1 }
 0x7e3   :  { %2455 = shalt.err (!%p2452_p5)
}
 0x7e4   :  { %2128 = dma.vmem_to_hbm [thread:$0]  %s2126_s20, 32, %s3536_s6, [#allocation10]  }
 0x7e5   :  { %2466 = dma.done.wait [#allocation7], 256  }
 0x7e6   :  { %2467 = vsyncadd [#allocation7], 4294967040 }
 0x7e7   :  { %2468 = dma.done.wait [#allocation10], 64  }
 0x7e8   :  { %2469 = vsyncadd [#allocation10], 4294967232 }
 0x7e9   :  { %2138 = vsyncpa [#allocation6], 1 }
 0x7ea   :  { %2139 = vsyncpa [#allocation7], 1 }
 0x7eb   :  { %2140 = vsyncpa [#allocation10], 1 }

// kernel: tpu_custom_call.1
= control target key start
LH: loop header
LB: loop body
LE: loop exit
PB: predicated region body
PF: predicated region fallthrough
CT: control target
= control target key end

     0   :  { %12 = vsyncpa [#allocation6], 0  ;;  %s3530_s0 = inlined_call_operand.vmem [shape: f32[2,8,4], index: 0, kind: input, shape index: {}]   ;;  %s3531_s1 = inlined_call_operand.vmem [shape: f32[4,512], index: 1, kind: input, shape index: {}]   ;;  %s3532_s2 = inlined_call_operand.hbm [shape: f32[128,512], index: 2, kind: input, shape index: {}]   ;;  %s3533_s3 = inlined_call_operand.vmem [shape: f32[1,512], index: 3, kind: input, shape index: {}]   ;;  %s3534_s4 = inlined_call_operand.hbm [shape: f32[2,8,128], index: 4, kind: output, shape index: {0}]   ;;  %s3535_s5 = inlined_call_operand.hbm [shape: f32[2,128], index: 5, kind: output, shape index: {1}]   ;;  %s3536_s6 = inlined_call_operand.hbm [shape: f32[2,128], index: 6, kind: output, shape index: {2}]  }
   0x1   :  { %13 = vsyncpa [#allocation7], 0 }
   0x2   :  { %14 = vsyncpa [#allocation10], 0  ;;  %s2470_s21 = smov [#allocation5]  }
   0x3   :  { %s24_s22 = sshll.u32 %s2470_s21, 4  ;;  %s25_s22 = int_to_ptr.vmem [resolvable:$true] %s24_s22 }
   0x4   :  { %s2392_s23 = scalar_lea.vmem %s25_s22, 8192  ;;  %p2397_p1 = scmp.lt.s32.totalorder %s25_s22, %s25_s22 }
   0x5   :  { %p2393_p0 = scmp.ne.s32.totalorder %s25_s22, %s2392_s23  ;;  %p2398_p2 = scmp.lt.s32.totalorder %s2392_s23, %s2392_s23 }
   0x7   :  { %p2399_p3 = por %p2398_p2, %p2397_p1 }
   0x9   :  { %p2400_p4 = pnand %p2399_p3, %p2393_p0 }
   0xb   :  { %2403 = shalt.err (!%p2400_p4)
}
   0xc   :  { %s2471_s24 = smov 512   ;;  %s2472_s25 = smov 32  }
   0xd   :  { %30 = dma.hbm_to_vmem [thread:$0]  %s3532_s2, 8192, %s25_s22, [#allocation6], %s2471_s24, %s2471_s24, %s2472_s25  }
   0xe   :  { %2464 = dma.done.wait [#allocation6], 8192  }
   0xf   :  { %2465 = vsyncadd [#allocation6], 4294959104  ;;  %v3539_v0 = vmov 0.0   ;;  %v108_v1 = vld [vmem:[%s3531_s1] sm:$0xff]  ;;  %vm143_vm0 = vcmask 1043456   ;;  %v109_v2 = vld [vmem:[%s3531_s1 + $0x8] sm:$0xff] }
  0x10   :  { %216 = vmatprep.mubr.f32.mxu0 %v3539_v0  ;;  %40 = vst [vmem:[#allocation3] sm:$0x3] %v3539_v0  ;;  %41 = vst [vmem:[#allocation4] sm:$0x3] %v3539_v0  ;;  %293 = vmatprep.mubr.f32.mxu1 %v3539_v0  ;;  %v134_v3 = vcombine.high %v108_v1, %v108_v1  ;;  %v135_v4 = vcombine.high %v109_v2, %v109_v2  ;;  %v106_v5 = vld [vmem:[%s3530_s0] sm:$0xff]  ;;  %vm136_vm1 = vcmask 31744  }
  0x11   :  { %v2530_v6 = vld [vmem:[#allocation5 + $0x1e8] sm:$0xff]  ;;  %v2534_v7 = vld [vmem:[#allocation5 + $0x1f8] sm:$0xff]  ;;  %v2538_v8 = vld [vmem:[#allocation5 + $0x1e0] sm:$0xff]  ;;  %vm536_vm2 = vcmask 1041409   ;;  %vm2054_vm3 = vcmask 1040384   ;;  %vm2057_vm4 = vcmask 1041408  }
  0x12   :  { %3680 = vst [vmem:[#allocation15_spill] sm:$0xff] %v2530_v6  ;;  %2141 = vmatprep.subr.msk.mxu0 %vm143_vm0, %v134_v3  ;;  %2145 = vmatprep.subr.msk.mxu1 %vm143_vm0, %v135_v4  ;;  %3681 = vst [vmem:[#allocation16_spill] sm:$0xff] %v2534_v7  ;;  %v2540_v9 = vld [vmem:[#allocation5 + $0x1f0] sm:$0xff]  ;;  %v2544_v10 = vld [vmem:[#allocation5 + $0x1c8] sm:$0xff]  ;;  %vm2060_vm5 = vcmask 1042432   ;;  %vm2065_vm6 = vcmask 1044480  }
  0x13   :  { %2142 = vmatpush1.msk.msra.mxu0 %vm143_vm0, %v108_v1  ;;  %2146 = vmatpush1.msk.msra.mxu1 %vm143_vm0, %v109_v2  ;;  %v2546_v11 = vld [vmem:[#allocation5 + $0x1d8] sm:$0xff]  ;;  %v2550_v12 = vld [vmem:[#allocation5 + $0x1c0] sm:$0xff]  ;;  %v2552_v13 = vld [vmem:[#allocation5 + $0x1d0] sm:$0xff]  ;;  %vm2068_vm7 = vcmask 1045504   ;;  %vm2071_vm8 = vcmask 1046528  }
  0x14   :  { %2143 = vmatmul.mubr.msk.f32.vlgmr.msra.gmra.mxu0 %vm136_vm1, %v106_v5  ;;  %327 = vmatprep.subr.mxu0 %v2530_v6  ;;  %v2556_v14 = vld [vmem:[#allocation5 + $0x1a8] sm:$0xff]  ;;  %v2558_v15 = vld [vmem:[#allocation5 + $0x1b8] sm:$0xff]  ;;  %v2562_v16 = vld [vmem:[#allocation5 + $0x1a0] sm:$0xff] }
  0x15   :  { %398 = vmatprep.subr.mxu1 %v2534_v7  ;;  %2147 = vmatmul.mubr.msk.f32.vlgmr.msra.gmra.mxu1 %vm136_vm1, %v106_v5  ;;  %v2564_v17 = vld [vmem:[#allocation5 + $0x1b0] sm:$0xff]  ;;  %v2568_v18 = vld [vmem:[#allocation5 + $0x188] sm:$0xff]  ;;  %v2570_v19 = vld [vmem:[#allocation5 + $0x198] sm:$0xff] }
  0x16   :  { %328 = vmatpush1.msra.mxu0 %v2538_v8  ;;  %399 = vmatpush1.msra.mxu1 %v2540_v9  ;;  %v2574_v20 = vld [vmem:[#allocation5 + $0x180] sm:$0xff]  ;;  %v2576_v21 = vld [vmem:[#allocation5 + $0x190] sm:$0xff]  ;;  %v2580_v22 = vld [vmem:[#allocation5 + $0x168] sm:$0xff] }
  0x17   :  { %329 = vmatprep.subr.mxu0 %v2544_v10  ;;  %400 = vmatprep.subr.mxu1 %v2546_v11  ;;  %v2582_v23 = vld [vmem:[#allocation5 + $0x178] sm:$0xff]  ;;  %v2586_v24 = vld [vmem:[#allocation5 + $0x160] sm:$0xff]  ;;  %v2588_v25 = vld [vmem:[#allocation5 + $0x170] sm:$0xff] }
  0x18   :  { %330 = vmatpush1.msra.mxu0 %v2550_v12  ;;  %401 = vmatpush1.msra.mxu1 %v2552_v13  ;;  %v2592_v26 = vld [vmem:[#allocation5 + $0x148] sm:$0xff]  ;;  %v2594_v27 = vld [vmem:[#allocation5 + $0x158] sm:$0xff]  ;;  %v2598_v28 = vld [vmem:[#allocation5 + $0x140] sm:$0xff] }
  0x19   :  { %331 = vmatprep.subr.mxu0 %v2556_v14  ;;  %402 = vmatprep.subr.mxu1 %v2558_v15  ;;  %v2600_v29 = vld [vmem:[#allocation5 + $0x150] sm:$0xff]  ;;  %v2604_v30 = vld [vmem:[#allocation5 + $0x128] sm:$0xff]  ;;  %v2606_v31 = vld [vmem:[#allocation5 + $0x138] sm:$0xff] }
  0x1a   :  { %332 = vmatpush1.msra.mxu0 %v2562_v16  ;;  %403 = vmatpush1.msra.mxu1 %v2564_v17  ;;  %v2610_v32 = vld [vmem:[#allocation5 + $0x120] sm:$0xff]  ;;  %v2612_v33 = vld [vmem:[#allocation5 + $0x130] sm:$0xff]  ;;  %v2616_v34 = vld [vmem:[#allocation5 + $0x108] sm:$0xff] }
  0x1b   :  { %333 = vmatprep.subr.mxu0 %v2568_v18  ;;  %404 = vmatprep.subr.mxu1 %v2570_v19  ;;  %v2618_v35 = vld [vmem:[#allocation5 + $0x118] sm:$0xff]  ;;  %v2622_v36 = vld [vmem:[#allocation5 + $0x100] sm:$0xff]  ;;  %v2624_v37 = vld [vmem:[#allocation5 + $0x110] sm:$0xff] }
  0x1c   :  { %334 = vmatpush1.msra.mxu0 %v2574_v20  ;;  %405 = vmatpush1.msra.mxu1 %v2576_v21  ;;  %v2628_v38 = vld [vmem:[#allocation5 + $0xe8] sm:$0xff]  ;;  %v2630_v39 = vld [vmem:[#allocation5 + $0xf8] sm:$0xff]  ;;  %v2634_v40 = vld [vmem:[#allocation5 + $0xe0] sm:$0xff] }
  0x1d   :  { %335 = vmatprep.subr.mxu0 %v2580_v22  ;;  %406 = vmatprep.subr.mxu1 %v2582_v23  ;;  %v2636_v41 = vld [vmem:[#allocation5 + $0xf0] sm:$0xff]  ;;  %v2640_v42 = vld [vmem:[#allocation5 + $0xc8] sm:$0xff]  ;;  %v2642_v43 = vld [vmem:[#allocation5 + $0xd8] sm:$0xff] }
  0x1e   :  { %336 = vmatpush1.msra.mxu0 %v2586_v24  ;;  %407 = vmatpush1.msra.mxu1 %v2588_v25  ;;  %v2646_v44 = vld [vmem:[#allocation5 + $0xc0] sm:$0xff]  ;;  %v2648_v45 = vld [vmem:[#allocation5 + $0xd0] sm:$0xff]  ;;  %v2652_v46 = vld [vmem:[#allocation5 + $0xa8] sm:$0xff] }
  0x1f   :  { %337 = vmatprep.subr.mxu0 %v2592_v26  ;;  %408 = vmatprep.subr.mxu1 %v2594_v27  ;;  %3682 = vst [vmem:[#allocation17_spill] sm:$0xff] %v2648_v45  ;;  %3683 = vst [vmem:[#allocation18_spill] sm:$0xff] %v2652_v46  ;;  %v2654_v47 = vld [vmem:[#allocation5 + $0xb8] sm:$0xff]  ;;  %v2658_v48 = vld [vmem:[#allocation5 + $0xa0] sm:$0xff] }
  0x20   :  { %338 = vmatpush1.msra.mxu0 %v2598_v28  ;;  %409 = vmatpush1.msra.mxu1 %v2600_v29  ;;  %3684 = vst [vmem:[#allocation19_spill] sm:$0xff] %v2654_v47  ;;  %3685 = vst [vmem:[#allocation20_spill] sm:$0xff] %v2658_v48  ;;  %v2660_v49 = vld [vmem:[#allocation5 + $0xb0] sm:$0xff]  ;;  %v2664_v50 = vld [vmem:[#allocation5 + $0x88] sm:$0xff] }
  0x21   :  { %339 = vmatprep.subr.mxu0 %v2604_v30  ;;  %410 = vmatprep.subr.mxu1 %v2606_v31  ;;  %3686 = vst [vmem:[#allocation21_spill] sm:$0xff] %v2660_v49  ;;  %3687 = vst [vmem:[#allocation22_spill] sm:$0xff] %v2664_v50  ;;  %v2666_v51 = vld [vmem:[#allocation5 + $0x98] sm:$0xff]  ;;  %v2670_v52 = vld [vmem:[#allocation5 + $0x80] sm:$0xff] }
  0x22   :  { %340 = vmatpush1.msra.mxu0 %v2610_v32  ;;  %411 = vmatpush1.msra.mxu1 %v2612_v33  ;;  %3688 = vst [vmem:[#allocation23_spill] sm:$0xff] %v2666_v51  ;;  %3689 = vst [vmem:[#allocation24_spill] sm:$0xff] %v2670_v52  ;;  %v2672_v53 = vld [vmem:[#allocation5 + $0x90] sm:$0xff]  ;;  %v2676_v54 = vld [vmem:[#allocation5 + $0x68] sm:$0xff] }
  0x23   :  { %341 = vmatprep.subr.mxu0 %v2616_v34  ;;  %412 = vmatprep.subr.mxu1 %v2618_v35  ;;  %3690 = vst [vmem:[#allocation25_spill] sm:$0xff] %v2672_v53  ;;  %3691 = vst [vmem:[#allocation26_spill] sm:$0xff] %v2676_v54  ;;  %v2678_v55 = vld [vmem:[#allocation5 + $0x78] sm:$0xff]  ;;  %v2682_v56 = vld [vmem:[#allocation5 + $0x60] sm:$0xff] }
  0x24   :  { %342 = vmatpush1.msra.mxu0 %v2622_v36  ;;  %413 = vmatpush1.msra.mxu1 %v2624_v37  ;;  %3692 = vst [vmem:[#allocation27_spill] sm:$0xff] %v2678_v55  ;;  %3693 = vst [vmem:[#allocation28_spill] sm:$0xff] %v2682_v56  ;;  %v2686_v57 = vld [vmem:[#allocation5 + $0x70] sm:$0xff]  ;;  %v107_v58 = vld [vmem:[%s3530_s0 + $0x8] sm:$0xff] }
  0x25   :  { %343 = vmatprep.subr.mxu0 %v2628_v38  ;;  %414 = vmatprep.subr.mxu1 %v2630_v39  ;;  %3694 = vst [vmem:[#allocation29_spill] sm:$0xff] %v2686_v57  ;;  %v2693_v59 = vld [vmem:[#allocation5 + $0x48] sm:$0xff]  ;;  %v2695_v60 = vld [vmem:[#allocation5 + $0x58] sm:$0xff]  ;;  %v2699_v61 = vld [vmem:[#allocation5 + $0x40] sm:$0xff] }
  0x26   :  { %344 = vmatpush1.msra.mxu0 %v2634_v40  ;;  %415 = vmatpush1.msra.mxu1 %v2636_v41  ;;  %3695 = vst [vmem:[#allocation30_spill] sm:$0xff] %v2693_v59  ;;  %3696 = vst [vmem:[#allocation31_spill] sm:$0xff] %v2695_v60  ;;  %v2703_v62 = vld [vmem:[#allocation5 + $0x50] sm:$0xff]  ;;  %v2705_v63 = vld [vmem:[#allocation5 + $0x28] sm:$0xff] }
  0x27   :  { %345 = vmatprep.subr.mxu0 %v2640_v42  ;;  %416 = vmatprep.subr.mxu1 %v2642_v43  ;;  %3697 = vst [vmem:[#allocation32_spill] sm:$0xff] %v2699_v61  ;;  %3698 = vst [vmem:[#allocation33_spill] sm:$0xff] %v2703_v62  ;;  %v2709_v1 = vld [vmem:[#allocation5 + $0x38] sm:$0xff]  ;;  %v2713_v2 = vld [vmem:[#allocation5 + $0x20] sm:$0xff] }
  0x28   :  { %346 = vmatpush1.msra.mxu0 %v2646_v44  ;;  %417 = vmatpush1.msra.mxu1 %v2648_v45  ;;  %3699 = vst [vmem:[#allocation34_spill] sm:$0xff] %v2705_v63  ;;  %3700 = vst [vmem:[#allocation35_spill] sm:$0xff] %v2709_v1  ;;  %v2715_v3 = vld [vmem:[#allocation5 + $0x30] sm:$0xff]  ;;  %v2719_v4 = vld [vmem:[#allocation5 + $0x8] sm:$0xff] }
  0x29   :  { %347 = vmatprep.subr.mxu0 %v2652_v46  ;;  %418 = vmatprep.subr.mxu1 %v2654_v47  ;;  %3701 = vst [vmem:[#allocation36_spill] sm:$0xff] %v2713_v2  ;;  %3702 = vst [vmem:[#allocation37_spill] sm:$0xff] %v2715_v3  ;;  %v2721_v5 = vld [vmem:[#allocation5 + $0x18] sm:$0xff] }
  0x2a   :  { %348 = vmatpush1.msra.mxu0 %v2658_v48  ;;  %419 = vmatpush1.msra.mxu1 %v2660_v49  ;;  %3703 = vst [vmem:[#allocation38_spill] sm:$0xff] %v2719_v4  ;;  %3704 = vst [vmem:[#allocation39_spill] sm:$0xff] %v2721_v5 }
  0x2b   :  { %349 = vmatprep.subr.mxu0 %v2664_v50  ;;  %420 = vmatprep.subr.mxu1 %v2666_v51 }
  0x2c   :  { %350 = vmatpush1.msra.mxu0 %v2670_v52  ;;  %421 = vmatpush1.msra.mxu1 %v2672_v53 }
  0x2d   :  { %351 = vmatprep.subr.mxu0 %v2676_v54  ;;  %422 = vmatprep.subr.mxu1 %v2678_v55 }
  0x2e   :  { %222 = vmatprep.mubr.f32.mxu0 %v3539_v0  ;;  %352 = vmatpush1.msra.mxu0 %v2682_v56 }
  0x2f   :  { %423 = vmatpush1.msra.mxu1 %v2686_v57  ;;  %2144 = vmatmul.mubr.msk.f32.gmra.mxu0 %vm136_vm1, %v107_v58 }
  0x30   :  { %353 = vmatprep.subr.mxu0 %v2693_v59  ;;  %424 = vmatprep.subr.mxu1 %v2695_v60  ;;  %v2725_v60 = vld [vmem:[#allocation5] sm:$0xff] }
  0x31   :  { %299 = vmatprep.mubr.f32.mxu1 %v3539_v0  ;;  %354 = vmatpush1.msra.mxu0 %v2699_v61  ;;  %3705 = vst [vmem:[#allocation40_spill] sm:$0xff] %v2725_v60  ;;  %v2729_v0 = vld [vmem:[#allocation5 + $0x10] sm:$0xff] }
  0x32   :  { %425 = vmatpush1.msra.mxu1 %v2703_v62  ;;  %355 = vmatprep.subr.mxu0 %v2705_v63  ;;  %3706 = vst [vmem:[#allocation41_spill] sm:$0xff] %v2729_v0  ;;  %v325_v63 = vld [vmem:[#allocation3] sm:$0x3]  ;;  %v3707_v62 = vmov 0.0  }
  0x33   :  { %2148 = vmatmul.mubr.msk.f32.gmra.mxu1 %vm136_vm1, %v107_v58  ;;  %426 = vmatprep.subr.mxu1 %v2709_v1  ;;  %v3708_v58 = vld [vmem:[#allocation31_spill] sm:$0xff] }
  0x34   :  { %356 = vmatpush1.msra.mxu0 %v2713_v2  ;;  %427 = vmatpush1.msra.mxu1 %v2715_v3 }
  0x35   :  { %357 = vmatprep.subr.mxu0 %v2719_v4  ;;  %428 = vmatprep.subr.mxu1 %v2721_v5 }
  0x36   :  { %358 = vmatpush1.msra.mxu0 %v2725_v60  ;;  %391 = vmatprep.mubr.f32.mxu0 %v3707_v62 }
  0x37   :  { %429 = vmatpush1.msra.mxu1 %v2729_v0  ;;  %462 = vmatprep.mubr.f32.mxu1 %v3707_v62 }
  0x38   :  { %392 = vmatmul.mubr.f32.vlgmr.msra.gmra.mxu0 %v325_v63  ;;  %463 = vmatmul.mubr.f32.vlgmr.msra.gmra.mxu1 %v325_v63  ;;  %v3709_v63 = vld [vmem:[#allocation33_spill] sm:$0xff] }
  0x39   :  { %539 = vmatprep.subr.mxu0 %v2530_v6  ;;  %610 = vmatprep.subr.mxu1 %v2534_v7 }
  0x3a   :  { %540 = vmatpush1.msra.mxu0 %v2538_v8  ;;  %611 = vmatpush1.msra.mxu1 %v2540_v9 }
  0x3b   :  { %541 = vmatprep.subr.mxu0 %v2544_v10  ;;  %612 = vmatprep.subr.mxu1 %v2546_v11 }
  0x3c   :  { %542 = vmatpush1.msra.mxu0 %v2550_v12  ;;  %613 = vmatpush1.msra.mxu1 %v2552_v13 }
  0x3d   :  { %543 = vmatprep.subr.mxu0 %v2556_v14  ;;  %614 = vmatprep.subr.mxu1 %v2558_v15 }
  0x3e   :  { %544 = vmatpush1.msra.mxu0 %v2562_v16  ;;  %615 = vmatpush1.msra.mxu1 %v2564_v17 }
  0x3f   :  { %545 = vmatprep.subr.mxu0 %v2568_v18  ;;  %616 = vmatprep.subr.mxu1 %v2570_v19 }
  0x40   :  { %546 = vmatpush1.msra.mxu0 %v2574_v20  ;;  %617 = vmatpush1.msra.mxu1 %v2576_v21 }
  0x41   :  { %547 = vmatprep.subr.mxu0 %v2580_v22  ;;  %618 = vmatprep.subr.mxu1 %v2582_v23 }
  0x42   :  { %548 = vmatpush1.msra.mxu0 %v2586_v24  ;;  %619 = vmatpush1.msra.mxu1 %v2588_v25 }
  0x43   :  { %549 = vmatprep.subr.mxu0 %v2592_v26  ;;  %620 = vmatprep.subr.mxu1 %v2594_v27 }
  0x44   :  { %550 = vmatpush1.msra.mxu0 %v2598_v28  ;;  %621 = vmatpush1.msra.mxu1 %v2600_v29 }
  0x45   :  { %551 = vmatprep.subr.mxu0 %v2604_v30  ;;  %622 = vmatprep.subr.mxu1 %v2606_v31 }
  0x46   :  { %552 = vmatpush1.msra.mxu0 %v2610_v32  ;;  %623 = vmatpush1.msra.mxu1 %v2612_v33 }
  0x47   :  { %553 = vmatprep.subr.mxu0 %v2616_v34  ;;  %624 = vmatprep.subr.mxu1 %v2618_v35 }
  0x48   :  { %554 = vmatpush1.msra.mxu0 %v2622_v36  ;;  %625 = vmatpush1.msra.mxu1 %v2624_v37 }
  0x49   :  { %555 = vmatprep.subr.mxu0 %v2628_v38  ;;  %626 = vmatprep.subr.mxu1 %v2630_v39 }
  0x4a   :  { %556 = vmatpush1.msra.mxu0 %v2634_v40  ;;  %627 = vmatpush1.msra.mxu1 %v2636_v41 }
  0x4b   :  { %557 = vmatprep.subr.mxu0 %v2640_v42  ;;  %628 = vmatprep.subr.mxu1 %v2642_v43 }
  0x4c   :  { %558 = vmatpush1.msra.mxu0 %v2646_v44  ;;  %629 = vmatpush1.msra.mxu1 %v2648_v45 }
  0x4d   :  { %559 = vmatprep.subr.mxu0 %v2652_v46  ;;  %630 = vmatprep.subr.mxu1 %v2654_v47 }
  0x4e   :  { %560 = vmatpush1.msra.mxu0 %v2658_v48  ;;  %631 = vmatpush1.msra.mxu1 %v2660_v49 }
  0x4f   :  { %561 = vmatprep.subr.mxu0 %v2664_v50  ;;  %632 = vmatprep.subr.mxu1 %v2666_v51  ;;  %v3710_v51 = vld [vmem:[#allocation34_spill] sm:$0xff] }
  0x50   :  { %562 = vmatpush1.msra.mxu0 %v2670_v52  ;;  %633 = vmatpush1.msra.mxu1 %v2672_v53 }
  0x51   :  { %563 = vmatprep.subr.mxu0 %v2676_v54  ;;  %634 = vmatprep.subr.mxu1 %v2678_v55 }
  0x52   :  { %564 = vmatpush1.msra.mxu0 %v2682_v56  ;;  %635 = vmatpush1.msra.mxu1 %v2686_v57 }
  0x53   :  { %565 = vmatprep.subr.mxu0 %v2693_v59  ;;  %636 = vmatprep.subr.mxu1 %v3708_v58 }
  0x54   :  { %566 = vmatpush1.msra.mxu0 %v2699_v61  ;;  %637 = vmatpush1.msra.mxu1 %v3709_v63 }
  0x55   :  { %567 = vmatprep.subr.mxu0 %v3710_v51  ;;  %638 = vmatprep.subr.mxu1 %v2709_v1  ;;  %v112_v1 = vlaneseq }
  0x56   :  { %568 = vmatpush1.msra.mxu0 %v2713_v2  ;;  %639 = vmatpush1.msra.mxu1 %v2715_v3 }
  0x57   :  { %569 = vmatprep.subr.mxu0 %v2719_v4  ;;  %640 = vmatprep.subr.mxu1 %v2721_v5  ;;  %v113_v2 = vshrl.u32 %v112_v1, 7  ;;  %v110_v5 = vld [vmem:[%s3533_s3] sm:$0xf]  ;;  %s2474_s3 = smov [#allocation8]  }
  0x58   :  { %570 = vmatpush1.msra.mxu0 %v2725_v60  ;;  %603 = vmatprep.mubr.f32.mxu0 %v3707_v62  ;;  %s2102_s11 = sshll.u32 %s2474_s3, 4  ;;  %s2103_s11 = int_to_ptr.vmem [resolvable:$true] %s2102_s11 }
  0x59   :  { %641 = vmatpush1.msra.mxu1 %v2729_v0  ;;  %674 = vmatprep.mubr.f32.mxu1 %v3707_v62  ;;  %v114_v3 = vsub.s32 0, %v113_v2  ;;  %v118_v4 = vsub.s32 1, %v113_v2  ;;  %v122_v59 = vsub.s32 2, %v113_v2  ;;  %s2404_s12 = scalar_lea.vmem %s2103_s11, 256  ;;  %p2409_p6 = scmp.lt.s32.totalorder %s2103_s11, %s2103_s11 }
  0x5a   :  { %752 = vmatprep.subr.mxu0 %v2530_v6  ;;  %823 = vmatprep.subr.mxu1 %v2534_v7  ;;  %p2405_p5 = scmp.ne.s32.totalorder %s2103_s11, %s2404_s12  ;;  %p2410_p7 = scmp.lt.s32.totalorder %s2404_s12, %s2404_s12 }
  0x5b   :  { %v115_v58 = vrot.slane %v110_v5, %v114_v3  ;;  %v119_v57 = vrot.slane %v110_v5, %v118_v4  ;;  %v123_v1 = vrot.slane %v110_v5, %v122_v59  ;;  %v126_v59 = vsub.s32 3, %v113_v2 }
  0x5c   :  { %p2411_p8 = por %p2410_p7, %p2409_p6 }
  0x5e   :  { %p2412_p9 = pnand %p2411_p8, %p2405_p5 }
  0xd4   :  { %v218_v51 = vpop.f32.mrf.mxu0 }
  0xd5   :  { %v295_v63 = vpop.f32.mrf.mxu1  ;;  %v2808_v56 = vadd.f32 %v218_v51, %v115_v58 }
  0xd6   :  { %v220_v60 = vpop.f32.mrf.mxu0  ;;  %v2819_v46 = vadd.f32 %v295_v63, %v123_v1 }
  0xd7   :  { %v297_v0 = vpop.f32.mrf.mxu1  ;;  %3711 = vst [vmem:[#allocation42_spill] sm:$0xff] %v2808_v56  ;;  %v2813_v50 = vadd.f32 %v220_v60, %v119_v57 }
  0xd8   :  { %3715 = vst [vmem:[#allocation46_spill] sm:$0xff] %v2819_v46 }
  0xd9   :  { %3713 = vst [vmem:[#allocation44_spill] sm:$0xff] %v2813_v50 }
  0xef   :  { %v224_v61 = vpop.f32.mrf.mxu0 }
  0xf0   :  { %v2810_v55 = vadd.f32 %v224_v61, %v115_v58 }
  0xf1   :  { %v226_v6 = vpop.f32.mrf.mxu0 }
  0xf2   :  { %3712 = vst [vmem:[#allocation43_spill] sm:$0xff] %v2810_v55  ;;  %v2816_v47 = vadd.f32 %v226_v6, %v119_v57 }
  0xf3   :  { %v301_v62 = vpop.f32.mrf.mxu1 }
  0xf4   :  { %3714 = vst [vmem:[#allocation45_spill] sm:$0xff] %v2816_v47  ;;  %v2821_v45 = vadd.f32 %v301_v62, %v123_v1 }
  0xf5   :  { %v303_v54 = vpop.f32.mrf.mxu1 }
  0xf6   :  { %3716 = vst [vmem:[#allocation47_spill] sm:$0xff] %v2821_v45 }
  0xf8   :  { %v393_v7 = vpop.f32.mrf.mxu0  ;;  %v464_v58 = vpop.f32.mrf.mxu1 }
  0xf9   :  { %v473_v53 = vrot.slane %v393_v7, 1  ;;  %v485_v52 = vadd.f32 %v393_v7, %v2808_v56  ;;  %v475_v7 = vrot.slane %v464_v58, 1 }
  0xfa   :  { %v395_v49 = vpop.f32.mrf.mxu0  ;;  %v466_v57 = vpop.f32.mrf.mxu1 }
  0xfb   :  { %v489_v3 = vadd.f32 %v473_v53, %v2810_v55  ;;  %v493_v48 = vmul.f32 0.5, %v485_v52  ;;  %v474_v4 = vrot.slane %v395_v49, 1  ;;  %v486_v51 = vadd.f32 %v395_v49, %v2813_v50 }
  0xfc   :  { %v487_v52 = vadd.f32 %v464_v58, %v2819_v46  ;;  %v127_v53 = vrot.slane %v110_v5, %v126_v59  ;;  %v491_v49 = vadd.f32 %v475_v7, %v2821_v45 }
  0xfd   :  { %v494_v61 = vmul.f32 0.5, %v489_v3  ;;  %2160 = vtanh.f32 %v493_v48  ;;  %v490_v60 = vadd.f32 %v474_v4, %v2816_v47  ;;  %v501_v56 = vmul.f32 0.5, %v486_v51 }
  0xfe   :  { %v2826_v2 = vadd.f32 %v303_v54, %v127_v53  ;;  %v476_v48 = vrot.slane %v466_v57, 1  ;;  %v2828_v62 = vadd.f32 %v297_v0, %v127_v53 }
  0xff   :  { %2162 = vtanh.f32 %v494_v61  ;;  %v502_v6 = vmul.f32 0.5, %v490_v60 }
 0x100   :  { %2164 = vtanh.f32 %v501_v56  ;;  %3717 = vst [vmem:[#allocation48_spill] sm:$0xff] %v2826_v2  ;;  %3718 = vst [vmem:[#allocation49_spill] sm:$0xff] %v2828_v62  ;;  %v492_v63 = vadd.f32 %v476_v48, %v2826_v2  ;;  %v488_v3 = vadd.f32 %v466_v57, %v2828_v62  ;;  %v326_v56 = vld [vmem:[#allocation4] sm:$0x3] }
 0x101   :  { %2166 = vtanh.f32 %v502_v6 }
 0x102   :  { %2168 = vtanh.f32 %v487_v52  ;;  %v512_v5 = vmul.f32 0.5, %v492_v63  ;;  %v511_v54 = vmul.f32 0.5, %v488_v3  ;;  %v520_v52 = vrot.slane %v326_v56, 1 }
 0x103   :  { %2170 = vtanh.f32 %v491_v49 }
 0x104   :  { %2172 = vtanh.f32 %v512_v5 }
 0x105   :  { %2174 = vtanh.f32 %v511_v54 }
 0x10a   :  { %v2161_v1 = vpop.eup %2160 }
 0x10b   :  { %v497_v4 = vadd.f32 1.0, %v2161_v1 }
 0x10c   :  { %v2163_v51 = vpop.eup %2162 }
 0x10d   :  { %v2165_v59 = vpop.eup %2164  ;;  %v498_v61 = vadd.f32 1.0, %v2163_v51  ;;  %v499_v58 = vmul.f32 0.5, %v497_v4 }
 0x10e   :  { %v505_v7 = vadd.f32 1.0, %v2165_v59  ;;  %v2167_v60 = vpop.eup %2166 }
 0x10f   :  { %v500_v6 = vmul.f32 0.5, %v498_v61  ;;  %v506_v49 = vadd.f32 1.0, %v2167_v60  ;;  %v2169_v53 = vpop.eup %2168 }
 0x110   :  { %v507_v0 = vmul.f32 0.5, %v505_v7  ;;  %v525_v46 = vmul.f32 %v2169_v53, %v499_v58  ;;  %v2171_v57 = vpop.eup %2170  ;;  %v3726_v53 = vld [vmem:[#allocation22_spill] sm:$0xff] }
 0x111   :  { %v508_v48 = vmul.f32 0.5, %v506_v49  ;;  %v526_v62 = vmul.f32 %v2171_v57, %v500_v6  ;;  %v2173_v3 = vpop.eup %2172  ;;  %v3723_v6 = vld [vmem:[#allocation19_spill] sm:$0xff]  ;;  %v3724_v49 = vld [vmem:[#allocation20_spill] sm:$0xff] }
 0x112   :  { %v523_v2 = vmul.f32 %v507_v0, %v326_v56  ;;  %v2175_v4 = vpop.eup %2174  ;;  %v516_v59 = vadd.f32 1.0, %v2173_v3  ;;  %v3725_v0 = vld [vmem:[#allocation21_spill] sm:$0xff]  ;;  %v3728_v57 = vld [vmem:[#allocation24_spill] sm:$0xff]  ;;  %v3730_v3 = vld [vmem:[#allocation26_spill] sm:$0xff] }
 0x113   :  { %v524_v1 = vmul.f32 %v520_v52, %v508_v48  ;;  %v515_v5 = vadd.f32 1.0, %v2175_v4  ;;  %v3722_v52 = vld [vmem:[#allocation18_spill] sm:$0xff]  ;;  %v3727_v48 = vld [vmem:[#allocation23_spill] sm:$0xff] }
 0x114   :  { %v2832_v63 = vadd.f32 %v525_v46, %v523_v2  ;;  %v518_v7 = vmul.f32 0.5, %v516_v59  ;;  %v3731_v4 = vld [vmem:[#allocation27_spill] sm:$0xff]  ;;  %v3732_v59 = vld [vmem:[#allocation28_spill] sm:$0xff] }
 0x115   :  { %v2834_v51 = vadd.f32 %v526_v62, %v524_v1  ;;  %v517_v58 = vmul.f32 0.5, %v515_v5  ;;  %v3721_v62 = vld [vmem:[#allocation17_spill] sm:$0xff] }
 0x116   :  { %2176 = vtanh.f32 %v2832_v63  ;;  %v3729_v1 = vld [vmem:[#allocation25_spill] sm:$0xff] }
 0x117   :  { %2178 = vtanh.f32 %v2834_v51  ;;  %v3733_v5 = vld [vmem:[#allocation29_spill] sm:$0xff] }
 0x123   :  { %v2177_v61 = vpop.eup %2176 }
 0x124   :  { %v2179_v56 = vpop.eup %2178  ;;  %v2840_v60 = vmul.f32 %v2177_v61, %v517_v58  ;;  %v3734_v61 = vld [vmem:[#allocation30_spill] sm:$0xff]  ;;  %v3737_v58 = vld [vmem:[#allocation33_spill] sm:$0xff] }
 0x125   :  { %v2838_v54 = vmul.f32 %v2179_v56, %v518_v7  ;;  %v3735_v7 = vld [vmem:[#allocation31_spill] sm:$0xff]  ;;  %v3736_v56 = vld [vmem:[#allocation32_spill] sm:$0xff] }
 0x126   :  { %3720 = vst [vmem:[#allocation51_spill] sm:$0xff] %v2840_v60 }
 0x127   :  { %3719 = vst [vmem:[#allocation50_spill] sm:$0xff] %v2838_v54  ;;  %v535_v46 = vrot.slane %v2838_v54, 7  ;;  %v3740_v54 = vld [vmem:[#allocation36_spill] sm:$0xff] }
 0x129   :  { %v537_v2 = vsel %vm536_vm2, %v535_v46, %v2840_v60  ;;  %v3738_v46 = vld [vmem:[#allocation34_spill] sm:$0xff]  ;;  %v3741_v60 = vld [vmem:[#allocation37_spill] sm:$0xff] }
 0x12a   :  { %604 = vmatmul.mubr.f32.vlgmr.msra.gmra.mxu0 %v537_v2  ;;  %675 = vmatmul.mubr.f32.vlgmr.msra.gmra.mxu1 %v537_v2  ;;  %v3739_v2 = vld [vmem:[#allocation35_spill] sm:$0xff] }
 0x12b   :  { %753 = vmatpush1.msra.mxu0 %v2538_v8  ;;  %824 = vmatpush1.msra.mxu1 %v2540_v9 }
 0x12c   :  { %754 = vmatprep.subr.mxu0 %v2544_v10  ;;  %825 = vmatprep.subr.mxu1 %v2546_v11 }
 0x12d   :  { %755 = vmatpush1.msra.mxu0 %v2550_v12  ;;  %826 = vmatpush1.msra.mxu1 %v2552_v13 }
 0x12e   :  { %756 = vmatprep.subr.mxu0 %v2556_v14  ;;  %827 = vmatprep.subr.mxu1 %v2558_v15 }
 0x12f   :  { %757 = vmatpush1.msra.mxu0 %v2562_v16  ;;  %828 = vmatpush1.msra.mxu1 %v2564_v17 }
 0x130   :  { %758 = vmatprep.subr.mxu0 %v2568_v18  ;;  %829 = vmatprep.subr.mxu1 %v2570_v19 }
 0x131   :  { %759 = vmatpush1.msra.mxu0 %v2574_v20  ;;  %830 = vmatpush1.msra.mxu1 %v2576_v21 }
 0x132   :  { %760 = vmatprep.subr.mxu0 %v2580_v22  ;;  %831 = vmatprep.subr.mxu1 %v2582_v23 }
 0x133   :  { %761 = vmatpush1.msra.mxu0 %v2586_v24  ;;  %832 = vmatpush1.msra.mxu1 %v2588_v25 }
 0x134   :  { %762 = vmatprep.subr.mxu0 %v2592_v26  ;;  %833 = vmatprep.subr.mxu1 %v2594_v27 }
 0x135   :  { %763 = vmatpush1.msra.mxu0 %v2598_v28  ;;  %834 = vmatpush1.msra.mxu1 %v2600_v29 }
 0x136   :  { %764 = vmatprep.subr.mxu0 %v2604_v30  ;;  %835 = vmatprep.subr.mxu1 %v2606_v31 }
 0x137   :  { %765 = vmatpush1.msra.mxu0 %v2610_v32  ;;  %836 = vmatpush1.msra.mxu1 %v2612_v33 }
 0x138   :  { %766 = vmatprep.subr.mxu0 %v2616_v34  ;;  %837 = vmatprep.subr.mxu1 %v2618_v35 }
 0x139   :  { %767 = vmatpush1.msra.mxu0 %v2622_v36  ;;  %838 = vmatpush1.msra.mxu1 %v2624_v37 }
 0x13a   :  { %768 = vmatprep.subr.mxu0 %v2628_v38  ;;  %839 = vmatprep.subr.mxu1 %v2630_v39 }
 0x13b   :  { %769 = vmatpush1.msra.mxu0 %v2634_v40  ;;  %840 = vmatpush1.msra.mxu1 %v2636_v41 }
 0x13c   :  { %770 = vmatprep.subr.mxu0 %v2640_v42  ;;  %841 = vmatprep.subr.mxu1 %v2642_v43 }
 0x13d   :  { %771 = vmatpush1.msra.mxu0 %v2646_v44  ;;  %842 = vmatpush1.msra.mxu1 %v3721_v62 }
 0x13e   :  { %772 = vmatprep.subr.mxu0 %v3722_v52  ;;  %843 = vmatprep.subr.mxu1 %v3723_v6 }
 0x13f   :  { %773 = vmatpush1.msra.mxu0 %v3724_v49  ;;  %844 = vmatpush1.msra.mxu1 %v3725_v0 }
 0x140   :  { %774 = vmatprep.subr.mxu0 %v3726_v53  ;;  %845 = vmatprep.subr.mxu1 %v3727_v48 }
 0x141   :  { %775 = vmatpush1.msra.mxu0 %v3728_v57  ;;  %846 = vmatpush1.msra.mxu1 %v3729_v1 }
 0x142   :  { %776 = vmatprep.subr.mxu0 %v3730_v3  ;;  %847 = vmatprep.subr.mxu1 %v3731_v4  ;;  %v3742_v4 = vld [vmem:[#allocation38_spill] sm:$0xff] }
 0x143   :  { %777 = vmatpush1.msra.mxu0 %v3732_v59  ;;  %848 = vmatpush1.msra.mxu1 %v3733_v5  ;;  %v3743_v59 = vld [vmem:[#allocation39_spill] sm:$0xff]  ;;  %v3744_v5 = vld [vmem:[#allocation40_spill] sm:$0xff] }
 0x144   :  { %778 = vmatprep.subr.mxu0 %v3734_v61  ;;  %849 = vmatprep.subr.mxu1 %v3735_v7  ;;  %v3745_v61 = vmov 0.0   ;;  %v3746_v7 = vld [vmem:[#allocation41_spill] sm:$0xff] }
 0x145   :  { %779 = vmatpush1.msra.mxu0 %v3736_v56  ;;  %850 = vmatpush1.msra.mxu1 %v3737_v58  ;;  %v3747_v58 = vld [vmem:[#allocation15_spill] sm:$0xff] }
 0x146   :  { %780 = vmatprep.subr.mxu0 %v3738_v46  ;;  %851 = vmatprep.subr.mxu1 %v3739_v2  ;;  %v3748_v46 = vld [vmem:[#allocation16_spill] sm:$0xff] }
 0x147   :  { %781 = vmatpush1.msra.mxu0 %v3740_v54  ;;  %852 = vmatpush1.msra.mxu1 %v3741_v60 }
 0x148   :  { %782 = vmatprep.subr.mxu0 %v3742_v4  ;;  %853 = vmatprep.subr.mxu1 %v3743_v59  ;;  %v3749_v4 = vld [vmem:[#allocation42_spill] sm:$0xff] }
 0x149   :  { %783 = vmatpush1.msra.mxu0 %v3744_v5  ;;  %816 = vmatprep.mubr.f32.mxu0 %v3745_v61 }
 0x14a   :  { %854 = vmatpush1.msra.mxu1 %v3746_v7  ;;  %887 = vmatprep.mubr.f32.mxu1 %v3745_v61 }
 0x14b   :  { %970 = vmatprep.subr.mxu0 %v3747_v58  ;;  %1041 = vmatprep.subr.mxu1 %v3748_v46 }
 0x1ea   :  { %v605_v2 = vpop.f32.mrf.mxu0  ;;  %v676_v1 = vpop.f32.mrf.mxu1 }
 0x1eb   :  { %v685_v54 = vrot.slane %v605_v2, 7  ;;  %v701_v60 = vadd.f32 %v605_v2, %v2810_v55  ;;  %v687_v7 = vrot.slane %v676_v1, 7  ;;  %v703_v46 = vadd.f32 %v676_v1, %v2821_v45  ;;  %v3750_v55 = vld [vmem:[#allocation46_spill] sm:$0xff] }
 0x1ec   :  { %v607_v56 = vpop.f32.mrf.mxu0  ;;  %v678_v2 = vpop.f32.mrf.mxu1 }
 0x1ed   :  { %v697_v3 = vadd.f32 %v685_v54, %v3749_v4  ;;  %v706_v59 = vmul.f32 0.5, %v701_v60  ;;  %v686_v5 = vrot.slane %v607_v56, 7  ;;  %v702_v57 = vadd.f32 %v607_v56, %v2816_v47  ;;  %v3751_v60 = vld [vmem:[#allocation49_spill] sm:$0xff] }
 0x1ee   :  { %v699_v0 = vadd.f32 %v687_v7, %v3750_v55  ;;  %v688_v54 = vrot.slane %v678_v2, 7  ;;  %v734_v7 = vrot.slane %v2834_v51, 7 }
 0x1ef   :  { %v705_v48 = vmul.f32 0.5, %v697_v3  ;;  %2180 = vtanh.f32 %v706_v59  ;;  %v698_v61 = vadd.f32 %v686_v5, %v2813_v50  ;;  %v714_v58 = vmul.f32 0.5, %v702_v57  ;;  %v3752_v59 = vld [vmem:[#allocation48_spill] sm:$0xff] }
 0x1f0   :  { %v700_v56 = vadd.f32 %v688_v54, %v3751_v60  ;;  %v704_v47 = vadd.f32 %v678_v2, %v3752_v59  ;;  %v733_v54 = vrot.slane %v2832_v63, 7 }
 0x1f1   :  { %2182 = vtanh.f32 %v705_v48  ;;  %v713_v53 = vmul.f32 0.5, %v698_v61 }
 0x1f2   :  { %2184 = vtanh.f32 %v714_v58  ;;  %v723_v57 = vmul.f32 0.5, %v700_v56  ;;  %v724_v58 = vmul.f32 0.5, %v704_v47 }
 0x1f3   :  { %2186 = vtanh.f32 %v713_v53 }
 0x1f4   :  { %2188 = vtanh.f32 %v703_v46 }
 0x1f5   :  { %2190 = vtanh.f32 %v699_v0 }
 0x1f6   :  { %2192 = vtanh.f32 %v723_v57 }
 0x1f7   :  { %2194 = vtanh.f32 %v724_v58 }
 0x1fc   :  { %v2181_v3 = vpop.eup %2180 }
 0x1fd   :  { %v710_v4 = vadd.f32 1.0, %v2181_v3 }
 0x1fe   :  { %v2183_v5 = vpop.eup %2182 }
 0x1ff   :  { %v2185_v48 = vpop.eup %2184  ;;  %v709_v50 = vadd.f32 1.0, %v2183_v5  ;;  %v712_v1 = vmul.f32 0.5, %v710_v4 }
 0x200   :  { %v718_v61 = vadd.f32 1.0, %v2185_v48  ;;  %v2187_v45 = vpop.eup %2186 }
 0x201   :  { %v711_v53 = vmul.f32 0.5, %v709_v50  ;;  %v717_v46 = vadd.f32 1.0, %v2187_v45  ;;  %v2189_v0 = vpop.eup %2188 }
 0x202   :  { %v720_v55 = vmul.f32 0.5, %v718_v61  ;;  %v740_v3 = vmul.f32 %v2189_v0, %v712_v1  ;;  %v2191_v56 = vpop.eup %2190 }
 0x203   :  { %v719_v60 = vmul.f32 0.5, %v717_v46  ;;  %v739_v5 = vmul.f32 %v2191_v56, %v711_v53  ;;  %v2193_v45 = vpop.eup %2192  ;;  %v3782_v56 = vld [vmem:[#allocation47_spill] sm:$0xff] }
 0x204   :  { %v738_v2 = vmul.f32 %v734_v7, %v720_v55  ;;  %v2195_v50 = vpop.eup %2194  ;;  %v727_v51 = vadd.f32 1.0, %v2193_v45 }
 0x205   :  { %v737_v59 = vmul.f32 %v733_v54, %v719_v60  ;;  %v728_v57 = vadd.f32 1.0, %v2195_v50 }
 0x206   :  { %v2921_v4 = vadd.f32 %v740_v3, %v738_v2  ;;  %v729_v48 = vmul.f32 0.5, %v727_v51  ;;  %v3781_v2 = vld [vmem:[#allocation46_spill] sm:$0xff]  ;;  %v3783_v51 = vld [vmem:[#allocation49_spill] sm:$0xff] }
 0x207   :  { %v2923_v47 = vadd.f32 %v739_v5, %v737_v59  ;;  %v730_v1 = vmul.f32 0.5, %v728_v57 }
 0x208   :  { %2196 = vtanh.f32 %v2921_v4 }
 0x209   :  { %2198 = vtanh.f32 %v2923_v47 }
 0x215   :  { %v2197_v63 = vpop.eup %2196 }
 0x216   :  { %v2199_v55 = vpop.eup %2198  ;;  %v2929_v60 = vmul.f32 %v2197_v63, %v730_v1  ;;  %v3784_v63 = vld [vmem:[#allocation48_spill] sm:$0xff] }
 0x217   :  { %v2927_v61 = vmul.f32 %v2199_v55, %v729_v48 }
 0x219   :  { %v749_v58 = vrot.slane %v2927_v61, 1 }
 0x21b   :  { %v750_v59 = vsel %vm536_vm2, %v2929_v60, %v749_v58 }
 0x21c   :  { %817 = vmatmul.mubr.f32.vlgmr.msra.gmra.mxu0 %v750_v59  ;;  %888 = vmatmul.mubr.f32.vlgmr.msra.gmra.mxu1 %v750_v59 }
 0x21d   :  { %971 = vmatpush1.msra.mxu0 %v2538_v8  ;;  %1042 = vmatpush1.msra.mxu1 %v2540_v9  ;;  %v3753_v8 = vld [vmem:[#allocation21_spill] sm:$0xff]  ;;  %v3754_v9 = vld [vmem:[#allocation22_spill] sm:$0xff] }
 0x21e   :  { %972 = vmatprep.subr.mxu0 %v2544_v10  ;;  %1043 = vmatprep.subr.mxu1 %v2546_v11  ;;  %v3755_v10 = vld [vmem:[#allocation23_spill] sm:$0xff]  ;;  %v3756_v11 = vld [vmem:[#allocation24_spill] sm:$0xff] }
 0x21f   :  { %973 = vmatpush1.msra.mxu0 %v2550_v12  ;;  %1044 = vmatpush1.msra.mxu1 %v2552_v13  ;;  %v3757_v12 = vld [vmem:[#allocation25_spill] sm:$0xff]  ;;  %v3758_v13 = vld [vmem:[#allocation26_spill] sm:$0xff] }
 0x220   :  { %974 = vmatprep.subr.mxu0 %v2556_v14  ;;  %1045 = vmatprep.subr.mxu1 %v2558_v15  ;;  %v3759_v14 = vld [vmem:[#allocation27_spill] sm:$0xff]  ;;  %v3760_v15 = vld [vmem:[#allocation28_spill] sm:$0xff] }
 0x221   :  { %975 = vmatpush1.msra.mxu0 %v2562_v16  ;;  %1046 = vmatpush1.msra.mxu1 %v2564_v17  ;;  %v3761_v16 = vld [vmem:[#allocation29_spill] sm:$0xff]  ;;  %v3762_v17 = vld [vmem:[#allocation30_spill] sm:$0xff] }
 0x222   :  { %976 = vmatprep.subr.mxu0 %v2568_v18  ;;  %1047 = vmatprep.subr.mxu1 %v2570_v19  ;;  %v3763_v18 = vld [vmem:[#allocation31_spill] sm:$0xff]  ;;  %v3764_v19 = vld [vmem:[#allocation32_spill] sm:$0xff] }
 0x223   :  { %977 = vmatpush1.msra.mxu0 %v2574_v20  ;;  %1048 = vmatpush1.msra.mxu1 %v2576_v21  ;;  %v3765_v20 = vld [vmem:[#allocation33_spill] sm:$0xff]  ;;  %v3766_v21 = vld [vmem:[#allocation34_spill] sm:$0xff] }
 0x224   :  { %978 = vmatprep.subr.mxu0 %v2580_v22  ;;  %1049 = vmatprep.subr.mxu1 %v2582_v23  ;;  %v3767_v22 = vld [vmem:[#allocation35_spill] sm:$0xff]  ;;  %v3768_v23 = vld [vmem:[#allocation36_spill] sm:$0xff] }
 0x225   :  { %979 = vmatpush1.msra.mxu0 %v2586_v24  ;;  %1050 = vmatpush1.msra.mxu1 %v2588_v25  ;;  %v3769_v24 = vld [vmem:[#allocation37_spill] sm:$0xff]  ;;  %v3770_v25 = vld [vmem:[#allocation38_spill] sm:$0xff] }
 0x226   :  { %980 = vmatprep.subr.mxu0 %v2592_v26  ;;  %1051 = vmatprep.subr.mxu1 %v2594_v27  ;;  %v3771_v26 = vld [vmem:[#allocation39_spill] sm:$0xff]  ;;  %v3772_v27 = vld [vmem:[#allocation40_spill] sm:$0xff] }
 0x227   :  { %981 = vmatpush1.msra.mxu0 %v2598_v28  ;;  %1052 = vmatpush1.msra.mxu1 %v2600_v29  ;;  %v3773_v28 = vmov 0.0   ;;  %v3774_v29 = vld [vmem:[#allocation41_spill] sm:$0xff] }
 0x228   :  { %982 = vmatprep.subr.mxu0 %v2604_v30  ;;  %1053 = vmatprep.subr.mxu1 %v2606_v31  ;;  %v3775_v30 = vld [vmem:[#allocation15_spill] sm:$0xff]  ;;  %v3776_v31 = vld [vmem:[#allocation16_spill] sm:$0xff] }
 0x229   :  { %983 = vmatpush1.msra.mxu0 %v2610_v32  ;;  %1054 = vmatpush1.msra.mxu1 %v2612_v33 }
 0x22a   :  { %984 = vmatprep.subr.mxu0 %v2616_v34  ;;  %1055 = vmatprep.subr.mxu1 %v2618_v35 }
 0x22b   :  { %985 = vmatpush1.msra.mxu0 %v2622_v36  ;;  %1056 = vmatpush1.msra.mxu1 %v2624_v37  ;;  %v3777_v36 = vld [vmem:[#allocation42_spill] sm:$0xff] }
 0x22c   :  { %986 = vmatprep.subr.mxu0 %v2628_v38  ;;  %1057 = vmatprep.subr.mxu1 %v2630_v39  ;;  %v3778_v38 = vld [vmem:[#allocation43_spill] sm:$0xff] }
 0x22d   :  { %987 = vmatpush1.msra.mxu0 %v2634_v40  ;;  %1058 = vmatpush1.msra.mxu1 %v2636_v41 }
 0x22e   :  { %988 = vmatprep.subr.mxu0 %v2640_v42  ;;  %1059 = vmatprep.subr.mxu1 %v2642_v43 }
 0x22f   :  { %989 = vmatpush1.msra.mxu0 %v2646_v44  ;;  %1060 = vmatpush1.msra.mxu1 %v3721_v62 }
 0x230   :  { %990 = vmatprep.subr.mxu0 %v3722_v52  ;;  %1061 = vmatprep.subr.mxu1 %v3723_v6  ;;  %v3779_v52 = vld [vmem:[#allocation44_spill] sm:$0xff] }
 0x231   :  { %991 = vmatpush1.msra.mxu0 %v3724_v49  ;;  %1062 = vmatpush1.msra.mxu1 %v3753_v8  ;;  %v3780_v49 = vld [vmem:[#allocation45_spill] sm:$0xff] }
 0x232   :  { %992 = vmatprep.subr.mxu0 %v3754_v9  ;;  %1063 = vmatprep.subr.mxu1 %v3755_v10 }
 0x233   :  { %993 = vmatpush1.msra.mxu0 %v3756_v11  ;;  %1064 = vmatpush1.msra.mxu1 %v3757_v12 }
 0x234   :  { %994 = vmatprep.subr.mxu0 %v3758_v13  ;;  %1065 = vmatprep.subr.mxu1 %v3759_v14 }
 0x235   :  { %995 = vmatpush1.msra.mxu0 %v3760_v15  ;;  %1066 = vmatpush1.msra.mxu1 %v3761_v16 }
 0x236   :  { %996 = vmatprep.subr.mxu0 %v3762_v17  ;;  %1067 = vmatprep.subr.mxu1 %v3763_v18  ;;  %v950_v17 = vrot.slane %v2923_v47, 7 }
 0x237   :  { %997 = vmatpush1.msra.mxu0 %v3764_v19  ;;  %1068 = vmatpush1.msra.mxu1 %v3765_v20  ;;  %v951_v20 = vrot.slane %v2921_v4, 7 }
 0x238   :  { %998 = vmatprep.subr.mxu0 %v3766_v21  ;;  %1069 = vmatprep.subr.mxu1 %v3767_v22 }
 0x239   :  { %999 = vmatpush1.msra.mxu0 %v3768_v23  ;;  %1070 = vmatpush1.msra.mxu1 %v3769_v24 }
 0x23a   :  { %1000 = vmatprep.subr.mxu0 %v3770_v25  ;;  %1071 = vmatprep.subr.mxu1 %v3771_v26 }
 0x23b   :  { %1001 = vmatpush1.msra.mxu0 %v3772_v27  ;;  %1034 = vmatprep.mubr.f32.mxu0 %v3773_v28 }
 0x23c   :  { %1072 = vmatpush1.msra.mxu1 %v3774_v29  ;;  %1105 = vmatprep.mubr.f32.mxu1 %v3773_v28 }
 0x23d   :  { %1188 = vmatprep.subr.mxu0 %v3775_v30  ;;  %1259 = vmatprep.subr.mxu1 %v3776_v31 }
 0x2dc   :  { %v818_v32 = vpop.f32.mrf.mxu0  ;;  %v889_v40 = vpop.f32.mrf.mxu1 }
 0x2dd   :  { %v898_v33 = vrot.slane %v818_v32, 6  ;;  %v902_v34 = vrot.slane %v818_v32, 7  ;;  %v900_v62 = vrot.slane %v889_v40, 6  ;;  %v904_v53 = vrot.slane %v889_v40, 7 }
 0x2de   :  { %v820_v35 = vpop.f32.mrf.mxu0  ;;  %v891_v54 = vpop.f32.mrf.mxu1 }
 0x2df   :  { %v914_v37 = vadd.f32 %v898_v33, %v3777_v36  ;;  %v918_v39 = vadd.f32 %v902_v34, %v3778_v38  ;;  %v899_v41 = vrot.slane %v820_v35, 6  ;;  %v903_v42 = vrot.slane %v820_v35, 7 }
 0x2e0   :  { %v916_v3 = vadd.f32 %v900_v62, %v3781_v2  ;;  %v920_v5 = vadd.f32 %v904_v53, %v3782_v56  ;;  %v901_v45 = vrot.slane %v891_v54, 6  ;;  %v905_v50 = vrot.slane %v891_v54, 7  ;;  %v3025_v53 = vld [vmem:[#allocation5 + $0x1e0] sm:$0xff]  ;;  %v3040_v54 = vld [vmem:[#allocation5 + $0x1d0] sm:$0xff] }
 0x2e1   :  { %v922_v43 = vmul.f32 0.5, %v914_v37  ;;  %v923_v44 = vmul.f32 0.5, %v918_v39  ;;  %v915_v6 = vadd.f32 %v899_v41, %v3779_v52  ;;  %v919_v7 = vadd.f32 %v903_v42, %v3780_v49  ;;  %v3785_v37 = vld [vmem:[#allocation51_spill] sm:$0xff]  ;;  %v3786_v41 = vld [vmem:[#allocation50_spill] sm:$0xff] }
 0x2e2   :  { %v917_v57 = vadd.f32 %v901_v45, %v3783_v51  ;;  %v921_v48 = vadd.f32 %v905_v50, %v3784_v63  ;;  %v2055_v39 = vsel %vm2054_vm3, %v3785_v37, %v2927_v61  ;;  %v2056_v42 = vsel %vm2054_vm3, %v3786_v41, %v2929_v60  ;;  %v3031_v61 = vld [vmem:[#allocation5 + $0x1c8] sm:$0xff]  ;;  %v3034_v60 = vld [vmem:[#allocation5 + $0x1d8] sm:$0xff]  ;;  %v3049_v45 = vld [vmem:[#allocation5 + $0x1a0] sm:$0xff] }
 0x2e3   :  { %2200 = vtanh.f32 %v922_v43  ;;  %v930_v46 = vmul.f32 0.5, %v915_v6  ;;  %v931_v0 = vmul.f32 0.5, %v919_v7  ;;  %v3052_v50 = vld [vmem:[#allocation5 + $0x1b0] sm:$0xff]  ;;  %v3154_v37 = vld [vmem:[#allocation5 + $0x98] sm:$0xff]  ;;  %v3163_v41 = vld [vmem:[#allocation5 + $0x68] sm:$0xff] }
 0x2e4   :  { %2202 = vtanh.f32 %v923_v44  ;;  %v940_v1 = vmul.f32 0.5, %v917_v57  ;;  %v941_v8 = vmul.f32 0.5, %v921_v48  ;;  %v3055_v57 = vld [vmem:[#allocation5 + $0x188] sm:$0xff]  ;;  %v3058_v48 = vld [vmem:[#allocation5 + $0x198] sm:$0xff]  ;;  %3795 = vst [vmem:[#allocation25_spill] sm:$0xff] %v3154_v37  ;;  %3798 = vst [vmem:[#allocation28_spill] sm:$0xff] %v3163_v41 }
 0x2e5   :  { %2204 = vtanh.f32 %v930_v46  ;;  %v3028_v46 = vld [vmem:[#allocation5 + $0x1f0] sm:$0xff] }
 0x2e6   :  { %2206 = vtanh.f32 %v931_v0  ;;  %v3037_v0 = vld [vmem:[#allocation5 + $0x1c0] sm:$0xff] }
 0x2e7   :  { %2208 = vtanh.f32 %v916_v3  ;;  %v3043_v3 = vld [vmem:[#allocation5 + $0x1a8] sm:$0xff] }
 0x2e8   :  { %2210 = vtanh.f32 %v920_v5  ;;  %v3046_v5 = vld [vmem:[#allocation5 + $0x1b8] sm:$0xff] }
 0x2e9   :  { %2212 = vtanh.f32 %v940_v1  ;;  %v3064_v1 = vld [vmem:[#allocation5 + $0x190] sm:$0xff] }
 0x2ea   :  { %2214 = vtanh.f32 %v941_v8  ;;  %v3073_v8 = vld [vmem:[#allocation5 + $0x160] sm:$0xff] }
 0x2f0   :  { %v2201_v55 = vpop.eup %2200 }
 0x2f1   :  { %v2203_v58 = vpop.eup %2202  ;;  %v926_v59 = vadd.f32 1.0, %v2201_v55  ;;  %v3061_v55 = vld [vmem:[#allocation5 + $0x180] sm:$0xff] }
 0x2f2   :  { %v927_v9 = vadd.f32 1.0, %v2203_v58  ;;  %v2205_v10 = vpop.eup %2204  ;;  %v3067_v58 = vld [vmem:[#allocation5 + $0x168] sm:$0xff] }
 0x2f3   :  { %v2207_v11 = vpop.eup %2206  ;;  %v928_v12 = vmul.f32 0.5, %v926_v59  ;;  %v934_v13 = vadd.f32 1.0, %v2205_v10  ;;  %v3070_v59 = vld [vmem:[#allocation5 + $0x178] sm:$0xff]  ;;  %v3079_v10 = vld [vmem:[#allocation5 + $0x148] sm:$0xff] }
 0x2f4   :  { %v929_v14 = vmul.f32 0.5, %v927_v9  ;;  %v935_v15 = vadd.f32 1.0, %v2207_v11  ;;  %v2209_v18 = vpop.eup %2208  ;;  %v3076_v9 = vld [vmem:[#allocation5 + $0x170] sm:$0xff]  ;;  %v3082_v11 = vld [vmem:[#allocation5 + $0x158] sm:$0xff] }
 0x2f5   :  { %v936_v16 = vmul.f32 0.5, %v934_v13  ;;  %v2211_v21 = vpop.eup %2210  ;;  %v956_v23 = vmul.f32 %v2209_v18, %v928_v12  ;;  %v3085_v12 = vld [vmem:[#allocation5 + $0x140] sm:$0xff]  ;;  %v3088_v13 = vld [vmem:[#allocation5 + $0x150] sm:$0xff]  ;;  %v3103_v18 = vld [vmem:[#allocation5 + $0x108] sm:$0xff] }
 0x2f6   :  { %v937_v19 = vmul.f32 0.5, %v935_v15  ;;  %v957_v25 = vmul.f32 %v2211_v21, %v929_v14  ;;  %v2213_v29 = vpop.eup %2212  ;;  %v3091_v14 = vld [vmem:[#allocation5 + $0x128] sm:$0xff]  ;;  %v3094_v15 = vld [vmem:[#allocation5 + $0x138] sm:$0xff]  ;;  %v3112_v21 = vld [vmem:[#allocation5 + $0x110] sm:$0xff] }
 0x2f7   :  { %v954_v22 = vmul.f32 %v950_v17, %v936_v16  ;;  %v2215_v30 = vpop.eup %2214  ;;  %v944_v47 = vadd.f32 1.0, %v2213_v29  ;;  %v3097_v16 = vld [vmem:[#allocation5 + $0x120] sm:$0xff]  ;;  %v3100_v17 = vld [vmem:[#allocation5 + $0x130] sm:$0xff]  ;;  %v3127_v29 = vld [vmem:[#allocation5 + $0xc8] sm:$0xff] }
 0x2f8   :  { %v955_v24 = vmul.f32 %v951_v20, %v937_v19  ;;  %v945_v31 = vadd.f32 1.0, %v2215_v30  ;;  %v3106_v19 = vld [vmem:[#allocation5 + $0x118] sm:$0xff]  ;;  %v3109_v20 = vld [vmem:[#allocation5 + $0x100] sm:$0xff] }
 0x2f9   :  { %v3010_v26 = vadd.f32 %v956_v23, %v954_v22  ;;  %v946_v32 = vmul.f32 0.5, %v944_v47  ;;  %v3115_v22 = vld [vmem:[#allocation5 + $0xe8] sm:$0xff]  ;;  %v3118_v23 = vld [vmem:[#allocation5 + $0xf8] sm:$0xff]  ;;  %v3133_v47 = vld [vmem:[#allocation5 + $0xc0] sm:$0xff] }
 0x2fa   :  { %v3012_v27 = vadd.f32 %v957_v25, %v955_v24  ;;  %v947_v4 = vmul.f32 0.5, %v945_v31  ;;  %v3121_v24 = vld [vmem:[#allocation5 + $0xe0] sm:$0xff]  ;;  %v3124_v25 = vld [vmem:[#allocation5 + $0xf0] sm:$0xff]  ;;  %v3130_v30 = vld [vmem:[#allocation5 + $0xd8] sm:$0xff]  ;;  %3788 = vst [vmem:[#allocation18_spill] sm:$0xff] %v3133_v47 }
 0x2fb   :  { %2216 = vtanh.f32 %v3010_v26  ;;  %3787 = vst [vmem:[#allocation17_spill] sm:$0xff] %v3130_v30  ;;  %v3136_v31 = vld [vmem:[#allocation5 + $0xd0] sm:$0xff] }
 0x2fc   :  { %2218 = vtanh.f32 %v3012_v27  ;;  %3789 = vst [vmem:[#allocation19_spill] sm:$0xff] %v3136_v31 }
 0x308   :  { %v2217_v33 = vpop.eup %2216 }
 0x309   :  { %v2219_v34 = vpop.eup %2218  ;;  %v962_v35 = vmul.f32 %v2217_v33, %v946_v32  ;;  %v3139_v32 = vld [vmem:[#allocation5 + $0xa8] sm:$0xff]  ;;  %v3142_v33 = vld [vmem:[#allocation5 + $0xb8] sm:$0xff] }
 0x30a   :  { %v963_v40 = vmul.f32 %v2219_v34, %v947_v4  ;;  %3790 = vst [vmem:[#allocation20_spill] sm:$0xff] %v3139_v32  ;;  %3791 = vst [vmem:[#allocation21_spill] sm:$0xff] %v3142_v33  ;;  %v3145_v4 = vld [vmem:[#allocation5 + $0xa0] sm:$0xff]  ;;  %v3148_v34 = vld [vmem:[#allocation5 + $0xb0] sm:$0xff] }
 0x30b   :  { %v966_v43 = vrot.slane %v962_v35, 2  ;;  %v3020_v44 = vsel %vm2057_vm4, %v2055_v39, %v962_v35  ;;  %3792 = vst [vmem:[#allocation22_spill] sm:$0xff] %v3145_v4  ;;  %3793 = vst [vmem:[#allocation23_spill] sm:$0xff] %v3148_v34  ;;  %v3151_v35 = vld [vmem:[#allocation5 + $0x88] sm:$0xff]  ;;  %v3157_v39 = vld [vmem:[#allocation5 + $0x80] sm:$0xff] }
 0x30c   :  { %v967_v62 = vrot.slane %v963_v40, 1  ;;  %v3022_v6 = vsel %vm2057_vm4, %v2056_v42, %v963_v40  ;;  %3794 = vst [vmem:[#allocation24_spill] sm:$0xff] %v3151_v35  ;;  %3796 = vst [vmem:[#allocation26_spill] sm:$0xff] %v3157_v39  ;;  %v3160_v40 = vld [vmem:[#allocation5 + $0x90] sm:$0xff]  ;;  %v3166_v42 = vld [vmem:[#allocation5 + $0x78] sm:$0xff] }
 0x30d   :  { %3797 = vst [vmem:[#allocation27_spill] sm:$0xff] %v3160_v40  ;;  %3799 = vst [vmem:[#allocation29_spill] sm:$0xff] %v3166_v42 }
 0x30e   :  { %v968_v7 = vsel %vm536_vm2, %v967_v62, %v966_v43  ;;  %v3169_v43 = vld [vmem:[#allocation5 + $0x60] sm:$0xff]  ;;  %v3172_v62 = vld [vmem:[#allocation5 + $0x70] sm:$0xff] }
 0x30f   :  { %1035 = vmatmul.mubr.f32.vlgmr.msra.gmra.mxu0 %v968_v7  ;;  %1106 = vmatmul.mubr.f32.vlgmr.msra.gmra.mxu1 %v968_v7  ;;  %3800 = vst [vmem:[#allocation30_spill] sm:$0xff] %v3169_v43  ;;  %3801 = vst [vmem:[#allocation31_spill] sm:$0xff] %v3172_v62  ;;  %v3175_v7 = vld [vmem:[#allocation5 + $0x48] sm:$0xff] }
 0x310   :  { %1189 = vmatpush1.msra.mxu0 %v3025_v53  ;;  %1260 = vmatpush1.msra.mxu1 %v3028_v46  ;;  %3802 = vst [vmem:[#allocation32_spill] sm:$0xff] %v3175_v7 }
 0x311   :  { %1190 = vmatprep.subr.mxu0 %v3031_v61  ;;  %1261 = vmatprep.subr.mxu1 %v3034_v60 }
 0x312   :  { %1191 = vmatpush1.msra.mxu0 %v3037_v0  ;;  %1262 = vmatpush1.msra.mxu1 %v3040_v54 }
 0x313   :  { %1192 = vmatprep.subr.mxu0 %v3043_v3  ;;  %1263 = vmatprep.subr.mxu1 %v3046_v5 }
 0x314   :  { %1193 = vmatpush1.msra.mxu0 %v3049_v45  ;;  %1264 = vmatpush1.msra.mxu1 %v3052_v50 }
 0x315   :  { %1194 = vmatprep.subr.mxu0 %v3055_v57  ;;  %1265 = vmatprep.subr.mxu1 %v3058_v48 }
 0x316   :  { %1195 = vmatpush1.msra.mxu0 %v3061_v55  ;;  %1266 = vmatpush1.msra.mxu1 %v3064_v1 }
 0x317   :  { %1196 = vmatprep.subr.mxu0 %v3067_v58  ;;  %1267 = vmatprep.subr.mxu1 %v3070_v59 }
 0x318   :  { %1197 = vmatpush1.msra.mxu0 %v3073_v8  ;;  %1268 = vmatpush1.msra.mxu1 %v3076_v9 }
 0x319   :  { %1198 = vmatprep.subr.mxu0 %v3079_v10  ;;  %1269 = vmatprep.subr.mxu1 %v3082_v11 }
 0x31a   :  { %1199 = vmatpush1.msra.mxu0 %v3085_v12  ;;  %1270 = vmatpush1.msra.mxu1 %v3088_v13 }
 0x31b   :  { %1200 = vmatprep.subr.mxu0 %v3091_v14  ;;  %1271 = vmatprep.subr.mxu1 %v3094_v15 }
 0x31c   :  { %1201 = vmatpush1.msra.mxu0 %v3097_v16  ;;  %1272 = vmatpush1.msra.mxu1 %v3100_v17 }
 0x31d   :  { %1202 = vmatprep.subr.mxu0 %v3103_v18  ;;  %1273 = vmatprep.subr.mxu1 %v3106_v19 }
 0x31e   :  { %1203 = vmatpush1.msra.mxu0 %v3109_v20  ;;  %1274 = vmatpush1.msra.mxu1 %v3112_v21 }
 0x31f   :  { %1204 = vmatprep.subr.mxu0 %v3115_v22  ;;  %1275 = vmatprep.subr.mxu1 %v3118_v23 }
 0x320   :  { %1205 = vmatpush1.msra.mxu0 %v3121_v24  ;;  %1276 = vmatpush1.msra.mxu1 %v3124_v25 }
 0x321   :  { %1206 = vmatprep.subr.mxu0 %v3127_v29  ;;  %1277 = vmatprep.subr.mxu1 %v3130_v30 }
 0x322   :  { %1207 = vmatpush1.msra.mxu0 %v3133_v47  ;;  %1278 = vmatpush1.msra.mxu1 %v3136_v31 }
 0x323   :  { %1208 = vmatprep.subr.mxu0 %v3139_v32  ;;  %1279 = vmatprep.subr.mxu1 %v3142_v33 }
 0x324   :  { %1209 = vmatpush1.msra.mxu0 %v3145_v4  ;;  %1280 = vmatpush1.msra.mxu1 %v3148_v34 }
 0x325   :  { %1210 = vmatprep.subr.mxu0 %v3151_v35  ;;  %1281 = vmatprep.subr.mxu1 %v3154_v37 }
 0x326   :  { %1211 = vmatpush1.msra.mxu0 %v3157_v39  ;;  %1282 = vmatpush1.msra.mxu1 %v3160_v40  ;;  %v3178_v40 = vld [vmem:[#allocation5 + $0x58] sm:$0xff] }
 0x327   :  { %1212 = vmatprep.subr.mxu0 %v3163_v41  ;;  %1283 = vmatprep.subr.mxu1 %v3166_v42  ;;  %3803 = vst [vmem:[#allocation33_spill] sm:$0xff] %v3178_v40  ;;  %v3181_v41 = vld [vmem:[#allocation5 + $0x40] sm:$0xff]  ;;  %v3184_v42 = vld [vmem:[#allocation5 + $0x50] sm:$0xff] }
 0x328   :  { %1213 = vmatpush1.msra.mxu0 %v3169_v43  ;;  %1284 = vmatpush1.msra.mxu1 %v3172_v62  ;;  %3804 = vst [vmem:[#allocation34_spill] sm:$0xff] %v3181_v41  ;;  %3805 = vst [vmem:[#allocation35_spill] sm:$0xff] %v3184_v42  ;;  %v3187_v43 = vld [vmem:[#allocation5 + $0x28] sm:$0xff]  ;;  %v3190_v62 = vld [vmem:[#allocation5 + $0x38] sm:$0xff] }
 0x329   :  { %1214 = vmatprep.subr.mxu0 %v3175_v7  ;;  %1285 = vmatprep.subr.mxu1 %v3178_v40  ;;  %3806 = vst [vmem:[#allocation36_spill] sm:$0xff] %v3187_v43  ;;  %3807 = vst [vmem:[#allocation37_spill] sm:$0xff] %v3190_v62  ;;  %v3193_v7 = vld [vmem:[#allocation5 + $0x20] sm:$0xff]  ;;  %v3196_v40 = vld [vmem:[#allocation5 + $0x30] sm:$0xff] }
 0x32a   :  { %1215 = vmatpush1.msra.mxu0 %v3181_v41  ;;  %1286 = vmatpush1.msra.mxu1 %v3184_v42  ;;  %3808 = vst [vmem:[#allocation38_spill] sm:$0xff] %v3193_v7  ;;  %3809 = vst [vmem:[#allocation39_spill] sm:$0xff] %v3196_v40  ;;  %v3199_v41 = vld [vmem:[#allocation5 + $0x8] sm:$0xff]  ;;  %v3202_v42 = vld [vmem:[#allocation5 + $0x18] sm:$0xff] }
 0x32b   :  { %1216 = vmatprep.subr.mxu0 %v3187_v43  ;;  %1287 = vmatprep.subr.mxu1 %v3190_v62  ;;  %3810 = vst [vmem:[#allocation40_spill] sm:$0xff] %v3199_v41  ;;  %3811 = vst [vmem:[#allocation41_spill] sm:$0xff] %v3202_v42  ;;  %v3205_v43 = vld [vmem:[#allocation5] sm:$0xff]  ;;  %v3209_v62 = vld [vmem:[#allocation5 + $0x10] sm:$0xff] }
 0x32c   :  { %1217 = vmatpush1.msra.mxu0 %v3193_v7  ;;  %1288 = vmatpush1.msra.mxu1 %v3196_v40  ;;  %3812 = vst [vmem:[#allocation15_spill] sm:$0xff] %v3205_v43  ;;  %3813 = vst [vmem:[#allocation16_spill] sm:$0xff] %v3209_v62  ;;  %v3213_v40 = vld [vmem:[#allocation5 + $0x1e8] sm:$0xff] }
 0x32d   :  { %1218 = vmatprep.subr.mxu0 %v3199_v41  ;;  %1289 = vmatprep.subr.mxu1 %v3202_v42  ;;  %3814 = vst [vmem:[#allocation42_spill] sm:$0xff] %v3213_v40  ;;  %v3216_v41 = vld [vmem:[#allocation5 + $0x1f8] sm:$0xff] }
 0x32e   :  { %1219 = vmatpush1.msra.mxu0 %v3205_v43  ;;  %1252 = vmatprep.mubr.f32.mxu0 %v3773_v28  ;;  %3815 = vst [vmem:[#allocation47_spill] sm:$0xff] %v3216_v41 }
 0x32f   :  { %1290 = vmatpush1.msra.mxu1 %v3209_v62  ;;  %1323 = vmatprep.mubr.f32.mxu1 %v3773_v28 }
 0x330   :  { %1406 = vmatprep.subr.mxu0 %v3213_v40  ;;  %1477 = vmatprep.subr.mxu1 %v3216_v41 }
 0x3cf   :  { %v1036_v42 = vpop.f32.mrf.mxu0  ;;  %v1107_v34 = vpop.f32.mrf.mxu1 }
 0x3d0   :  { %v1116_v7 = vrot.slane %v1036_v42, 5  ;;  %v1120_v39 = vrot.slane %v1036_v42, 6  ;;  %v1118_v32 = vrot.slane %v1107_v34, 5  ;;  %v1122_v41 = vrot.slane %v1107_v34, 6 }
 0x3d1   :  { %v1038_v43 = vpop.f32.mrf.mxu0  ;;  %v1109_v30 = vpop.f32.mrf.mxu1 }
 0x3d2   :  { %v1132_v37 = vadd.f32 %v1116_v7, %v3777_v36  ;;  %v1136_v35 = vadd.f32 %v1120_v39, %v3778_v38  ;;  %v1117_v62 = vrot.slane %v1038_v43, 5  ;;  %v1121_v4 = vrot.slane %v1038_v43, 6 }
 0x3d3   :  { %v1134_v7 = vadd.f32 %v1118_v32, %v3781_v2  ;;  %v1138_v39 = vadd.f32 %v1122_v41, %v3782_v56  ;;  %v1119_v43 = vrot.slane %v1109_v30, 5 }
 0x3d4   :  { %v1140_v28 = vmul.f32 0.5, %v1132_v37  ;;  %v1141_v33 = vmul.f32 0.5, %v1136_v35  ;;  %v1133_v40 = vadd.f32 %v1117_v62, %v3779_v52  ;;  %v1137_v31 = vadd.f32 %v1121_v4, %v3780_v49 }
 0x3d5   :  { %v1123_v37 = vrot.slane %v1109_v30, 6  ;;  %v1135_v35 = vadd.f32 %v1119_v43, %v3783_v51 }
 0x3d6   :  { %2220 = vtanh.f32 %v1140_v28  ;;  %v1148_v47 = vmul.f32 0.5, %v1133_v40  ;;  %v1149_v42 = vmul.f32 0.5, %v1137_v31 }
 0x3d7   :  { %2222 = vtanh.f32 %v1141_v33  ;;  %v1139_v4 = vadd.f32 %v1123_v37, %v3784_v63  ;;  %v1158_v34 = vmul.f32 0.5, %v1135_v35  ;;  %v1169_v37 = vrot.slane %v3012_v27, 7 }
 0x3d8   :  { %2224 = vtanh.f32 %v1148_v47 }
 0x3d9   :  { %2226 = vtanh.f32 %v1149_v42  ;;  %v1159_v31 = vmul.f32 0.5, %v1139_v4 }
 0x3da   :  { %2228 = vtanh.f32 %v1134_v7  ;;  %v1168_v7 = vrot.slane %v3010_v26, 7 }
 0x3db   :  { %2230 = vtanh.f32 %v1138_v39 }
 0x3dc   :  { %2232 = vtanh.f32 %v1158_v34 }
 0x3dd   :  { %2234 = vtanh.f32 %v1159_v31 }
 0x3e3   :  { %v2221_v28 = vpop.eup %2220 }
 0x3e4   :  { %v2223_v33 = vpop.eup %2222  ;;  %v1144_v40 = vadd.f32 1.0, %v2221_v28 }
 0x3e5   :  { %v1145_v62 = vadd.f32 1.0, %v2223_v33  ;;  %v2225_v49 = vpop.eup %2224 }
 0x3e6   :  { %v2227_v32 = vpop.eup %2226  ;;  %v1146_v47 = vmul.f32 0.5, %v1144_v40  ;;  %v1152_v2 = vadd.f32 1.0, %v2225_v49 }
 0x3e7   :  { %v1147_v41 = vmul.f32 0.5, %v1145_v62  ;;  %v1153_v42 = vadd.f32 1.0, %v2227_v32  ;;  %v2229_v39 = vpop.eup %2228 }
 0x3e8   :  { %v1154_v30 = vmul.f32 0.5, %v1152_v2  ;;  %v2231_v35 = vpop.eup %2230  ;;  %v1174_v28 = vmul.f32 %v2229_v39, %v1146_v47 }
 0x3e9   :  { %v1155_v43 = vmul.f32 0.5, %v1153_v42  ;;  %v1175_v33 = vmul.f32 %v2231_v35, %v1147_v41  ;;  %v2233_v49 = vpop.eup %2232  ;;  %v3820_v35 = vld [vmem:[#allocation21_spill] sm:$0xff] }
 0x3ea   :  { %v1172_v63 = vmul.f32 %v1168_v7, %v1154_v30  ;;  %v2235_v2 = vpop.eup %2234  ;;  %v1162_v26 = vadd.f32 1.0, %v2233_v49  ;;  %v3824_v49 = vld [vmem:[#allocation25_spill] sm:$0xff] }
 0x3eb   :  { %v1173_v4 = vmul.f32 %v1169_v37, %v1155_v43  ;;  %v1163_v34 = vadd.f32 1.0, %v2235_v2  ;;  %v3818_v43 = vld [vmem:[#allocation19_spill] sm:$0xff]  ;;  %v3819_v37 = vld [vmem:[#allocation20_spill] sm:$0xff]  ;;  %v3825_v2 = vld [vmem:[#allocation26_spill] sm:$0xff] }
 0x3ec   :  { %v3229_v51 = vadd.f32 %v1174_v28, %v1172_v63  ;;  %v1164_v31 = vmul.f32 0.5, %v1162_v26  ;;  %v3821_v28 = vld [vmem:[#allocation22_spill] sm:$0xff]  ;;  %v3826_v26 = vld [vmem:[#allocation27_spill] sm:$0xff] }
 0x3ed   :  { %v3231_v40 = vadd.f32 %v1175_v33, %v1173_v4  ;;  %v1165_v27 = vmul.f32 0.5, %v1163_v34  ;;  %v3822_v4 = vld [vmem:[#allocation23_spill] sm:$0xff]  ;;  %v3823_v33 = vld [vmem:[#allocation24_spill] sm:$0xff] }
 0x3ee   :  { %2236 = vtanh.f32 %v3229_v51  ;;  %v3827_v34 = vld [vmem:[#allocation28_spill] sm:$0xff] }
 0x3ef   :  { %2238 = vtanh.f32 %v3231_v40 }
 0x3fb   :  { %v2237_v62 = vpop.eup %2236 }
 0x3fc   :  { %v2239_v32 = vpop.eup %2238  ;;  %v1180_v47 = vmul.f32 %v2237_v62, %v1164_v31  ;;  %v3828_v31 = vld [vmem:[#allocation29_spill] sm:$0xff]  ;;  %v3829_v62 = vld [vmem:[#allocation30_spill] sm:$0xff] }
 0x3fd   :  { %v1181_v42 = vmul.f32 %v2239_v32, %v1165_v27  ;;  %v3830_v27 = vld [vmem:[#allocation31_spill] sm:$0xff]  ;;  %v3831_v32 = vld [vmem:[#allocation32_spill] sm:$0xff] }
 0x3fe   :  { %v1184_v41 = vrot.slane %v1180_v47, 3  ;;  %v3236_v63 = vsel %vm2060_vm5, %v3020_v44, %v1180_v47  ;;  %v3816_v44 = vld [vmem:[#allocation17_spill] sm:$0xff] }
 0x3ff   :  { %v1185_v30 = vrot.slane %v1181_v42, 2  ;;  %v3239_v7 = vsel %vm2060_vm5, %v3022_v6, %v1181_v42  ;;  %v3817_v6 = vld [vmem:[#allocation18_spill] sm:$0xff]  ;;  %v3832_v47 = vld [vmem:[#allocation33_spill] sm:$0xff] }
 0x400   :  { %v3833_v42 = vld [vmem:[#allocation34_spill] sm:$0xff] }
 0x401   :  { %v1186_v39 = vsel %vm536_vm2, %v1185_v30, %v1184_v41  ;;  %v3834_v41 = vld [vmem:[#allocation35_spill] sm:$0xff]  ;;  %v3835_v30 = vld [vmem:[#allocation36_spill] sm:$0xff] }
 0x402   :  { %1253 = vmatmul.mubr.f32.vlgmr.msra.gmra.mxu0 %v1186_v39  ;;  %1324 = vmatmul.mubr.f32.vlgmr.msra.gmra.mxu1 %v1186_v39  ;;  %v3836_v39 = vld [vmem:[#allocation37_spill] sm:$0xff] }
 0x403   :  { %1407 = vmatpush1.msra.mxu0 %v3025_v53  ;;  %1478 = vmatpush1.msra.mxu1 %v3028_v46 }
 0x404   :  { %1408 = vmatprep.subr.mxu0 %v3031_v61  ;;  %1479 = vmatprep.subr.mxu1 %v3034_v60 }
 0x405   :  { %1409 = vmatpush1.msra.mxu0 %v3037_v0  ;;  %1480 = vmatpush1.msra.mxu1 %v3040_v54 }
 0x406   :  { %1410 = vmatprep.subr.mxu0 %v3043_v3  ;;  %1481 = vmatprep.subr.mxu1 %v3046_v5 }
 0x407   :  { %1411 = vmatpush1.msra.mxu0 %v3049_v45  ;;  %1482 = vmatpush1.msra.mxu1 %v3052_v50 }
 0x408   :  { %1412 = vmatprep.subr.mxu0 %v3055_v57  ;;  %1483 = vmatprep.subr.mxu1 %v3058_v48 }
 0x409   :  { %1413 = vmatpush1.msra.mxu0 %v3061_v55  ;;  %1484 = vmatpush1.msra.mxu1 %v3064_v1 }
 0x40a   :  { %1414 = vmatprep.subr.mxu0 %v3067_v58  ;;  %1485 = vmatprep.subr.mxu1 %v3070_v59 }
 0x40b   :  { %1415 = vmatpush1.msra.mxu0 %v3073_v8  ;;  %1486 = vmatpush1.msra.mxu1 %v3076_v9 }
 0x40c   :  { %1416 = vmatprep.subr.mxu0 %v3079_v10  ;;  %1487 = vmatprep.subr.mxu1 %v3082_v11 }
 0x40d   :  { %1417 = vmatpush1.msra.mxu0 %v3085_v12  ;;  %1488 = vmatpush1.msra.mxu1 %v3088_v13 }
 0x40e   :  { %1418 = vmatprep.subr.mxu0 %v3091_v14  ;;  %1489 = vmatprep.subr.mxu1 %v3094_v15 }
 0x40f   :  { %1419 = vmatpush1.msra.mxu0 %v3097_v16  ;;  %1490 = vmatpush1.msra.mxu1 %v3100_v17 }
 0x410   :  { %1420 = vmatprep.subr.mxu0 %v3103_v18  ;;  %1491 = vmatprep.subr.mxu1 %v3106_v19 }
 0x411   :  { %1421 = vmatpush1.msra.mxu0 %v3109_v20  ;;  %1492 = vmatpush1.msra.mxu1 %v3112_v21 }
 0x412   :  { %1422 = vmatprep.subr.mxu0 %v3115_v22  ;;  %1493 = vmatprep.subr.mxu1 %v3118_v23 }
 0x413   :  { %1423 = vmatpush1.msra.mxu0 %v3121_v24  ;;  %1494 = vmatpush1.msra.mxu1 %v3124_v25 }
 0x414   :  { %1424 = vmatprep.subr.mxu0 %v3127_v29  ;;  %1495 = vmatprep.subr.mxu1 %v3816_v44 }
 0x415   :  { %1425 = vmatpush1.msra.mxu0 %v3817_v6  ;;  %1496 = vmatpush1.msra.mxu1 %v3818_v43  ;;  %v3847_v43 = vld [vmem:[#allocation46_spill] sm:$0xff] }
 0x416   :  { %1426 = vmatprep.subr.mxu0 %v3819_v37  ;;  %1497 = vmatprep.subr.mxu1 %v3820_v35 }
 0x417   :  { %1427 = vmatpush1.msra.mxu0 %v3821_v28  ;;  %1498 = vmatpush1.msra.mxu1 %v3822_v4  ;;  %v3846_v28 = vld [vmem:[#allocation45_spill] sm:$0xff] }
 0x418   :  { %1428 = vmatprep.subr.mxu0 %v3823_v33  ;;  %1499 = vmatprep.subr.mxu1 %v3824_v49 }
 0x419   :  { %1429 = vmatpush1.msra.mxu0 %v3825_v2  ;;  %1500 = vmatpush1.msra.mxu1 %v3826_v26  ;;  %v3837_v26 = vld [vmem:[#allocation38_spill] sm:$0xff] }
 0x41a   :  { %1430 = vmatprep.subr.mxu0 %v3827_v34  ;;  %1501 = vmatprep.subr.mxu1 %v3828_v31  ;;  %v3838_v34 = vld [vmem:[#allocation39_spill] sm:$0xff]  ;;  %v3839_v31 = vld [vmem:[#allocation40_spill] sm:$0xff] }
 0x41b   :  { %1431 = vmatpush1.msra.mxu0 %v3829_v62  ;;  %1502 = vmatpush1.msra.mxu1 %v3830_v27  ;;  %v3840_v62 = vld [vmem:[#allocation41_spill] sm:$0xff]  ;;  %v3841_v27 = vld [vmem:[#allocation15_spill] sm:$0xff] }
 0x41c   :  { %1432 = vmatprep.subr.mxu0 %v3831_v32  ;;  %1503 = vmatprep.subr.mxu1 %v3832_v47  ;;  %v3842_v32 = vmov 0.0   ;;  %v3843_v47 = vld [vmem:[#allocation16_spill] sm:$0xff] }
 0x41d   :  { %1433 = vmatpush1.msra.mxu0 %v3833_v42  ;;  %1504 = vmatpush1.msra.mxu1 %v3834_v41  ;;  %v3844_v41 = vld [vmem:[#allocation42_spill] sm:$0xff] }
 0x41e   :  { %1434 = vmatprep.subr.mxu0 %v3835_v30  ;;  %1505 = vmatprep.subr.mxu1 %v3836_v39  ;;  %v3845_v30 = vld [vmem:[#allocation47_spill] sm:$0xff] }
 0x41f   :  { %1435 = vmatpush1.msra.mxu0 %v3837_v26  ;;  %1506 = vmatpush1.msra.mxu1 %v3838_v34 }
 0x420   :  { %1436 = vmatprep.subr.mxu0 %v3839_v31  ;;  %1507 = vmatprep.subr.mxu1 %v3840_v62 }
 0x421   :  { %1437 = vmatpush1.msra.mxu0 %v3841_v27  ;;  %1470 = vmatprep.mubr.f32.mxu0 %v3842_v32 }
 0x422   :  { %1508 = vmatpush1.msra.mxu1 %v3843_v47  ;;  %1541 = vmatprep.mubr.f32.mxu1 %v3842_v32 }
 0x423   :  { %1624 = vmatprep.subr.mxu0 %v3844_v41  ;;  %1695 = vmatprep.subr.mxu1 %v3845_v30 }
 0x4c2   :  { %v1254_v39 = vpop.f32.mrf.mxu0  ;;  %v1325_v2 = vpop.f32.mrf.mxu1 }
 0x4c3   :  { %v1334_v26 = vrot.slane %v1254_v39, 4  ;;  %v1338_v42 = vrot.slane %v1254_v39, 5  ;;  %v1336_v47 = vrot.slane %v1325_v2, 4  ;;  %v1340_v30 = vrot.slane %v1325_v2, 5 }
 0x4c4   :  { %v1256_v34 = vpop.f32.mrf.mxu0  ;;  %v1327_v37 = vpop.f32.mrf.mxu1 }
 0x4c5   :  { %v1350_v31 = vadd.f32 %v1334_v26, %v3777_v36  ;;  %v1354_v62 = vadd.f32 %v1338_v42, %v3778_v38  ;;  %v1335_v27 = vrot.slane %v1256_v34, 4  ;;  %v1339_v49 = vrot.slane %v1256_v34, 5 }
 0x4c6   :  { %v1352_v26 = vadd.f32 %v1336_v47, %v3847_v43  ;;  %v1356_v42 = vadd.f32 %v1340_v30, %v3782_v56  ;;  %v1337_v34 = vrot.slane %v1327_v37, 4 }
 0x4c7   :  { %v1358_v33 = vmul.f32 0.5, %v1350_v31  ;;  %v1359_v4 = vmul.f32 0.5, %v1354_v62  ;;  %v1351_v32 = vadd.f32 %v1335_v27, %v3779_v52  ;;  %v1355_v41 = vadd.f32 %v1339_v49, %v3846_v28  ;;  %v3848_v62 = vld [vmem:[#allocation49_spill] sm:$0xff]  ;;  %v3849_v52 = vld [vmem:[#allocation48_spill] sm:$0xff] }
 0x4c8   :  { %v1341_v31 = vrot.slane %v1327_v37, 5  ;;  %v1353_v27 = vadd.f32 %v1337_v34, %v3848_v62 }
 0x4c9   :  { %2240 = vtanh.f32 %v1358_v33  ;;  %v1366_v35 = vmul.f32 0.5, %v1351_v32  ;;  %v1367_v39 = vmul.f32 0.5, %v1355_v41 }
 0x4ca   :  { %2242 = vtanh.f32 %v1359_v4  ;;  %v1357_v49 = vadd.f32 %v1341_v31, %v3849_v52  ;;  %v1376_v2 = vmul.f32 0.5, %v1353_v27  ;;  %v1387_v31 = vrot.slane %v3231_v40, 7 }
 0x4cb   :  { %2244 = vtanh.f32 %v1366_v35 }
 0x4cc   :  { %2246 = vtanh.f32 %v1367_v39  ;;  %v1377_v41 = vmul.f32 0.5, %v1357_v49 }
 0x4cd   :  { %2248 = vtanh.f32 %v1352_v26  ;;  %v1386_v26 = vrot.slane %v3229_v51, 7 }
 0x4ce   :  { %2250 = vtanh.f32 %v1356_v42 }
 0x4cf   :  { %2252 = vtanh.f32 %v1376_v2 }
 0x4d0   :  { %2254 = vtanh.f32 %v1377_v41 }
 0x4d6   :  { %v2241_v33 = vpop.eup %2240 }
 0x4d7   :  { %v2243_v4 = vpop.eup %2242  ;;  %v1362_v32 = vadd.f32 1.0, %v2241_v33 }
 0x4d8   :  { %v1363_v28 = vadd.f32 1.0, %v2243_v4  ;;  %v2245_v38 = vpop.eup %2244 }
 0x4d9   :  { %v2247_v47 = vpop.eup %2246  ;;  %v1364_v35 = vmul.f32 0.5, %v1362_v32  ;;  %v1370_v43 = vadd.f32 1.0, %v2245_v38 }
 0x4da   :  { %v1365_v30 = vmul.f32 0.5, %v1363_v28  ;;  %v1371_v39 = vadd.f32 1.0, %v2247_v47  ;;  %v2249_v42 = vpop.eup %2248 }
 0x4db   :  { %v1372_v37 = vmul.f32 0.5, %v1370_v43  ;;  %v2251_v27 = vpop.eup %2250  ;;  %v1392_v33 = vmul.f32 %v2249_v42, %v1364_v35 }
 0x4dc   :  { %v1373_v34 = vmul.f32 0.5, %v1371_v39  ;;  %v1393_v4 = vmul.f32 %v2251_v27, %v1365_v30  ;;  %v2253_v38 = vpop.eup %2252  ;;  %v3854_v27 = vld [vmem:[#allocation23_spill] sm:$0xff] }
 0x4dd   :  { %v1390_v52 = vmul.f32 %v1386_v26, %v1372_v37  ;;  %v2255_v43 = vpop.eup %2254  ;;  %v1380_v51 = vadd.f32 1.0, %v2253_v38  ;;  %v3858_v38 = vld [vmem:[#allocation27_spill] sm:$0xff] }
 0x4de   :  { %v1391_v49 = vmul.f32 %v1387_v31, %v1373_v34  ;;  %v1381_v28 = vadd.f32 1.0, %v2255_v43  ;;  %v3852_v34 = vld [vmem:[#allocation21_spill] sm:$0xff]  ;;  %v3853_v31 = vld [vmem:[#allocation22_spill] sm:$0xff]  ;;  %v3859_v43 = vld [vmem:[#allocation28_spill] sm:$0xff] }
 0x4df   :  { %v3318_v62 = vadd.f32 %v1392_v33, %v1390_v52  ;;  %v1382_v2 = vmul.f32 0.5, %v1380_v51  ;;  %v3855_v33 = vld [vmem:[#allocation24_spill] sm:$0xff]  ;;  %v3860_v51 = vld [vmem:[#allocation29_spill] sm:$0xff] }
 0x4e0   :  { %v3320_v32 = vadd.f32 %v1393_v4, %v1391_v49  ;;  %v1383_v40 = vmul.f32 0.5, %v1381_v28  ;;  %v3856_v49 = vld [vmem:[#allocation25_spill] sm:$0xff]  ;;  %v3857_v4 = vld [vmem:[#allocation26_spill] sm:$0xff] }
 0x4e1   :  { %2256 = vtanh.f32 %v3318_v62  ;;  %v3861_v28 = vld [vmem:[#allocation30_spill] sm:$0xff] }
 0x4e2   :  { %2258 = vtanh.f32 %v3320_v32 }
 0x4ee   :  { %v2257_v41 = vpop.eup %2256 }
 0x4ef   :  { %v2259_v47 = vpop.eup %2258  ;;  %v1398_v39 = vmul.f32 %v2257_v41, %v1382_v2  ;;  %v3862_v2 = vld [vmem:[#allocation31_spill] sm:$0xff]  ;;  %v3863_v41 = vld [vmem:[#allocation32_spill] sm:$0xff] }
 0x4f0   :  { %v1399_v35 = vmul.f32 %v2259_v47, %v1383_v40  ;;  %v3864_v40 = vld [vmem:[#allocation33_spill] sm:$0xff]  ;;  %v3865_v47 = vld [vmem:[#allocation34_spill] sm:$0xff] }
 0x4f1   :  { %v1402_v37 = vrot.slane %v1398_v39, 4  ;;  %v3326_v52 = vsel %vm143_vm0, %v3236_v63, %v1398_v39  ;;  %v3850_v63 = vld [vmem:[#allocation19_spill] sm:$0xff] }
 0x4f2   :  { %v1403_v30 = vrot.slane %v1399_v35, 3  ;;  %v3330_v26 = vsel %vm143_vm0, %v3239_v7, %v1399_v35  ;;  %v3851_v7 = vld [vmem:[#allocation20_spill] sm:$0xff]  ;;  %v3866_v39 = vld [vmem:[#allocation35_spill] sm:$0xff] }
 0x4f3   :  { %v3867_v35 = vld [vmem:[#allocation36_spill] sm:$0xff] }
 0x4f4   :  { %v1404_v42 = vsel %vm536_vm2, %v1403_v30, %v1402_v37  ;;  %v3868_v37 = vld [vmem:[#allocation37_spill] sm:$0xff]  ;;  %v3869_v30 = vld [vmem:[#allocation38_spill] sm:$0xff] }
 0x4f5   :  { %1471 = vmatmul.mubr.f32.vlgmr.msra.gmra.mxu0 %v1404_v42  ;;  %1542 = vmatmul.mubr.f32.vlgmr.msra.gmra.mxu1 %v1404_v42  ;;  %v3870_v42 = vld [vmem:[#allocation39_spill] sm:$0xff] }
 0x4f6   :  { %1625 = vmatpush1.msra.mxu0 %v3025_v53  ;;  %1696 = vmatpush1.msra.mxu1 %v3028_v46 }
 0x4f7   :  { %1626 = vmatprep.subr.mxu0 %v3031_v61  ;;  %1697 = vmatprep.subr.mxu1 %v3034_v60 }
 0x4f8   :  { %1627 = vmatpush1.msra.mxu0 %v3037_v0  ;;  %1698 = vmatpush1.msra.mxu1 %v3040_v54 }
 0x4f9   :  { %1628 = vmatprep.subr.mxu0 %v3043_v3  ;;  %1699 = vmatprep.subr.mxu1 %v3046_v5 }
 0x4fa   :  { %1629 = vmatpush1.msra.mxu0 %v3049_v45  ;;  %1700 = vmatpush1.msra.mxu1 %v3052_v50 }
 0x4fb   :  { %1630 = vmatprep.subr.mxu0 %v3055_v57  ;;  %1701 = vmatprep.subr.mxu1 %v3058_v48 }
 0x4fc   :  { %1631 = vmatpush1.msra.mxu0 %v3061_v55  ;;  %1702 = vmatpush1.msra.mxu1 %v3064_v1 }
 0x4fd   :  { %1632 = vmatprep.subr.mxu0 %v3067_v58  ;;  %1703 = vmatprep.subr.mxu1 %v3070_v59 }
 0x4fe   :  { %1633 = vmatpush1.msra.mxu0 %v3073_v8  ;;  %1704 = vmatpush1.msra.mxu1 %v3076_v9 }
 0x4ff   :  { %1634 = vmatprep.subr.mxu0 %v3079_v10  ;;  %1705 = vmatprep.subr.mxu1 %v3082_v11 }
 0x500   :  { %1635 = vmatpush1.msra.mxu0 %v3085_v12  ;;  %1706 = vmatpush1.msra.mxu1 %v3088_v13 }
 0x501   :  { %1636 = vmatprep.subr.mxu0 %v3091_v14  ;;  %1707 = vmatprep.subr.mxu1 %v3094_v15 }
 0x502   :  { %1637 = vmatpush1.msra.mxu0 %v3097_v16  ;;  %1708 = vmatpush1.msra.mxu1 %v3100_v17 }
 0x503   :  { %1638 = vmatprep.subr.mxu0 %v3103_v18  ;;  %1709 = vmatprep.subr.mxu1 %v3106_v19 }
 0x504   :  { %1639 = vmatpush1.msra.mxu0 %v3109_v20  ;;  %1710 = vmatpush1.msra.mxu1 %v3112_v21 }
 0x505   :  { %1640 = vmatprep.subr.mxu0 %v3115_v22  ;;  %1711 = vmatprep.subr.mxu1 %v3118_v23 }
 0x506   :  { %1641 = vmatpush1.msra.mxu0 %v3121_v24  ;;  %1712 = vmatpush1.msra.mxu1 %v3124_v25 }
 0x507   :  { %1642 = vmatprep.subr.mxu0 %v3127_v29  ;;  %1713 = vmatprep.subr.mxu1 %v3816_v44 }
 0x508   :  { %1643 = vmatpush1.msra.mxu0 %v3817_v6  ;;  %1714 = vmatpush1.msra.mxu1 %v3850_v63  ;;  %v3881_v63 = vld [vmem:[#allocation46_spill] sm:$0xff] }
 0x509   :  { %1644 = vmatprep.subr.mxu0 %v3851_v7  ;;  %1715 = vmatprep.subr.mxu1 %v3852_v34 }
 0x50a   :  { %1645 = vmatpush1.msra.mxu0 %v3853_v31  ;;  %1716 = vmatpush1.msra.mxu1 %v3854_v27  ;;  %v3879_v27 = vld [vmem:[#allocation44_spill] sm:$0xff]  ;;  %v3880_v31 = vld [vmem:[#allocation45_spill] sm:$0xff] }
 0x50b   :  { %1646 = vmatprep.subr.mxu0 %v3855_v33  ;;  %1717 = vmatprep.subr.mxu1 %v3856_v49 }
 0x50c   :  { %1647 = vmatpush1.msra.mxu0 %v3857_v4  ;;  %1718 = vmatpush1.msra.mxu1 %v3858_v38 }
 0x50d   :  { %1648 = vmatprep.subr.mxu0 %v3859_v43  ;;  %1719 = vmatprep.subr.mxu1 %v3860_v51  ;;  %v3871_v51 = vld [vmem:[#allocation40_spill] sm:$0xff]  ;;  %v3878_v43 = vld [vmem:[#allocation43_spill] sm:$0xff] }
 0x50e   :  { %1649 = vmatpush1.msra.mxu0 %v3861_v28  ;;  %1720 = vmatpush1.msra.mxu1 %v3862_v2  ;;  %v3872_v28 = vld [vmem:[#allocation41_spill] sm:$0xff]  ;;  %v3873_v2 = vld [vmem:[#allocation15_spill] sm:$0xff] }
 0x50f   :  { %1650 = vmatprep.subr.mxu0 %v3863_v41  ;;  %1721 = vmatprep.subr.mxu1 %v3864_v40  ;;  %v3874_v41 = vmov 0.0   ;;  %v3875_v40 = vld [vmem:[#allocation16_spill] sm:$0xff] }
 0x510   :  { %1651 = vmatpush1.msra.mxu0 %v3865_v47  ;;  %1722 = vmatpush1.msra.mxu1 %v3866_v39  ;;  %v3876_v39 = vld [vmem:[#allocation42_spill] sm:$0xff] }
 0x511   :  { %1652 = vmatprep.subr.mxu0 %v3867_v35  ;;  %1723 = vmatprep.subr.mxu1 %v3868_v37  ;;  %v3877_v35 = vld [vmem:[#allocation47_spill] sm:$0xff] }
 0x512   :  { %1653 = vmatpush1.msra.mxu0 %v3869_v30  ;;  %1724 = vmatpush1.msra.mxu1 %v3870_v42 }
 0x513   :  { %1654 = vmatprep.subr.mxu0 %v3871_v51  ;;  %1725 = vmatprep.subr.mxu1 %v3872_v28 }
 0x514   :  { %1655 = vmatpush1.msra.mxu0 %v3873_v2  ;;  %1688 = vmatprep.mubr.f32.mxu0 %v3874_v41 }
 0x515   :  { %1726 = vmatpush1.msra.mxu1 %v3875_v40  ;;  %1759 = vmatprep.mubr.f32.mxu1 %v3874_v41 }
 0x516   :  { %1842 = vmatprep.subr.mxu0 %v3876_v39  ;;  %1913 = vmatprep.subr.mxu1 %v3877_v35 }
 0x5b5   :  { %v1472_v37 = vpop.f32.mrf.mxu0  ;;  %v1543_v38 = vpop.f32.mrf.mxu1 }
 0x5b6   :  { %v1552_v30 = vrot.slane %v1472_v37, 3  ;;  %v1556_v47 = vrot.slane %v1472_v37, 4  ;;  %v1554_v40 = vrot.slane %v1543_v38, 3  ;;  %v1558_v35 = vrot.slane %v1543_v38, 4 }
 0x5b7   :  { %v1474_v42 = vpop.f32.mrf.mxu0  ;;  %v1545_v7 = vpop.f32.mrf.mxu1 }
 0x5b8   :  { %v1568_v51 = vadd.f32 %v1552_v30, %v3777_v36  ;;  %v1572_v28 = vadd.f32 %v1556_v47, %v3878_v43  ;;  %v1553_v2 = vrot.slane %v1474_v42, 3  ;;  %v1557_v4 = vrot.slane %v1474_v42, 4 }
 0x5b9   :  { %v1570_v30 = vadd.f32 %v1554_v40, %v3881_v63  ;;  %v1574_v47 = vadd.f32 %v1558_v35, %v3782_v56  ;;  %v1555_v42 = vrot.slane %v1545_v7, 3 }
 0x5ba   :  { %v1576_v49 = vmul.f32 0.5, %v1568_v51  ;;  %v1577_v33 = vmul.f32 0.5, %v1572_v28  ;;  %v1569_v41 = vadd.f32 %v1553_v2, %v3879_v27  ;;  %v1573_v39 = vadd.f32 %v1557_v4, %v3880_v31  ;;  %v3882_v28 = vld [vmem:[#allocation49_spill] sm:$0xff]  ;;  %v3883_v27 = vld [vmem:[#allocation48_spill] sm:$0xff] }
 0x5bb   :  { %v1559_v51 = vrot.slane %v1545_v7, 4  ;;  %v1571_v2 = vadd.f32 %v1555_v42, %v3882_v28 }
 0x5bc   :  { %2260 = vtanh.f32 %v1576_v49  ;;  %v1584_v34 = vmul.f32 0.5, %v1569_v41  ;;  %v1585_v37 = vmul.f32 0.5, %v1573_v39 }
 0x5bd   :  { %2262 = vtanh.f32 %v1577_v33  ;;  %v1575_v4 = vadd.f32 %v1559_v51, %v3883_v27  ;;  %v1594_v38 = vmul.f32 0.5, %v1571_v2  ;;  %v1605_v51 = vrot.slane %v3320_v32, 7 }
 0x5be   :  { %2264 = vtanh.f32 %v1584_v34 }
 0x5bf   :  { %2266 = vtanh.f32 %v1585_v37  ;;  %v1595_v39 = vmul.f32 0.5, %v1575_v4 }
 0x5c0   :  { %2268 = vtanh.f32 %v1570_v30  ;;  %v1604_v30 = vrot.slane %v3318_v62, 7 }
 0x5c1   :  { %2270 = vtanh.f32 %v1574_v47 }
 0x5c2   :  { %2272 = vtanh.f32 %v1594_v38 }
 0x5c3   :  { %2274 = vtanh.f32 %v1595_v39 }
 0x5c9   :  { %v2261_v49 = vpop.eup %2260 }
 0x5ca   :  { %v2263_v33 = vpop.eup %2262  ;;  %v1580_v41 = vadd.f32 1.0, %v2261_v49 }
 0x5cb   :  { %v1581_v31 = vadd.f32 1.0, %v2263_v33  ;;  %v2265_v43 = vpop.eup %2264 }
 0x5cc   :  { %v2267_v40 = vpop.eup %2266  ;;  %v1582_v34 = vmul.f32 0.5, %v1580_v41  ;;  %v1588_v63 = vadd.f32 1.0, %v2265_v43 }
 0x5cd   :  { %v1583_v35 = vmul.f32 0.5, %v1581_v31  ;;  %v1589_v37 = vadd.f32 1.0, %v2267_v40  ;;  %v2269_v47 = vpop.eup %2268 }
 0x5ce   :  { %v1590_v7 = vmul.f32 0.5, %v1588_v63  ;;  %v2271_v2 = vpop.eup %2270  ;;  %v1610_v49 = vmul.f32 %v2269_v47, %v1582_v34 }
 0x5cf   :  { %v1591_v42 = vmul.f32 0.5, %v1589_v37  ;;  %v1611_v33 = vmul.f32 %v2271_v2, %v1583_v35  ;;  %v2273_v63 = vpop.eup %2272  ;;  %v3912_v2 = vld [vmem:[#allocation45_spill] sm:$0xff] }
 0x5d0   :  { %v1608_v27 = vmul.f32 %v1604_v30, %v1590_v7  ;;  %v2275_v31 = vpop.eup %2274  ;;  %v1598_v62 = vadd.f32 1.0, %v2273_v63 }
 0x5d1   :  { %v1609_v4 = vmul.f32 %v1605_v51, %v1591_v42  ;;  %v1599_v43 = vadd.f32 1.0, %v2275_v31  ;;  %v3911_v42 = vld [vmem:[#allocation44_spill] sm:$0xff] }
 0x5d2   :  { %v3409_v28 = vadd.f32 %v1610_v49, %v1608_v27  ;;  %v1600_v38 = vmul.f32 0.5, %v1598_v62  ;;  %v3913_v62 = vld [vmem:[#allocation46_spill] sm:$0xff] }
 0x5d3   :  { %v3411_v41 = vadd.f32 %v1611_v33, %v1609_v4  ;;  %v1601_v32 = vmul.f32 0.5, %v1599_v43 }
 0x5d4   :  { %2276 = vtanh.f32 %v3409_v28 }
 0x5d5   :  { %2278 = vtanh.f32 %v3411_v41 }
 0x5e1   :  { %v2277_v39 = vpop.eup %2276 }
 0x5e2   :  { %v2279_v40 = vpop.eup %2278  ;;  %v1616_v34 = vmul.f32 %v2277_v39, %v1600_v38 }
 0x5e3   :  { %v1617_v37 = vmul.f32 %v2279_v40, %v1601_v32  ;;  %v3914_v40 = vld [vmem:[#allocation49_spill] sm:$0xff] }
 0x5e4   :  { %v1620_v35 = vrot.slane %v1616_v34, 5  ;;  %v3416_v27 = vsel %vm2065_vm6, %v3326_v52, %v1616_v34 }
 0x5e5   :  { %v1621_v7 = vrot.slane %v1617_v37, 4  ;;  %v3419_v30 = vsel %vm2065_vm6, %v3330_v26, %v1617_v37  ;;  %v3915_v37 = vld [vmem:[#allocation48_spill] sm:$0xff] }
 0x5e7   :  { %v1622_v47 = vsel %vm536_vm2, %v1621_v7, %v1620_v35 }
 0x5e8   :  { %1689 = vmatmul.mubr.f32.vlgmr.msra.gmra.mxu0 %v1622_v47  ;;  %1760 = vmatmul.mubr.f32.vlgmr.msra.gmra.mxu1 %v1622_v47 }
 0x5e9   :  { %1843 = vmatpush1.msra.mxu0 %v3025_v53  ;;  %1914 = vmatpush1.msra.mxu1 %v3028_v46  ;;  %v3884_v53 = vld [vmem:[#allocation19_spill] sm:$0xff]  ;;  %v3885_v46 = vld [vmem:[#allocation20_spill] sm:$0xff] }
 0x5ea   :  { %1844 = vmatprep.subr.mxu0 %v3031_v61  ;;  %1915 = vmatprep.subr.mxu1 %v3034_v60  ;;  %v3886_v61 = vld [vmem:[#allocation21_spill] sm:$0xff]  ;;  %v3887_v60 = vld [vmem:[#allocation22_spill] sm:$0xff] }
 0x5eb   :  { %1845 = vmatpush1.msra.mxu0 %v3037_v0  ;;  %1916 = vmatpush1.msra.mxu1 %v3040_v54  ;;  %v3888_v0 = vld [vmem:[#allocation23_spill] sm:$0xff]  ;;  %v3889_v54 = vld [vmem:[#allocation24_spill] sm:$0xff] }
 0x5ec   :  { %1846 = vmatprep.subr.mxu0 %v3043_v3  ;;  %1917 = vmatprep.subr.mxu1 %v3046_v5  ;;  %v3890_v3 = vld [vmem:[#allocation25_spill] sm:$0xff]  ;;  %v3891_v5 = vld [vmem:[#allocation26_spill] sm:$0xff] }
 0x5ed   :  { %1847 = vmatpush1.msra.mxu0 %v3049_v45  ;;  %1918 = vmatpush1.msra.mxu1 %v3052_v50  ;;  %v3892_v45 = vld [vmem:[#allocation27_spill] sm:$0xff]  ;;  %v3893_v50 = vld [vmem:[#allocation28_spill] sm:$0xff] }
 0x5ee   :  { %1848 = vmatprep.subr.mxu0 %v3055_v57  ;;  %1919 = vmatprep.subr.mxu1 %v3058_v48  ;;  %v3894_v57 = vld [vmem:[#allocation29_spill] sm:$0xff]  ;;  %v3895_v48 = vld [vmem:[#allocation30_spill] sm:$0xff] }
 0x5ef   :  { %1849 = vmatpush1.msra.mxu0 %v3061_v55  ;;  %1920 = vmatpush1.msra.mxu1 %v3064_v1  ;;  %v3896_v55 = vld [vmem:[#allocation31_spill] sm:$0xff]  ;;  %v3897_v1 = vld [vmem:[#allocation32_spill] sm:$0xff] }
 0x5f0   :  { %1850 = vmatprep.subr.mxu0 %v3067_v58  ;;  %1921 = vmatprep.subr.mxu1 %v3070_v59  ;;  %v3898_v58 = vld [vmem:[#allocation33_spill] sm:$0xff]  ;;  %v3899_v59 = vld [vmem:[#allocation34_spill] sm:$0xff] }
 0x5f1   :  { %1851 = vmatpush1.msra.mxu0 %v3073_v8  ;;  %1922 = vmatpush1.msra.mxu1 %v3076_v9  ;;  %v3900_v8 = vld [vmem:[#allocation35_spill] sm:$0xff]  ;;  %v3901_v9 = vld [vmem:[#allocation36_spill] sm:$0xff] }
 0x5f2   :  { %1852 = vmatprep.subr.mxu0 %v3079_v10  ;;  %1923 = vmatprep.subr.mxu1 %v3082_v11  ;;  %v3902_v10 = vld [vmem:[#allocation37_spill] sm:$0xff]  ;;  %v3903_v11 = vld [vmem:[#allocation38_spill] sm:$0xff] }
 0x5f3   :  { %1853 = vmatpush1.msra.mxu0 %v3085_v12  ;;  %1924 = vmatpush1.msra.mxu1 %v3088_v13  ;;  %v3904_v12 = vld [vmem:[#allocation39_spill] sm:$0xff]  ;;  %v3905_v13 = vld [vmem:[#allocation40_spill] sm:$0xff] }
 0x5f4   :  { %1854 = vmatprep.subr.mxu0 %v3091_v14  ;;  %1925 = vmatprep.subr.mxu1 %v3094_v15  ;;  %v3906_v14 = vld [vmem:[#allocation41_spill] sm:$0xff]  ;;  %v3907_v15 = vld [vmem:[#allocation15_spill] sm:$0xff] }
 0x5f5   :  { %1855 = vmatpush1.msra.mxu0 %v3097_v16  ;;  %1926 = vmatpush1.msra.mxu1 %v3100_v17  ;;  %v3908_v16 = vmov 0.0   ;;  %v3909_v17 = vld [vmem:[#allocation16_spill] sm:$0xff] }
 0x5f6   :  { %1856 = vmatprep.subr.mxu0 %v3103_v18  ;;  %1927 = vmatprep.subr.mxu1 %v3106_v19 }
 0x5f7   :  { %1857 = vmatpush1.msra.mxu0 %v3109_v20  ;;  %1928 = vmatpush1.msra.mxu1 %v3112_v21 }
 0x5f8   :  { %1858 = vmatprep.subr.mxu0 %v3115_v22  ;;  %1929 = vmatprep.subr.mxu1 %v3118_v23  ;;  %v3910_v23 = vld [vmem:[#allocation43_spill] sm:$0xff] }
 0x5f9   :  { %1859 = vmatpush1.msra.mxu0 %v3121_v24  ;;  %1930 = vmatpush1.msra.mxu1 %v3124_v25 }
 0x5fa   :  { %1860 = vmatprep.subr.mxu0 %v3127_v29  ;;  %1931 = vmatprep.subr.mxu1 %v3816_v44 }
 0x5fb   :  { %1861 = vmatpush1.msra.mxu0 %v3817_v6  ;;  %1932 = vmatpush1.msra.mxu1 %v3884_v53 }
 0x5fc   :  { %1862 = vmatprep.subr.mxu0 %v3885_v46  ;;  %1933 = vmatprep.subr.mxu1 %v3886_v61 }
 0x5fd   :  { %1863 = vmatpush1.msra.mxu0 %v3887_v60  ;;  %1934 = vmatpush1.msra.mxu1 %v3888_v0 }
 0x5fe   :  { %1864 = vmatprep.subr.mxu0 %v3889_v54  ;;  %1935 = vmatprep.subr.mxu1 %v3890_v3 }
 0x5ff   :  { %1865 = vmatpush1.msra.mxu0 %v3891_v5  ;;  %1936 = vmatpush1.msra.mxu1 %v3892_v45 }
 0x600   :  { %1866 = vmatprep.subr.mxu0 %v3893_v50  ;;  %1937 = vmatprep.subr.mxu1 %v3894_v57 }
 0x601   :  { %1867 = vmatpush1.msra.mxu0 %v3895_v48  ;;  %1938 = vmatpush1.msra.mxu1 %v3896_v55  ;;  %v1822_v48 = vrot.slane %v3409_v28, 7 }
 0x602   :  { %1868 = vmatprep.subr.mxu0 %v3897_v1  ;;  %1939 = vmatprep.subr.mxu1 %v3898_v58  ;;  %v1823_v58 = vrot.slane %v3411_v41, 7 }
 0x603   :  { %1869 = vmatpush1.msra.mxu0 %v3899_v59  ;;  %1940 = vmatpush1.msra.mxu1 %v3900_v8 }
 0x604   :  { %1870 = vmatprep.subr.mxu0 %v3901_v9  ;;  %1941 = vmatprep.subr.mxu1 %v3902_v10 }
 0x605   :  { %1871 = vmatpush1.msra.mxu0 %v3903_v11  ;;  %1942 = vmatpush1.msra.mxu1 %v3904_v12 }
 0x606   :  { %1872 = vmatprep.subr.mxu0 %v3905_v13  ;;  %1943 = vmatprep.subr.mxu1 %v3906_v14 }
 0x607   :  { %1873 = vmatpush1.msra.mxu0 %v3907_v15  ;;  %1906 = vmatprep.mubr.f32.mxu0 %v3908_v16 }
 0x608   :  { %1944 = vmatpush1.msra.mxu1 %v3909_v17  ;;  %1977 = vmatprep.mubr.f32.mxu1 %v3908_v16 }
 0x6a8   :  { %v1690_v18 = vpop.f32.mrf.mxu0  ;;  %v1761_v25 = vpop.f32.mrf.mxu1 }
 0x6a9   :  { %v1770_v19 = vrot.slane %v1690_v18, 2  ;;  %v1774_v20 = vrot.slane %v1690_v18, 3  ;;  %v1772_v26 = vrot.slane %v1761_v25, 2  ;;  %v1776_v4 = vrot.slane %v1761_v25, 3 }
 0x6aa   :  { %v1692_v21 = vpop.f32.mrf.mxu0  ;;  %v1763_v31 = vpop.f32.mrf.mxu1 }
 0x6ab   :  { %v1786_v22 = vadd.f32 %v1770_v19, %v3777_v36  ;;  %v1790_v24 = vadd.f32 %v1774_v20, %v3910_v23  ;;  %v1771_v29 = vrot.slane %v1692_v21, 2  ;;  %v1775_v44 = vrot.slane %v1692_v21, 3 }
 0x6ac   :  { %v1788_v43 = vadd.f32 %v1772_v26, %v3913_v62  ;;  %v1792_v38 = vadd.f32 %v1776_v4, %v3782_v56  ;;  %v1773_v39 = vrot.slane %v1763_v31, 2  ;;  %v1777_v32 = vrot.slane %v1763_v31, 3 }
 0x6ad   :  { %v1794_v6 = vmul.f32 0.5, %v1786_v22  ;;  %v1795_v52 = vmul.f32 0.5, %v1790_v24  ;;  %v1787_v51 = vadd.f32 %v1771_v29, %v3911_v42  ;;  %v1791_v49 = vadd.f32 %v1775_v44, %v3912_v2 }
 0x6ae   :  { %v1789_v34 = vadd.f32 %v1773_v39, %v3914_v40  ;;  %v1793_v35 = vadd.f32 %v1777_v32, %v3915_v37 }
 0x6af   :  { %2280 = vtanh.f32 %v1794_v6  ;;  %v1802_v33 = vmul.f32 0.5, %v1787_v51  ;;  %v1803_v63 = vmul.f32 0.5, %v1791_v49 }
 0x6b0   :  { %2282 = vtanh.f32 %v1795_v52  ;;  %v1812_v47 = vmul.f32 0.5, %v1789_v34  ;;  %v1813_v61 = vmul.f32 0.5, %v1793_v35 }
 0x6b1   :  { %2284 = vtanh.f32 %v1802_v33 }
 0x6b2   :  { %2286 = vtanh.f32 %v1803_v63 }
 0x6b3   :  { %2288 = vtanh.f32 %v1788_v43 }
 0x6b4   :  { %2290 = vtanh.f32 %v1792_v38 }
 0x6b5   :  { %2292 = vtanh.f32 %v1812_v47 }
 0x6b6   :  { %2294 = vtanh.f32 %v1813_v61 }
 0x6bc   :  { %v2281_v7 = vpop.eup %2280 }
 0x6bd   :  { %v2283_v53 = vpop.eup %2282  ;;  %v1798_v46 = vadd.f32 1.0, %v2281_v7 }
 0x6be   :  { %v1799_v60 = vadd.f32 1.0, %v2283_v53  ;;  %v2285_v0 = vpop.eup %2284 }
 0x6bf   :  { %v2287_v54 = vpop.eup %2286  ;;  %v1800_v3 = vmul.f32 0.5, %v1798_v46  ;;  %v1806_v5 = vadd.f32 1.0, %v2285_v0 }
 0x6c0   :  { %v1801_v45 = vmul.f32 0.5, %v1799_v60  ;;  %v1807_v50 = vadd.f32 1.0, %v2287_v54  ;;  %v2289_v55 = vpop.eup %2288 }
 0x6c1   :  { %v1808_v57 = vmul.f32 0.5, %v1806_v5  ;;  %v2291_v59 = vpop.eup %2290  ;;  %v1828_v9 = vmul.f32 %v2289_v55, %v1800_v3 }
 0x6c2   :  { %v1809_v1 = vmul.f32 0.5, %v1807_v50  ;;  %v1829_v11 = vmul.f32 %v2291_v59, %v1801_v45  ;;  %v2293_v14 = vpop.eup %2292 }
 0x6c3   :  { %v1826_v8 = vmul.f32 %v1822_v48, %v1808_v57  ;;  %v2295_v15 = vpop.eup %2294  ;;  %v1816_v28 = vadd.f32 1.0, %v2293_v14 }
 0x6c4   :  { %v1827_v10 = vmul.f32 %v1823_v58, %v1809_v1  ;;  %v1817_v16 = vadd.f32 1.0, %v2295_v15 }
 0x6c5   :  { %v3496_v12 = vadd.f32 %v1828_v9, %v1826_v8  ;;  %v1818_v17 = vmul.f32 0.5, %v1816_v28 }
 0x6c6   :  { %v3498_v13 = vadd.f32 %v1829_v11, %v1827_v10  ;;  %v1819_v41 = vmul.f32 0.5, %v1817_v16 }
 0x6c7   :  { %2296 = vtanh.f32 %v3496_v12  ;;  %v2040_v55 = vrot.slane %v3496_v12, 7 }
 0x6c8   :  { %2298 = vtanh.f32 %v3498_v13 }
 0x6d4   :  { %v2297_v18 = vpop.eup %2296 }
 0x6d5   :  { %v2299_v19 = vpop.eup %2298  ;;  %v1834_v20 = vmul.f32 %v2297_v18, %v1818_v17 }
 0x6d6   :  { %v1835_v21 = vmul.f32 %v2299_v19, %v1819_v41 }
 0x6d7   :  { %v1838_v22 = vrot.slane %v1834_v20, 6  ;;  %v3503_v24 = vsel %vm2068_vm7, %v3416_v27, %v1834_v20 }
 0x6d8   :  { %v1839_v25 = vrot.slane %v1835_v21, 5  ;;  %v3506_v29 = vsel %vm2068_vm7, %v3419_v30, %v1835_v21 }
 0x6da   :  { %v1840_v44 = vsel %vm536_vm2, %v1839_v25, %v1838_v22 }
 0x6db   :  { %1907 = vmatmul.mubr.f32.vlgmr.msra.gmra.mxu0 %v1840_v44  ;;  %1978 = vmatmul.mubr.f32.vlgmr.msra.gmra.mxu1 %v1840_v44 }
 0x79b   :  { %v1908_v6 = vpop.f32.mrf.mxu0  ;;  %v1979_v33 = vpop.f32.mrf.mxu1 }
 0x79c   :  { %v1988_v52 = vrot.slane %v1908_v6, 1  ;;  %v1992_v26 = vrot.slane %v1908_v6, 2  ;;  %v1990_v38 = vrot.slane %v1979_v33, 1  ;;  %v1994_v32 = vrot.slane %v1979_v33, 2 }
 0x79d   :  { %v1910_v51 = vpop.f32.mrf.mxu0  ;;  %v1981_v7 = vpop.f32.mrf.mxu1 }
 0x79e   :  { %v2004_v49 = vadd.f32 %v1988_v52, %v3777_v36  ;;  %v2008_v4 = vadd.f32 %v1992_v26, %v3910_v23  ;;  %v1989_v63 = vrot.slane %v1910_v51, 1  ;;  %v1993_v27 = vrot.slane %v1910_v51, 2 }
 0x79f   :  { %v2006_v36 = vadd.f32 %v1990_v38, %v3913_v62  ;;  %v2010_v23 = vadd.f32 %v1994_v32, %v3782_v56  ;;  %v1991_v47 = vrot.slane %v1981_v7, 1  ;;  %v1995_v53 = vrot.slane %v1981_v7, 2 }
 0x7a0   :  { %v2012_v31 = vmul.f32 0.5, %v2004_v49  ;;  %v2013_v43 = vmul.f32 0.5, %v2008_v4  ;;  %v2005_v30 = vadd.f32 %v1989_v63, %v3911_v42  ;;  %v2009_v39 = vadd.f32 %v1993_v27, %v3912_v2 }
 0x7a1   :  { %v2007_v42 = vadd.f32 %v1991_v47, %v3914_v40  ;;  %v2011_v2 = vadd.f32 %v1995_v53, %v3915_v37  ;;  %v2041_v37 = vrot.slane %v3498_v13, 7 }
 0x7a2   :  { %2300 = vtanh.f32 %v2012_v31  ;;  %v2020_v34 = vmul.f32 0.5, %v2005_v30  ;;  %v2021_v35 = vmul.f32 0.5, %v2009_v39 }
 0x7a3   :  { %2302 = vtanh.f32 %v2013_v43  ;;  %v2030_v61 = vmul.f32 0.5, %v2007_v42  ;;  %v2031_v54 = vmul.f32 0.5, %v2011_v2 }
 0x7a4   :  { %2304 = vtanh.f32 %v2020_v34 }
 0x7a5   :  { %2306 = vtanh.f32 %v2021_v35 }
 0x7a6   :  { %2308 = vtanh.f32 %v2006_v36 }
 0x7a7   :  { %2310 = vtanh.f32 %v2010_v23 }
 0x7a8   :  { %2312 = vtanh.f32 %v2030_v61 }
 0x7a9   :  { %2314 = vtanh.f32 %v2031_v54 }
 0x7af   :  { %v2301_v46 = vpop.eup %2300 }
 0x7b0   :  { %v2303_v60 = vpop.eup %2302  ;;  %v2016_v0 = vadd.f32 1.0, %v2301_v46 }
 0x7b1   :  { %v2017_v3 = vadd.f32 1.0, %v2303_v60  ;;  %v2305_v5 = vpop.eup %2304 }
 0x7b2   :  { %v2307_v62 = vpop.eup %2306  ;;  %v2018_v45 = vmul.f32 0.5, %v2016_v0  ;;  %v2024_v50 = vadd.f32 1.0, %v2305_v5 }
 0x7b3   :  { %v2019_v56 = vmul.f32 0.5, %v2017_v3  ;;  %v2025_v57 = vadd.f32 1.0, %v2307_v62  ;;  %v2309_v40 = vpop.eup %2308 }
 0x7b4   :  { %v2026_v48 = vmul.f32 0.5, %v2024_v50  ;;  %v2311_v58 = vpop.eup %2310  ;;  %v2046_v8 = vmul.f32 %v2309_v40, %v2018_v45 }
 0x7b5   :  { %v2027_v1 = vmul.f32 0.5, %v2025_v57  ;;  %v2047_v10 = vmul.f32 %v2311_v58, %v2019_v56  ;;  %v2313_v28 = vpop.eup %2312 }
 0x7b6   :  { %v2044_v59 = vmul.f32 %v2040_v55, %v2026_v48  ;;  %v2315_v16 = vpop.eup %2314  ;;  %v2034_v17 = vadd.f32 1.0, %v2313_v28 }
 0x7b7   :  { %v2045_v9 = vmul.f32 %v2041_v37, %v2027_v1  ;;  %v2035_v12 = vadd.f32 1.0, %v2315_v16 }
 0x7b8   :  { %v2048_v11 = vadd.f32 %v2046_v8, %v2044_v59  ;;  %v2036_v41 = vmul.f32 0.5, %v2034_v17 }
 0x7b9   :  { %v2049_v14 = vadd.f32 %v2047_v10, %v2045_v9  ;;  %v2037_v19 = vmul.f32 0.5, %v2035_v12 }
 0x7ba   :  { %2316 = vtanh.f32 %v2048_v11  ;;  %2088 = vst [vmem:[#allocation4 - $0x7] sm:$0x80] %v2048_v11 }
 0x7bb   :  { %2318 = vtanh.f32 %v2049_v14  ;;  %v2085_v15 = vrot.slane %v2049_v14, 7 }
 0x7bd   :  { %2089 = vst [vmem:[#allocation4 + $0x1] sm:$0x1] %v2085_v15 }
 0x7c4   :  { %v2095_v18 = vld [vmem:[#allocation4] sm:$0x3] }
 0x7c5   :  { %2096 = vst [vmem:[#allocation11] sm:$0x3] %v2095_v18 }
 0x7c7   :  { %v2317_v13 = vpop.eup %2316 }
 0x7c8   :  { %v2319_v20 = vpop.eup %2318  ;;  %v2052_v21 = vmul.f32 %v2317_v13, %v2036_v41 }
 0x7c9   :  { %v2053_v22 = vmul.f32 %v2319_v20, %v2037_v19 }
 0x7ca   :  { %2081 = vst [vmem:[#allocation3 - $0x7] sm:$0x80] %v2052_v21  ;;  %v2072_v25 = vsel %vm2071_vm8, %v3503_v24, %v2052_v21 }
 0x7cb   :  { %v2078_v44 = vrot.slane %v2053_v22, 7  ;;  %v2073_v6 = vsel %vm2071_vm8, %v3506_v29, %v2053_v22  ;;  %2074 = vst [vmem:[#allocation8] sm:$0xff] %v2072_v25 }
 0x7cc   :  { %2075 = vst [vmem:[#allocation8 + $0x8] sm:$0xff] %v2073_v6 }
 0x7cd   :  { %2082 = vst [vmem:[#allocation3 + $0x1] sm:$0x1] %v2078_v44 }
 0x7ce   :  { %2415 = shalt.err (!%p2412_p9)
}
 0x7cf   :  { %s2475_s13 = smov 128   ;;  %s2476_s14 = smov 8  }
 0x7d0   :  { %2108 = dma.vmem_to_hbm [thread:$0]  %s2103_s11, 256, %s3534_s4, [#allocation7], %s2475_s13, %s2475_s13, %s2476_s14  }
 0x7d1   :  { %s2477_s17 = smov [#allocation9]   ;;  %s2478_s19 = smov [#allocation11]  }
 0x7d2   :  { %s2115_s18 = sshll.u32 %s2477_s17, 4  ;;  %s2125_s20 = sshll.u32 %s2478_s19, 4  ;;  %s2116_s18 = int_to_ptr.vmem [resolvable:$true] %s2115_s18  ;;  %s2126_s20 = int_to_ptr.vmem [resolvable:$true] %s2125_s20 }
 0x7d3   :  { %s2424_s21 = scalar_lea.vmem %s2116_s18, 32  ;;  %p2429_p11 = scmp.lt.s32.totalorder %s2116_s18, %s2116_s18 }
 0x7d4   :  { %v2093_v24 = vld [vmem:[#allocation3] sm:$0x3]  ;;  %p2425_p10 = scmp.ne.s32.totalorder %s2116_s18, %s2424_s21  ;;  %p2430_p12 = scmp.lt.s32.totalorder %s2424_s21, %s2424_s21 }
 0x7d5   :  { %2094 = vst [vmem:[#allocation9] sm:$0x3] %v2093_v24 }
 0x7d6   :  { %p2431_p13 = por %p2430_p12, %p2429_p11 }
 0x7d8   :  { %p2432_p0 = pnand %p2431_p13, %p2425_p10 }
 0x7da   :  { %2435 = shalt.err (!%p2432_p0)
}
 0x7db   :  { %2118 = dma.vmem_to_hbm [thread:$0]  %s2116_s18, 32, %s3535_s5, [#allocation10]  }
 0x7dc   :  { %s2444_s4 = scalar_lea.vmem %s2126_s20, 32  ;;  %p2449_p2 = scmp.lt.s32.totalorder %s2126_s20, %s2126_s20 }
 0x7dd   :  { %p2445_p1 = scmp.ne.s32.totalorder %s2126_s20, %s2444_s4  ;;  %p2450_p3 = scmp.lt.s32.totalorder %s2444_s4, %s2444_s4 }
 0x7df   :  { %p2451_p4 = por %p2450_p3, %p2449_p2 }
 0x7e1   :  { %p2452_p5 = pnand %p2451_p4, %p2445_p1 }
 0x7e3   :  { %2455 = shalt.err (!%p2452_p5)
}
 0x7e4   :  { %2128 = dma.vmem_to_hbm [thread:$0]  %s2126_s20, 32, %s3536_s6, [#allocation10]  }
 0x7e5   :  { %2466 = dma.done.wait [#allocation7], 256  }
 0x7e6   :  { %2467 = vsyncadd [#allocation7], 4294967040 }
 0x7e7   :  { %2468 = dma.done.wait [#allocation10], 64  }
 0x7e8   :  { %2469 = vsyncadd [#allocation10], 4294967232 }
 0x7e9   :  { %2138 = vsyncpa [#allocation6], 1 }
 0x7ea   :  { %2139 = vsyncpa [#allocation7], 1 }
 0x7eb   :  { %2140 = vsyncpa [#allocation10], 1 }

</bundles_post_ra>
